<compile_context>
chip_gen: v7x
topology: tpu7x:2x2x1
jax: 0.10.0
libtpu: 0.0.40
codegen_flags: <defaults>
</compile_context>

<pallas_src>
import functools

import numpy as np
import jax
import jax.numpy as jnp
from jax import lax
from jax.experimental import pallas as pl
from jax.experimental.pallas import tpu as pltpu

F32 = jnp.float32
EPS = 1e-5

S_HEADS = ["degree", "hlb_s", "hub_s", "lb_s", "ub_s"]
T_HEADS = ["weights", "hlb_t", "hub_t", "c", "lb_t", "ub_t", "t", "logits"]


def _round_up(n, m):
    return ((n + m - 1) // m) * m


def _dot(a, b):
    return jnp.dot(a, b, preferred_element_type=jnp.float32)


def _vmem_specs(n):
    return [pl.BlockSpec(memory_space=pltpu.MemorySpace.VMEM) for _ in range(n)]


# ----------------------------------------------------------------------------
# Kernel 1: fused graph stage (Fourier embed + all BipartiteGraphConv layers)
# ----------------------------------------------------------------------------
def _graph_kernel(xs_ref, xt_ref, ms_ref, mt_ref, ea_ref,
                  src_c_ref, tgt_c_ref, src_r_ref, tgt_r_ref,
                  wl_ref, bl_ref, we_ref, wr_ref, wf_ref, bf_ref,
                  w1a_ref, w1b_ref, b1_ref, w2_ref, b2_ref, lnw_ref, lnb_ref,
                  out_s_ref, out_t_ref):
    L = out_s_ref.shape[0]
    E = ea_ref.shape[0]
    Ns = xs_ref.shape[0]
    Nt = xt_ref.shape[0]

    def fourier(x, m):
        # FourierEncoder: multiscale == x @ M (M folds the column tiling and 1/scale),
        # then [sin | cos] assembled via two constant projection matmuls (avoids
        # lane-axis concatenation inside the kernel).
        msx = _dot(x, m)                                   # (N, H/2)
        dl = m.shape[1]
        row = lax.broadcasted_iota(jnp.int32, (dl, 2 * dl), 0)
        col = lax.broadcasted_iota(jnp.int32, (dl, 2 * dl), 1)
        p_sin = (col == row).astype(F32)                   # sin block -> cols [0, dl)
        p_cos = (col == row + dl).astype(F32)              # cos block -> cols [dl, 2dl)
        return _dot(jnp.sin(msx), p_sin) + _dot(jnp.cos(msx), p_cos)

    hs = fourier(xs_ref[...], ms_ref[...])                 # (Ns, H)
    ht = fourier(xt_ref[...], mt_ref[...])                 # (Nt, H)
    e = ea_ref[...]                                        # (E, 1)

    # Gather / scatter one-hot matrices built in-register from iota (padded edges
    # carry index -1 and therefore contribute nothing).
    g_src = (src_c_ref[...] == lax.broadcasted_iota(jnp.int32, (E, Ns), 1)).astype(F32)
    g_tgt = (tgt_c_ref[...] == lax.broadcasted_iota(jnp.int32, (E, Nt), 1)).astype(F32)
    s_src = (src_r_ref[...] == lax.broadcasted_iota(jnp.int32, (Ns, E), 0)).astype(F32)
    s_tgt = (tgt_r_ref[...] == lax.broadcasted_iota(jnp.int32, (Nt, E), 0)).astype(F32)

    def conv(c, left, right, g_left, g_right, scat):
        # message = feature_module_final( fm_left(x_i) + fm_edge(e) + fm_right(x_j) )
        # (PreNorm scale of fm_final already folded into wl/bl/we/wr at param setup)
        i_lin = _dot(right, wl_ref[c]) + bl_ref[c]         # per-target-node Linear
        j_lin = _dot(left, wr_ref[c])                      # per-source-node Linear
        pre = (_dot(g_right, i_lin)                        # gather x_i terms
               + _dot(g_left, j_lin)                       # gather x_j terms
               + e * we_ref[c])                            # Linear(1, H, no bias)
        msg = _dot(jnp.maximum(pre, 0.0), wf_ref[c]) + bf_ref[c]     # (E, H)
        agg = _dot(scat, msg)                              # scatter-add -> (N_right, H)
        # output_module(cat([post_conv(agg), right])): split matmul (post scale folded
        # into w1a) -> ReLU -> Linear -> LayerNorm
        z = _dot(agg, w1a_ref[c]) + _dot(right, w1b_ref[c]) + b1_ref[c]
        y = _dot(jnp.maximum(z, 0.0), w2_ref[c]) + b2_ref[c]
        mu = jnp.mean(y, axis=-1, keepdims=True)
        var = jnp.mean((y - mu) * (y - mu), axis=-1, keepdims=True)
        return (y - mu) * lax.rsqrt(var + EPS) * lnw_ref[c] + lnb_ref[c]

    for l in range(L):
        # conv_s_t[l]: left = x_s, right = x_t (edges src -> tgt)
        out_t_ref[l] = conv(2 * l, hs, ht, g_src, g_tgt, s_tgt)
        # conv_t_s[l]: left = x_t, right = x_s (inverse edges tgt -> src)
        out_s_ref[l] = conv(2 * l + 1, ht, hs, g_tgt, g_src, s_src)


def run_graph(inputs, L, ns_pad, nt_pad, H):
    return pl.pallas_call(
        _graph_kernel,
        out_shape=(jax.ShapeDtypeStruct((L, ns_pad, H), F32),
                   jax.ShapeDtypeStruct((L, nt_pad, H), F32)),
        in_specs=_vmem_specs(len(inputs)),
        out_specs=(pl.BlockSpec(memory_space=pltpu.MemorySpace.VMEM),
                   pl.BlockSpec(memory_space=pltpu.MemorySpace.VMEM)),
    )(*inputs)


# ----------------------------------------------------------------------------
# Kernel 2: fused head stage (mlp_hx + fc_hx + all K heads for one node set)
# ----------------------------------------------------------------------------
def _make_heads_kernel(n_real, L):
    def heads_kernel(conv_ref, z_ref, w1hx_ref, b1hx_ref, ghx_ref, bhx_ref,
                     fcw_ref, fcb_ref, w1h_ref, w1z_ref, b1h_ref, gh_ref, bh_ref,
                     w2bd_ref, b2h_ref, out_ref):
        n_pad = z_ref.shape[0]
        mask = (lax.broadcasted_iota(jnp.int32, (n_pad, 1), 0) < n_real).astype(F32)
        inv_n = 1.0 / float(n_real)

        def batchnorm(x, gamma, beta):
            # training-mode BatchNorm1d over the n_real valid rows (biased variance)
            mu = jnp.sum(x * mask, axis=0, keepdims=True) * inv_n
            d = (x - mu) * mask
            var = jnp.sum(d * d, axis=0, keepdims=True) * inv_n
            return (x - mu) * lax.rsqrt(var + EPS) * gamma + beta

        # mlp_hx: Linear over JK('cat') (split per layer -> no concat needed) + BN + ReLU
        a = b1hx_ref[...]
        for l in range(L):
            a = a + _dot(conv_ref[l], w1hx_ref[l])
        a = jnp.maximum(batchnorm(a, ghx_ref[...], bhx_ref[...]), 0.0)
        # fc_hx
        h = _dot(a, fcw_ref[...]) + fcb_ref[...]                        # (N, mlp_out)

        # all K heads at once: cat([h, z]) @ W1_all == h @ W1h_all + z @ W1z_all
        u = _dot(h, w1h_ref[...]) + _dot(z_ref[...], w1z_ref[...]) + b1h_ref[...]
        # per-column BN over the concatenated (N, K*M) block == per-head BatchNorm1d
        u = jnp.maximum(batchnorm(u, gh_ref[...], bh_ref[...]), 0.0)
        # block-diagonal second Linear -> lane-dense (N, K) output slab
        out_ref[...] = _dot(u, w2bd_ref[...]) + b2h_ref[...]
    return heads_kernel


def run_heads(inputs, n_real, L, n_pad, K):
    return pl.pallas_call(
        _make_heads_kernel(n_real, L),
        out_shape=jax.ShapeDtypeStruct((n_pad, K), F32),
        in_specs=_vmem_specs(len(inputs)),
        out_specs=pl.BlockSpec(memory_space=pltpu.MemorySpace.VMEM),
    )(*inputs)


# ----------------------------------------------------------------------------
# parameters (deterministic synthetic init; PyTorch Linear(out,in) stored as (in,out))
# ----------------------------------------------------------------------------
def init_decoder_params(key, num_layers, hidden_dim, mlp_hidden_dim, mlp_out_dim, enc_dim):
    keys = iter(jax.random.split(key, 1024))

    def nrm(shape, s=0.1):
        return jax.random.normal(next(keys), shape, F32) * s

    H, M, D = hidden_dim, mlp_hidden_dim, mlp_out_dim
    C = 2 * num_layers  # conv index c = 2*l -> conv_s_t[l], c = 2*l+1 -> conv_t_s[l]

    def conv_one():
        scale_f = 1.0      # PreNormLayer(1, shift=False) inside feature_module_final
        post_scale = 1.0   # post_conv_module PreNormLayer — both folded into weights
        return dict(
            wl=nrm((H, H)) * scale_f, bl=nrm((1, H)) * scale_f,   # feature_module_left
            we=nrm((1, H)) * scale_f,                              # feature_module_edge (no bias)
            wr=nrm((H, H)) * scale_f,                              # feature_module_right (no bias)
            wf=nrm((H, H)), bf=nrm((1, H)),                        # feature_module_final Linear
            w1a=nrm((H, H)) * post_scale, w1b=nrm((H, H)), b1=nrm((1, H)),  # Linear(2H,H) split
            w2=nrm((H, H)), b2=nrm((1, H)),                        # Linear(H,H)
            lnw=jnp.ones((1, H), F32), lnb=jnp.zeros((1, H), F32), # LayerNorm(H)
        )

    convs = [conv_one() for _ in range(C)]
    conv_stacked = {k: jnp.stack([cv[k] for cv in convs], axis=0) for k in convs[0]}

    def hx_params():
        return dict(
            w1=nrm((num_layers, H, M)),                 # Linear(jk_dim, M) split per JK layer
            b1=nrm((1, M)),
            gamma=jnp.ones((1, M), F32), beta=jnp.zeros((1, M), F32),   # BatchNorm1d(M)
            fcw=nrm((M, D)), fcb=nrm((1, D)),           # fc_hx
        )

    def head_pack(names):
        K = len(names)
        w1h, w1z, b1, gam, bet, w2cols, b2 = [], [], [], [], [], [], []
        for _ in names:
            w1 = nrm((D + enc_dim, M))                  # Linear(mlp_out+enc, M)
            w1h.append(w1[:D]); w1z.append(w1[D:])
            b1.append(nrm((1, M)))
            gam.append(jnp.ones((1, M), F32)); bet.append(jnp.zeros((1, M), F32))
            w2cols.append(nrm((M, 1)))                  # Linear(M, 1)
            b2.append(nrm((1, 1)))
        w2bd = jnp.zeros((K * M, K), F32)
        for k in range(K):
            w2bd = w2bd.at[k * M:(k + 1) * M, k:k + 1].set(w2cols[k])
        return dict(
            w1h=jnp.concatenate(w1h, axis=1), w1z=jnp.concatenate(w1z, axis=1),
            b1=jnp.concatenate(b1, axis=1),
            gamma=jnp.concatenate(gam, axis=1), beta=jnp.concatenate(bet, axis=1),
            w2bd=w2bd, b2=jnp.concatenate(b2, axis=1),
        )

    return dict(conv=conv_stacked, hxs=hx_params(), hxt=hx_params(),
                heads_s=head_pack(S_HEADS), heads_t=head_pack(T_HEADS))


# ----------------------------------------------------------------------------
# Decoder forward
# ----------------------------------------------------------------------------
def decoder_forward(params, cfg, masked_x_s, masked_x_t, masked_edge_index,
                    masked_edge_attr, xs_z, xt_z):
    H, L = cfg["hidden_dim"], cfg["num_layers"]
    Ns, ds = masked_x_s.shape
    Nt, dt = masked_x_t.shape
    E = masked_edge_index.shape[1]
    Ns_p, Nt_p, E_p = _round_up(Ns, 8), _round_up(Nt, 8), _round_up(E, 8)

    # ---- one-time glue: pad rows/edges to sublane multiples (masked inside kernels) ----
    xs = jnp.pad(masked_x_s.astype(F32), ((0, Ns_p - Ns), (0, 0)))
    xt = jnp.pad(masked_x_t.astype(F32), ((0, Nt_p - Nt), (0, 0)))
    zs = jnp.pad(xs_z.astype(F32), ((0, Ns_p - Ns), (0, 0)))
    zt = jnp.pad(xt_z.astype(F32), ((0, Nt_p - Nt), (0, 0)))
    ea = jnp.pad(masked_edge_attr.astype(F32), ((0, E_p - E), (0, 0)))
    src = jnp.pad(masked_edge_index[0].astype(jnp.int32), (0, E_p - E), constant_values=-1)
    tgt = jnp.pad(masked_edge_index[1].astype(jnp.int32), (0, E_p - E), constant_values=-1)

    def fourier_mat(d, hidden):
        # FourierEncoder(level = hidden / (2*d)); scales = 2**arange(-level/2, level/2)
        level = hidden / (2 * d)
        scales = 2.0 ** np.arange(-level / 2, level / 2, dtype=np.float32)
        m = np.zeros((d, d * len(scales)), np.float32)
        for k, s in enumerate(scales):
            for i in range(d):
                m[i, k * d + i] = 1.0 / s
        return jnp.asarray(m)

    ms, mt = fourier_mat(ds, H), fourier_mat(dt, H)

    cp = params["conv"]
    graph_inputs = [
        xs, xt, ms, mt, ea,
        src.reshape(E_p, 1), tgt.reshape(E_p, 1),       # gather layouts
        src.reshape(1, E_p), tgt.reshape(1, E_p),       # scatter layouts
        cp["wl"], cp["bl"], cp["we"], cp["wr"], cp["wf"], cp["bf"],
        cp["w1a"], cp["w1b"], cp["b1"], cp["w2"], cp["b2"], cp["lnw"], cp["lnb"],
    ]
    conv_s, conv_t = run_graph(graph_inputs, L, Ns_p, Nt_p, H)   # (L, N_pad, H) each

    def head_inputs(conv, z, hx, hd):
        return [conv, z, hx["w1"], hx["b1"], hx["gamma"], hx["beta"], hx["fcw"], hx["fcb"],
                hd["w1h"], hd["w1z"], hd["b1"], hd["gamma"], hd["beta"], hd["w2bd"], hd["b2"]]

    out_s = run_heads(head_inputs(conv_s, zs, params["hxs"], params["heads_s"]),
                      Ns, L, Ns_p, len(S_HEADS))                 # (Ns_pad, 5)
    out_t = run_heads(head_inputs(conv_t, zt, params["hxt"], params["heads_t"]),
                      Nt, L, Nt_p, len(T_HEADS))                 # (Nt_pad, 8)

    s_map = {name: out_s[:Ns, k:k + 1] for k, name in enumerate(S_HEADS)}
    t_map = {name: out_t[:Nt, k:k + 1] for k, name in enumerate(T_HEADS)}

    return (s_map["degree"], t_map["weights"], s_map["hlb_s"], s_map["hub_s"],
            s_map["lb_s"], s_map["ub_s"], t_map["hlb_t"], t_map["hub_t"],
            t_map["c"], t_map["lb_t"], t_map["ub_t"], t_map["t"], t_map["logits"])


# ----------------------------------------------------------------------------
# main
# ----------------------------------------------------------------------------
if __name__ == "__main__":
    cfg = dict(
        input_dim_xs=2,
        input_dim_xt=2,
        input_dim_edge=1,
        num_layers=2,
        hidden_dim=32,
        mlp_hidden_dim=32,   # must equal hidden_dim (BatchNorm1d(hidden_dim) inside heads)
        mlp_out_dim=8,
        enc_dim=4,
    )
    Ns, Nt, E = 12, 10, 24

    key = jax.random.PRNGKey(0)
    kp, k1, k2, k3, k4, k5, k6, k7 = jax.random.split(key, 8)

    params = init_decoder_params(kp, cfg["num_layers"], cfg["hidden_dim"],
                                 cfg["mlp_hidden_dim"], cfg["mlp_out_dim"],
                                 cfg["enc_dim"])

    masked_x_s = jax.random.normal(k1, (Ns, cfg["input_dim_xs"]), F32)
    masked_x_t = jax.random.normal(k2, (Nt, cfg["input_dim_xt"]), F32)
    src = jax.random.randint(k3, (E,), 0, Ns, dtype=jnp.int32)
    tgt = jax.random.randint(k4, (E,), 0, Nt, dtype=jnp.int32)
    masked_edge_index = jnp.stack([src, tgt], axis=0)
    masked_edge_attr = jax.random.normal(k5, (E, cfg["input_dim_edge"]), F32)
    xs_z = jax.random.normal(k6, (Ns, cfg["enc_dim"]), F32)
    xt_z = jax.random.normal(k7, (Nt, cfg["enc_dim"]), F32)

    fwd = jax.jit(functools.partial(decoder_forward, params, cfg))
    preds = fwd(masked_x_s, masked_x_t, masked_edge_index, masked_edge_attr, xs_z, xt_z)
    jax.block_until_ready(preds)

    assert len(preds) == 13
    s_idx = {0, 2, 3, 4, 5}   # heads over x_s nodes
    for i, p in enumerate(preds):
        expect = (Ns, 1) if i in s_idx else (Nt, 1)
        assert p.shape == expect, (i, p.shape, expect)
        assert bool(jnp.all(jnp.isfinite(p)))
    print("KERNEL_OK")
</pallas_src>

<mosaic_0001>
module attributes {stable_mosaic.version = 11 : i64} {
  func.func @heads_kernel(%arg0: memref<2x16x32xf32, #tpu.memory_space<vmem>>, %arg1: memref<16x4xf32, #tpu.memory_space<vmem>>, %arg2: memref<2x32x32xf32, #tpu.memory_space<vmem>>, %arg3: memref<1x32xf32, #tpu.memory_space<vmem>>, %arg4: memref<1x32xf32, #tpu.memory_space<vmem>>, %arg5: memref<1x32xf32, #tpu.memory_space<vmem>>, %arg6: memref<32x8xf32, #tpu.memory_space<vmem>>, %arg7: memref<1x8xf32, #tpu.memory_space<vmem>>, %arg8: memref<8x160xf32, #tpu.memory_space<vmem>>, %arg9: memref<4x160xf32, #tpu.memory_space<vmem>>, %arg10: memref<1x160xf32, #tpu.memory_space<vmem>>, %arg11: memref<1x160xf32, #tpu.memory_space<vmem>>, %arg12: memref<1x160xf32, #tpu.memory_space<vmem>>, %arg13: memref<160x5xf32, #tpu.memory_space<vmem>>, %arg14: memref<1x5xf32, #tpu.memory_space<vmem>>, %arg15: memref<16x5xf32, #tpu.memory_space<vmem>>) attributes {dimension_semantics = [], scalar_prefetch = 0 : i64, scratch_operands = 0 : i64, tpu.core_type = #tpu.core_type<tc>} {
    %0 = tpu.iota {dimensions = array<i32: 0>} : vector<16x1xi32>
    %c12_i32 = arith.constant 12 : i32
    %1 = vector.broadcast %c12_i32 : i32 to vector<16x1xi32>
    %2 = arith.cmpi slt, %0, %1 : vector<16x1xi32>
    %3 = arith.extui %2 : vector<16x1xi1> to vector<16x1xi32>
    %4 = arith.sitofp %3 : vector<16x1xi32> to vector<16x1xf32>
    %c0 = arith.constant 0 : index
    %c0_0 = arith.constant 0 : index
    %5 = vector.load %arg3[%c0, %c0_0] : memref<1x32xf32, #tpu.memory_space<vmem>>, vector<1x32xf32>
    %c0_1 = arith.constant 0 : index
    %c0_2 = arith.constant 0 : index
    %c0_3 = arith.constant 0 : index
    %6 = vector.load %arg0[%c0_1, %c0_2, %c0_3] : memref<2x16x32xf32, #tpu.memory_space<vmem>>, vector<1x16x32xf32>
    %7 = vector.shape_cast %6 : vector<1x16x32xf32> to vector<16x32xf32>
    %c0_4 = arith.constant 0 : index
    %c0_5 = arith.constant 0 : index
    %c0_6 = arith.constant 0 : index
    %8 = vector.load %arg2[%c0_4, %c0_5, %c0_6] : memref<2x32x32xf32, #tpu.memory_space<vmem>>, vector<1x32x32xf32>
    %9 = vector.shape_cast %8 : vector<1x32x32xf32> to vector<32x32xf32>
    %cst = arith.constant dense<0.000000e+00> : vector<16x32xf32>
    %10 = tpu.matmul %7, %9, %cst {dimension_numbers = #tpu.dot_dimension_numbers<[1], [0], [0], [1], [0, 0, 1, 1], [], []>} : vector<16x32xf32>, vector<32x32xf32>, vector<16x32xf32> -> vector<16x32xf32>
    %11 = vector.broadcast %5 : vector<1x32xf32> to vector<16x32xf32>
    %12 = arith.addf %11, %10 : vector<16x32xf32>
    %c1 = arith.constant 1 : index
    %c0_7 = arith.constant 0 : index
    %c0_8 = arith.constant 0 : index
    %13 = vector.load %arg0[%c1, %c0_7, %c0_8] : memref<2x16x32xf32, #tpu.memory_space<vmem>>, vector<1x16x32xf32>
    %14 = vector.shape_cast %13 : vector<1x16x32xf32> to vector<16x32xf32>
    %c1_9 = arith.constant 1 : index
    %c0_10 = arith.constant 0 : index
    %c0_11 = arith.constant 0 : index
    %15 = vector.load %arg2[%c1_9, %c0_10, %c0_11] : memref<2x32x32xf32, #tpu.memory_space<vmem>>, vector<1x32x32xf32>
    %16 = vector.shape_cast %15 : vector<1x32x32xf32> to vector<32x32xf32>
    %cst_12 = arith.constant dense<0.000000e+00> : vector<16x32xf32>
    %17 = tpu.matmul %14, %16, %cst_12 {dimension_numbers = #tpu.dot_dimension_numbers<[1], [0], [0], [1], [0, 0, 1, 1], [], []>} : vector<16x32xf32>, vector<32x32xf32>, vector<16x32xf32> -> vector<16x32xf32>
    %18 = arith.addf %12, %17 : vector<16x32xf32>
    %c0_13 = arith.constant 0 : index
    %c0_14 = arith.constant 0 : index
    %19 = vector.load %arg4[%c0_13, %c0_14] : memref<1x32xf32, #tpu.memory_space<vmem>>, vector<1x32xf32>
    %c0_15 = arith.constant 0 : index
    %c0_16 = arith.constant 0 : index
    %20 = vector.load %arg5[%c0_15, %c0_16] : memref<1x32xf32, #tpu.memory_space<vmem>>, vector<1x32xf32>
    %21 = vector.broadcast %4 : vector<16x1xf32> to vector<16x32xf32>
    %22 = arith.mulf %18, %21 : vector<16x32xf32>
    %cst_17 = arith.constant dense<0.000000e+00> : vector<32xf32>
    %23 = vector.multi_reduction <add>, %22, %cst_17 [0] : vector<16x32xf32> to vector<32xf32>
    %24 = vector.shape_cast %23 : vector<32xf32> to vector<1x32xf32>
    %cst_18 = arith.constant 0.0833333358 : f32
    %25 = vector.broadcast %cst_18 : f32 to vector<1x32xf32>
    %26 = arith.mulf %24, %25 : vector<1x32xf32>
    %27 = vector.broadcast %26 : vector<1x32xf32> to vector<16x32xf32>
    %28 = arith.subf %18, %27 : vector<16x32xf32>
    %29 = vector.broadcast %4 : vector<16x1xf32> to vector<16x32xf32>
    %30 = arith.mulf %28, %29 : vector<16x32xf32>
    %31 = arith.mulf %30, %30 : vector<16x32xf32>
    %cst_19 = arith.constant dense<0.000000e+00> : vector<32xf32>
    %32 = vector.multi_reduction <add>, %31, %cst_19 [0] : vector<16x32xf32> to vector<32xf32>
    %33 = vector.shape_cast %32 : vector<32xf32> to vector<1x32xf32>
    %cst_20 = arith.constant 0.0833333358 : f32
    %34 = vector.broadcast %cst_20 : f32 to vector<1x32xf32>
    %35 = arith.mulf %33, %34 : vector<1x32xf32>
    %36 = vector.broadcast %26 : vector<1x32xf32> to vector<16x32xf32>
    %37 = arith.subf %18, %36 : vector<16x32xf32>
    %cst_21 = arith.constant 9.99999974E-6 : f32
    %38 = vector.broadcast %cst_21 : f32 to vector<1x32xf32>
    %39 = arith.addf %35, %38 : vector<1x32xf32>
    %40 = math.rsqrt %39 : vector<1x32xf32>
    %41 = vector.broadcast %40 : vector<1x32xf32> to vector<16x32xf32>
    %42 = arith.mulf %37, %41 : vector<16x32xf32>
    %43 = vector.broadcast %19 : vector<1x32xf32> to vector<16x32xf32>
    %44 = arith.mulf %42, %43 : vector<16x32xf32>
    %45 = vector.broadcast %20 : vector<1x32xf32> to vector<16x32xf32>
    %46 = arith.addf %44, %45 : vector<16x32xf32>
    %cst_22 = arith.constant 0.000000e+00 : f32
    %47 = vector.broadcast %cst_22 : f32 to vector<16x32xf32>
    %48 = arith.maximumf %46, %47 : vector<16x32xf32>
    %c0_23 = arith.constant 0 : index
    %c0_24 = arith.constant 0 : index
    %49 = vector.load %arg6[%c0_23, %c0_24] : memref<32x8xf32, #tpu.memory_space<vmem>>, vector<32x8xf32>
    %cst_25 = arith.constant dense<0.000000e+00> : vector<16x8xf32>
    %50 = tpu.matmul %48, %49, %cst_25 {dimension_numbers = #tpu.dot_dimension_numbers<[1], [0], [0], [1], [0, 0, 1, 1], [], []>} : vector<16x32xf32>, vector<32x8xf32>, vector<16x8xf32> -> vector<16x8xf32>
    %c0_26 = arith.constant 0 : index
    %c0_27 = arith.constant 0 : index
    %51 = vector.load %arg7[%c0_26, %c0_27] : memref<1x8xf32, #tpu.memory_space<vmem>>, vector<1x8xf32>
    %52 = vector.broadcast %51 : vector<1x8xf32> to vector<16x8xf32>
    %53 = arith.addf %50, %52 : vector<16x8xf32>
    %c0_28 = arith.constant 0 : index
    %c0_29 = arith.constant 0 : index
    %54 = vector.load %arg8[%c0_28, %c0_29] : memref<8x160xf32, #tpu.memory_space<vmem>>, vector<8x160xf32>
    %cst_30 = arith.constant dense<0.000000e+00> : vector<16x160xf32>
    %55 = tpu.matmul %53, %54, %cst_30 {dimension_numbers = #tpu.dot_dimension_numbers<[1], [0], [0], [1], [0, 0, 1, 1], [], []>} : vector<16x8xf32>, vector<8x160xf32>, vector<16x160xf32> -> vector<16x160xf32>
    %c0_31 = arith.constant 0 : index
    %c0_32 = arith.constant 0 : index
    %56 = vector.load %arg1[%c0_31, %c0_32] : memref<16x4xf32, #tpu.memory_space<vmem>>, vector<16x4xf32>
    %c0_33 = arith.constant 0 : index
    %c0_34 = arith.constant 0 : index
    %57 = vector.load %arg9[%c0_33, %c0_34] : memref<4x160xf32, #tpu.memory_space<vmem>>, vector<4x160xf32>
    %cst_35 = arith.constant dense<0.000000e+00> : vector<16x160xf32>
    %58 = tpu.matmul %56, %57, %cst_35 {dimension_numbers = #tpu.dot_dimension_numbers<[1], [0], [0], [1], [0, 0, 1, 1], [], []>} : vector<16x4xf32>, vector<4x160xf32>, vector<16x160xf32> -> vector<16x160xf32>
    %59 = arith.addf %55, %58 : vector<16x160xf32>
    %c0_36 = arith.constant 0 : index
    %c0_37 = arith.constant 0 : index
    %60 = vector.load %arg10[%c0_36, %c0_37] : memref<1x160xf32, #tpu.memory_space<vmem>>, vector<1x160xf32>
    %61 = vector.broadcast %60 : vector<1x160xf32> to vector<16x160xf32>
    %62 = arith.addf %59, %61 : vector<16x160xf32>
    %c0_38 = arith.constant 0 : index
    %c0_39 = arith.constant 0 : index
    %63 = vector.load %arg11[%c0_38, %c0_39] : memref<1x160xf32, #tpu.memory_space<vmem>>, vector<1x160xf32>
    %c0_40 = arith.constant 0 : index
    %c0_41 = arith.constant 0 : index
    %64 = vector.load %arg12[%c0_40, %c0_41] : memref<1x160xf32, #tpu.memory_space<vmem>>, vector<1x160xf32>
    %65 = vector.broadcast %4 : vector<16x1xf32> to vector<16x160xf32>
    %66 = arith.mulf %62, %65 : vector<16x160xf32>
    %cst_42 = arith.constant dense<0.000000e+00> : vector<160xf32>
    %67 = vector.multi_reduction <add>, %66, %cst_42 [0] : vector<16x160xf32> to vector<160xf32>
    %68 = vector.shape_cast %67 : vector<160xf32> to vector<1x160xf32>
    %cst_43 = arith.constant 0.0833333358 : f32
    %69 = vector.broadcast %cst_43 : f32 to vector<1x160xf32>
    %70 = arith.mulf %68, %69 : vector<1x160xf32>
    %71 = vector.broadcast %70 : vector<1x160xf32> to vector<16x160xf32>
    %72 = arith.subf %62, %71 : vector<16x160xf32>
    %73 = vector.broadcast %4 : vector<16x1xf32> to vector<16x160xf32>
    %74 = arith.mulf %72, %73 : vector<16x160xf32>
    %75 = arith.mulf %74, %74 : vector<16x160xf32>
    %cst_44 = arith.constant dense<0.000000e+00> : vector<160xf32>
    %76 = vector.multi_reduction <add>, %75, %cst_44 [0] : vector<16x160xf32> to vector<160xf32>
    %77 = vector.shape_cast %76 : vector<160xf32> to vector<1x160xf32>
    %cst_45 = arith.constant 0.0833333358 : f32
    %78 = vector.broadcast %cst_45 : f32 to vector<1x160xf32>
    %79 = arith.mulf %77, %78 : vector<1x160xf32>
    %80 = vector.broadcast %70 : vector<1x160xf32> to vector<16x160xf32>
    %81 = arith.subf %62, %80 : vector<16x160xf32>
    %cst_46 = arith.constant 9.99999974E-6 : f32
    %82 = vector.broadcast %cst_46 : f32 to vector<1x160xf32>
    %83 = arith.addf %79, %82 : vector<1x160xf32>
    %84 = math.rsqrt %83 : vector<1x160xf32>
    %85 = vector.broadcast %84 : vector<1x160xf32> to vector<16x160xf32>
    %86 = arith.mulf %81, %85 : vector<16x160xf32>
    %87 = vector.broadcast %63 : vector<1x160xf32> to vector<16x160xf32>
    %88 = arith.mulf %86, %87 : vector<16x160xf32>
    %89 = vector.broadcast %64 : vector<1x160xf32> to vector<16x160xf32>
    %90 = arith.addf %88, %89 : vector<16x160xf32>
    %cst_47 = arith.constant 0.000000e+00 : f32
    %91 = vector.broadcast %cst_47 : f32 to vector<16x160xf32>
    %92 = arith.maximumf %90, %91 : vector<16x160xf32>
    %c0_48 = arith.constant 0 : index
    %c0_49 = arith.constant 0 : index
    %93 = vector.load %arg13[%c0_48, %c0_49] : memref<160x5xf32, #tpu.memory_space<vmem>>, vector<160x5xf32>
    %cst_50 = arith.constant dense<0.000000e+00> : vector<16x5xf32>
    %94 = tpu.matmul %92, %93, %cst_50 {dimension_numbers = #tpu.dot_dimension_numbers<[1], [0], [0], [1], [0, 0, 1, 1], [], []>} : vector<16x160xf32>, vector<160x5xf32>, vector<16x5xf32> -> vector<16x5xf32>
    %c0_51 = arith.constant 0 : index
    %c0_52 = arith.constant 0 : index
    %95 = vector.load %arg14[%c0_51, %c0_52] : memref<1x5xf32, #tpu.memory_space<vmem>>, vector<1x5xf32>
    %96 = vector.broadcast %95 : vector<1x5xf32> to vector<16x5xf32>
    %97 = arith.addf %94, %96 : vector<16x5xf32>
    %c0_53 = arith.constant 0 : index
    %c0_54 = arith.constant 0 : index
    %98 = vector.load %arg15[%c0_53, %c0_54] : memref<16x5xf32, #tpu.memory_space<vmem>>, vector<16x5xf32>
    tpu.vector_store %arg15[%c0_53, %c0_54], %97 {strides = array<i32>} : memref<16x5xf32, #tpu.memory_space<vmem>>, vector<16x5xf32>,
    return
  }
}

module attributes {stable_mosaic.version = 11 : i64} {
  func.func @heads_kernel(%arg0: memref<2x16x32xf32, #tpu.memory_space<vmem>>, %arg1: memref<16x4xf32, #tpu.memory_space<vmem>>, %arg2: memref<2x32x32xf32, #tpu.memory_space<vmem>>, %arg3: memref<1x32xf32, #tpu.memory_space<vmem>>, %arg4: memref<1x32xf32, #tpu.memory_space<vmem>>, %arg5: memref<1x32xf32, #tpu.memory_space<vmem>>, %arg6: memref<32x8xf32, #tpu.memory_space<vmem>>, %arg7: memref<1x8xf32, #tpu.memory_space<vmem>>, %arg8: memref<8x256xf32, #tpu.memory_space<vmem>>, %arg9: memref<4x256xf32, #tpu.memory_space<vmem>>, %arg10: memref<1x256xf32, #tpu.memory_space<vmem>>, %arg11: memref<1x256xf32, #tpu.memory_space<vmem>>, %arg12: memref<1x256xf32, #tpu.memory_space<vmem>>, %arg13: memref<256x8xf32, #tpu.memory_space<vmem>>, %arg14: memref<1x8xf32, #tpu.memory_space<vmem>>, %arg15: memref<16x8xf32, #tpu.memory_space<vmem>>) attributes {dimension_semantics = [], scalar_prefetch = 0 : i64, scratch_operands = 0 : i64, tpu.core_type = #tpu.core_type<tc>} {
    %0 = tpu.iota {dimensions = array<i32: 0>} : vector<16x1xi32>
    %c10_i32 = arith.constant 10 : i32
    %1 = vector.broadcast %c10_i32 : i32 to vector<16x1xi32>
    %2 = arith.cmpi slt, %0, %1 : vector<16x1xi32>
    %3 = arith.extui %2 : vector<16x1xi1> to vector<16x1xi32>
    %4 = arith.sitofp %3 : vector<16x1xi32> to vector<16x1xf32>
    %c0 = arith.constant 0 : index
    %c0_0 = arith.constant 0 : index
    %5 = vector.load %arg3[%c0, %c0_0] : memref<1x32xf32, #tpu.memory_space<vmem>>, vector<1x32xf32>
    %c0_1 = arith.constant 0 : index
    %c0_2 = arith.constant 0 : index
    %c0_3 = arith.constant 0 : index
    %6 = vector.load %arg0[%c0_1, %c0_2, %c0_3] : memref<2x16x32xf32, #tpu.memory_space<vmem>>, vector<1x16x32xf32>
    %7 = vector.shape_cast %6 : vector<1x16x32xf32> to vector<16x32xf32>
    %c0_4 = arith.constant 0 : index
    %c0_5 = arith.constant 0 : index
    %c0_6 = arith.constant 0 : index
    %8 = vector.load %arg2[%c0_4, %c0_5, %c0_6] : memref<2x32x32xf32, #tpu.memory_space<vmem>>, vector<1x32x32xf32>
    %9 = vector.shape_cast %8 : vector<1x32x32xf32> to vector<32x32xf32>
    %cst = arith.constant dense<0.000000e+00> : vector<16x32xf32>
    %10 = tpu.matmul %7, %9, %cst {dimension_numbers = #tpu.dot_dimension_numbers<[1], [0], [0], [1], [0, 0, 1, 1], [], []>} : vector<16x32xf32>, vector<32x32xf32>, vector<16x32xf32> -> vector<16x32xf32>
    %11 = vector.broadcast %5 : vector<1x32xf32> to vector<16x32xf32>
    %12 = arith.addf %11, %10 : vector<16x32xf32>
    %c1 = arith.constant 1 : index
    %c0_7 = arith.constant 0 : index
    %c0_8 = arith.constant 0 : index
    %13 = vector.load %arg0[%c1, %c0_7, %c0_8] : memref<2x16x32xf32, #tpu.memory_space<vmem>>, vector<1x16x32xf32>
    %14 = vector.shape_cast %13 : vector<1x16x32xf32> to vector<16x32xf32>
    %c1_9 = arith.constant 1 : index
    %c0_10 = arith.constant 0 : index
    %c0_11 = arith.constant 0 : index
    %15 = vector.load %arg2[%c1_9, %c0_10, %c0_11] : memref<2x32x32xf32, #tpu.memory_space<vmem>>, vector<1x32x32xf32>
    %16 = vector.shape_cast %15 : vector<1x32x32xf32> to vector<32x32xf32>
    %cst_12 = arith.constant dense<0.000000e+00> : vector<16x32xf32>
    %17 = tpu.matmul %14, %16, %cst_12 {dimension_numbers = #tpu.dot_dimension_numbers<[1], [0], [0], [1], [0, 0, 1, 1], [], []>} : vector<16x32xf32>, vector<32x32xf32>, vector<16x32xf32> -> vector<16x32xf32>
    %18 = arith.addf %12, %17 : vector<16x32xf32>
    %c0_13 = arith.constant 0 : index
    %c0_14 = arith.constant 0 : index
    %19 = vector.load %arg4[%c0_13, %c0_14] : memref<1x32xf32, #tpu.memory_space<vmem>>, vector<1x32xf32>
    %c0_15 = arith.constant 0 : index
    %c0_16 = arith.constant 0 : index
    %20 = vector.load %arg5[%c0_15, %c0_16] : memref<1x32xf32, #tpu.memory_space<vmem>>, vector<1x32xf32>
    %21 = vector.broadcast %4 : vector<16x1xf32> to vector<16x32xf32>
    %22 = arith.mulf %18, %21 : vector<16x32xf32>
    %cst_17 = arith.constant dense<0.000000e+00> : vector<32xf32>
    %23 = vector.multi_reduction <add>, %22, %cst_17 [0] : vector<16x32xf32> to vector<32xf32>
    %24 = vector.shape_cast %23 : vector<32xf32> to vector<1x32xf32>
    %cst_18 = arith.constant 1.000000e-01 : f32
    %25 = vector.broadcast %cst_18 : f32 to vector<1x32xf32>
    %26 = arith.mulf %24, %25 : vector<1x32xf32>
    %27 = vector.broadcast %26 : vector<1x32xf32> to vector<16x32xf32>
    %28 = arith.subf %18, %27 : vector<16x32xf32>
    %29 = vector.broadcast %4 : vector<16x1xf32> to vector<16x32xf32>
    %30 = arith.mulf %28, %29 : vector<16x32xf32>
    %31 = arith.mulf %30, %30 : vector<16x32xf32>
    %cst_19 = arith.constant dense<0.000000e+00> : vector<32xf32>
    %32 = vector.multi_reduction <add>, %31, %cst_19 [0] : vector<16x32xf32> to vector<32xf32>
    %33 = vector.shape_cast %32 : vector<32xf32> to vector<1x32xf32>
    %cst_20 = arith.constant 1.000000e-01 : f32
    %34 = vector.broadcast %cst_20 : f32 to vector<1x32xf32>
    %35 = arith.mulf %33, %34 : vector<1x32xf32>
    %36 = vector.broadcast %26 : vector<1x32xf32> to vector<16x32xf32>
    %37 = arith.subf %18, %36 : vector<16x32xf32>
    %cst_21 = arith.constant 9.99999974E-6 : f32
    %38 = vector.broadcast %cst_21 : f32 to vector<1x32xf32>
    %39 = arith.addf %35, %38 : vector<1x32xf32>
    %40 = math.rsqrt %39 : vector<1x32xf32>
    %41 = vector.broadcast %40 : vector<1x32xf32> to vector<16x32xf32>
    %42 = arith.mulf %37, %41 : vector<16x32xf32>
    %43 = vector.broadcast %19 : vector<1x32xf32> to vector<16x32xf32>
    %44 = arith.mulf %42, %43 : vector<16x32xf32>
    %45 = vector.broadcast %20 : vector<1x32xf32> to vector<16x32xf32>
    %46 = arith.addf %44, %45 : vector<16x32xf32>
    %cst_22 = arith.constant 0.000000e+00 : f32
    %47 = vector.broadcast %cst_22 : f32 to vector<16x32xf32>
    %48 = arith.maximumf %46, %47 : vector<16x32xf32>
    %c0_23 = arith.constant 0 : index
    %c0_24 = arith.constant 0 : index
    %49 = vector.load %arg6[%c0_23, %c0_24] : memref<32x8xf32, #tpu.memory_space<vmem>>, vector<32x8xf32>
    %cst_25 = arith.constant dense<0.000000e+00> : vector<16x8xf32>
    %50 = tpu.matmul %48, %49, %cst_25 {dimension_numbers = #tpu.dot_dimension_numbers<[1], [0], [0], [1], [0, 0, 1, 1], [], []>} : vector<16x32xf32>, vector<32x8xf32>, vector<16x8xf32> -> vector<16x8xf32>
    %c0_26 = arith.constant 0 : index
    %c0_27 = arith.constant 0 : index
    %51 = vector.load %arg7[%c0_26, %c0_27] : memref<1x8xf32, #tpu.memory_space<vmem>>, vector<1x8xf32>
    %52 = vector.broadcast %51 : vector<1x8xf32> to vector<16x8xf32>
    %53 = arith.addf %50, %52 : vector<16x8xf32>
    %c0_28 = arith.constant 0 : index
    %c0_29 = arith.constant 0 : index
    %54 = vector.load %arg8[%c0_28, %c0_29] : memref<8x256xf32, #tpu.memory_space<vmem>>, vector<8x256xf32>
    %cst_30 = arith.constant dense<0.000000e+00> : vector<16x256xf32>
    %55 = tpu.matmul %53, %54, %cst_30 {dimension_numbers = #tpu.dot_dimension_numbers<[1], [0], [0], [1], [0, 0, 1, 1], [], []>} : vector<16x8xf32>, vector<8x256xf32>, vector<16x256xf32> -> vector<16x256xf32>
    %c0_31 = arith.constant 0 : index
    %c0_32 = arith.constant 0 : index
    %56 = vector.load %arg1[%c0_31, %c0_32] : memref<16x4xf32, #tpu.memory_space<vmem>>, vector<16x4xf32>
    %c0_33 = arith.constant 0 : index
    %c0_34 = arith.constant 0 : index
    %57 = vector.load %arg9[%c0_33, %c0_34] : memref<4x256xf32, #tpu.memory_space<vmem>>, vector<4x256xf32>
    %cst_35 = arith.constant dense<0.000000e+00> : vector<16x256xf32>
    %58 = tpu.matmul %56, %57, %cst_35 {dimension_numbers = #tpu.dot_dimension_numbers<[1], [0], [0], [1], [0, 0, 1, 1], [], []>} : vector<16x4xf32>, vector<4x256xf32>, vector<16x256xf32> -> vector<16x256xf32>
    %59 = arith.addf %55, %58 : vector<16x256xf32>
    %c0_36 = arith.constant 0 : index
    %c0_37 = arith.constant 0 : index
    %60 = vector.load %arg10[%c0_36, %c0_37] : memref<1x256xf32, #tpu.memory_space<vmem>>, vector<1x256xf32>
    %61 = vector.broadcast %60 : vector<1x256xf32> to vector<16x256xf32>
    %62 = arith.addf %59, %61 : vector<16x256xf32>
    %c0_38 = arith.constant 0 : index
    %c0_39 = arith.constant 0 : index
    %63 = vector.load %arg11[%c0_38, %c0_39] : memref<1x256xf32, #tpu.memory_space<vmem>>, vector<1x256xf32>
    %c0_40 = arith.constant 0 : index
    %c0_41 = arith.constant 0 : index
    %64 = vector.load %arg12[%c0_40, %c0_41] : memref<1x256xf32, #tpu.memory_space<vmem>>, vector<1x256xf32>
    %65 = vector.broadcast %4 : vector<16x1xf32> to vector<16x256xf32>
    %66 = arith.mulf %62, %65 : vector<16x256xf32>
    %cst_42 = arith.constant dense<0.000000e+00> : vector<256xf32>
    %67 = vector.multi_reduction <add>, %66, %cst_42 [0] : vector<16x256xf32> to vector<256xf32>
    %68 = vector.shape_cast %67 : vector<256xf32> to vector<1x256xf32>
    %cst_43 = arith.constant 1.000000e-01 : f32
    %69 = vector.broadcast %cst_43 : f32 to vector<1x256xf32>
    %70 = arith.mulf %68, %69 : vector<1x256xf32>
    %71 = vector.broadcast %70 : vector<1x256xf32> to vector<16x256xf32>
    %72 = arith.subf %62, %71 : vector<16x256xf32>
    %73 = vector.broadcast %4 : vector<16x1xf32> to vector<16x256xf32>
    %74 = arith.mulf %72, %73 : vector<16x256xf32>
    %75 = arith.mulf %74, %74 : vector<16x256xf32>
    %cst_44 = arith.constant dense<0.000000e+00> : vector<256xf32>
    %76 = vector.multi_reduction <add>, %75, %cst_44 [0] : vector<16x256xf32> to vector<256xf32>
    %77 = vector.shape_cast %76 : vector<256xf32> to vector<1x256xf32>
    %cst_45 = arith.constant 1.000000e-01 : f32
    %78 = vector.broadcast %cst_45 : f32 to vector<1x256xf32>
    %79 = arith.mulf %77, %78 : vector<1x256xf32>
    %80 = vector.broadcast %70 : vector<1x256xf32> to vector<16x256xf32>
    %81 = arith.subf %62, %80 : vector<16x256xf32>
    %cst_46 = arith.constant 9.99999974E-6 : f32
    %82 = vector.broadcast %cst_46 : f32 to vector<1x256xf32>
    %83 = arith.addf %79, %82 : vector<1x256xf32>
    %84 = math.rsqrt %83 : vector<1x256xf32>
    %85 = vector.broadcast %84 : vector<1x256xf32> to vector<16x256xf32>
    %86 = arith.mulf %81, %85 : vector<16x256xf32>
    %87 = vector.broadcast %63 : vector<1x256xf32> to vector<16x256xf32>
    %88 = arith.mulf %86, %87 : vector<16x256xf32>
    %89 = vector.broadcast %64 : vector<1x256xf32> to vector<16x256xf32>
    %90 = arith.addf %88, %89 : vector<16x256xf32>
    %cst_47 = arith.constant 0.000000e+00 : f32
    %91 = vector.broadcast %cst_47 : f32 to vector<16x256xf32>
    %92 = arith.maximumf %90, %91 : vector<16x256xf32>
    %c0_48 = arith.constant 0 : index
    %c0_49 = arith.constant 0 : index
    %93 = vector.load %arg13[%c0_48, %c0_49] : memref<256x8xf32, #tpu.memory_space<vmem>>, vector<256x8xf32>
    %cst_50 = arith.constant dense<0.000000e+00> : vector<16x8xf32>
    %94 = tpu.matmul %92, %93, %cst_50 {dimension_numbers = #tpu.dot_dimension_numbers<[1], [0], [0], [1], [0, 0, 1, 1], [], []>} : vector<16x256xf32>, vector<256x8xf32>, vector<16x8xf32> -> vector<16x8xf32>
    %c0_51 = arith.constant 0 : index
    %c0_52 = arith.constant 0 : index
    %95 = vector.load %arg14[%c0_51, %c0_52] : memref<1x8xf32, #tpu.memory_space<vmem>>, vector<1x8xf32>
    %96 = vector.broadcast %95 : vector<1x8xf32> to vector<16x8xf32>
    %97 = arith.addf %94, %96 : vector<16x8xf32>
    %c0_53 = arith.constant 0 : index
    %c0_54 = arith.constant 0 : index
    %98 = vector.load %arg15[%c0_53, %c0_54] : memref<16x8xf32, #tpu.memory_space<vmem>>, vector<16x8xf32>
    tpu.vector_store %arg15[%c0_53, %c0_54], %97 {strides = array<i32>} : memref<16x8xf32, #tpu.memory_space<vmem>>, vector<16x8xf32>,
    return
  }
}

module attributes {stable_mosaic.version = 11 : i64} {
  func.func @_graph_kernel(%arg0: memref<16x2xf32, #tpu.memory_space<vmem>>, %arg1: memref<16x2xf32, #tpu.memory_space<vmem>>, %arg2: memref<2x16xf32, #tpu.memory_space<vmem>>, %arg3: memref<2x16xf32, #tpu.memory_space<vmem>>, %arg4: memref<24x1xf32, #tpu.memory_space<vmem>>, %arg5: memref<24x1xi32, #tpu.memory_space<vmem>>, %arg6: memref<24x1xi32, #tpu.memory_space<vmem>>, %arg7: memref<1x24xi32, #tpu.memory_space<vmem>>, %arg8: memref<1x24xi32, #tpu.memory_space<vmem>>, %arg9: memref<4x32x32xf32, #tpu.memory_space<vmem>>, %arg10: memref<4x1x32xf32, #tpu.memory_space<vmem>>, %arg11: memref<4x1x32xf32, #tpu.memory_space<vmem>>, %arg12: memref<4x32x32xf32, #tpu.memory_space<vmem>>, %arg13: memref<4x32x32xf32, #tpu.memory_space<vmem>>, %arg14: memref<4x1x32xf32, #tpu.memory_space<vmem>>, %arg15: memref<4x32x32xf32, #tpu.memory_space<vmem>>, %arg16: memref<4x32x32xf32, #tpu.memory_space<vmem>>, %arg17: memref<4x1x32xf32, #tpu.memory_space<vmem>>, %arg18: memref<4x32x32xf32, #tpu.memory_space<vmem>>, %arg19: memref<4x1x32xf32, #tpu.memory_space<vmem>>, %arg20: memref<4x1x32xf32, #tpu.memory_space<vmem>>, %arg21: memref<4x1x32xf32, #tpu.memory_space<vmem>>, %arg22: memref<2x16x32xf32, #tpu.memory_space<vmem>>, %arg23: memref<2x16x32xf32, #tpu.memory_space<vmem>>) attributes {dimension_semantics = [], scalar_prefetch = 0 : i64, scratch_operands = 0 : i64, tpu.core_type = #tpu.core_type<tc>} {
    %c0 = arith.constant 0 : index
    %c0_0 = arith.constant 0 : index
    %0 = vector.load %arg0[%c0, %c0_0] : memref<16x2xf32, #tpu.memory_space<vmem>>, vector<16x2xf32>
    %c0_1 = arith.constant 0 : index
    %c0_2 = arith.constant 0 : index
    %1 = vector.load %arg2[%c0_1, %c0_2] : memref<2x16xf32, #tpu.memory_space<vmem>>, vector<2x16xf32>
    %cst = arith.constant dense<0.000000e+00> : vector<16x16xf32>
    %2 = tpu.matmul %0, %1, %cst {dimension_numbers = #tpu.dot_dimension_numbers<[1], [0], [0], [1], [0, 0, 1, 1], [], []>} : vector<16x2xf32>, vector<2x16xf32>, vector<16x16xf32> -> vector<16x16xf32>
    %3 = tpu.iota {dimensions = array<i32: 0>} : vector<16x32xi32>
    %4 = tpu.iota {dimensions = array<i32: 1>} : vector<16x32xi32>
    %5 = arith.cmpi eq, %4, %3 : vector<16x32xi32>
    %6 = arith.extui %5 : vector<16x32xi1> to vector<16x32xi32>
    %7 = arith.sitofp %6 : vector<16x32xi32> to vector<16x32xf32>
    %c16_i32 = arith.constant 16 : i32
    %8 = vector.broadcast %c16_i32 : i32 to vector<16x32xi32>
    %9 = arith.addi %3, %8 : vector<16x32xi32>
    %10 = arith.cmpi eq, %4, %9 : vector<16x32xi32>
    %11 = arith.extui %10 : vector<16x32xi1> to vector<16x32xi32>
    %12 = arith.sitofp %11 : vector<16x32xi32> to vector<16x32xf32>
    %13 = math.sin %2 : vector<16x16xf32>
    %cst_3 = arith.constant dense<0.000000e+00> : vector<16x32xf32>
    %14 = tpu.matmul %13, %7, %cst_3 {dimension_numbers = #tpu.dot_dimension_numbers<[1], [0], [0], [1], [0, 0, 1, 1], [], []>} : vector<16x16xf32>, vector<16x32xf32>, vector<16x32xf32> -> vector<16x32xf32>
    %15 = math.cos %2 : vector<16x16xf32>
    %cst_4 = arith.constant dense<0.000000e+00> : vector<16x32xf32>
    %16 = tpu.matmul %15, %12, %cst_4 {dimension_numbers = #tpu.dot_dimension_numbers<[1], [0], [0], [1], [0, 0, 1, 1], [], []>} : vector<16x16xf32>, vector<16x32xf32>, vector<16x32xf32> -> vector<16x32xf32>
    %17 = arith.addf %14, %16 : vector<16x32xf32>
    %c0_5 = arith.constant 0 : index
    %c0_6 = arith.constant 0 : index
    %18 = vector.load %arg1[%c0_5, %c0_6] : memref<16x2xf32, #tpu.memory_space<vmem>>, vector<16x2xf32>
    %c0_7 = arith.constant 0 : index
    %c0_8 = arith.constant 0 : index
    %19 = vector.load %arg3[%c0_7, %c0_8] : memref<2x16xf32, #tpu.memory_space<vmem>>, vector<2x16xf32>
    %cst_9 = arith.constant dense<0.000000e+00> : vector<16x16xf32>
    %20 = tpu.matmul %18, %19, %cst_9 {dimension_numbers = #tpu.dot_dimension_numbers<[1], [0], [0], [1], [0, 0, 1, 1], [], []>} : vector<16x2xf32>, vector<2x16xf32>, vector<16x16xf32> -> vector<16x16xf32>
    %21 = tpu.iota {dimensions = array<i32: 0>} : vector<16x32xi32>
    %22 = tpu.iota {dimensions = array<i32: 1>} : vector<16x32xi32>
    %23 = arith.cmpi eq, %22, %21 : vector<16x32xi32>
    %24 = arith.extui %23 : vector<16x32xi1> to vector<16x32xi32>
    %25 = arith.sitofp %24 : vector<16x32xi32> to vector<16x32xf32>
    %c16_i32_10 = arith.constant 16 : i32
    %26 = vector.broadcast %c16_i32_10 : i32 to vector<16x32xi32>
    %27 = arith.addi %21, %26 : vector<16x32xi32>
    %28 = arith.cmpi eq, %22, %27 : vector<16x32xi32>
    %29 = arith.extui %28 : vector<16x32xi1> to vector<16x32xi32>
    %30 = arith.sitofp %29 : vector<16x32xi32> to vector<16x32xf32>
    %31 = math.sin %20 : vector<16x16xf32>
    %cst_11 = arith.constant dense<0.000000e+00> : vector<16x32xf32>
    %32 = tpu.matmul %31, %25, %cst_11 {dimension_numbers = #tpu.dot_dimension_numbers<[1], [0], [0], [1], [0, 0, 1, 1], [], []>} : vector<16x16xf32>, vector<16x32xf32>, vector<16x32xf32> -> vector<16x32xf32>
    %33 = math.cos %20 : vector<16x16xf32>
    %cst_12 = arith.constant dense<0.000000e+00> : vector<16x32xf32>
    %34 = tpu.matmul %33, %30, %cst_12 {dimension_numbers = #tpu.dot_dimension_numbers<[1], [0], [0], [1], [0, 0, 1, 1], [], []>} : vector<16x16xf32>, vector<16x32xf32>, vector<16x32xf32> -> vector<16x32xf32>
    %35 = arith.addf %32, %34 : vector<16x32xf32>
    %c0_13 = arith.constant 0 : index
    %c0_14 = arith.constant 0 : index
    %36 = vector.load %arg4[%c0_13, %c0_14] : memref<24x1xf32, #tpu.memory_space<vmem>>, vector<24x1xf32>
    %c0_15 = arith.constant 0 : index
    %c0_16 = arith.constant 0 : index
    %37 = vector.load %arg5[%c0_15, %c0_16] : memref<24x1xi32, #tpu.memory_space<vmem>>, vector<24x1xi32>
    %38 = tpu.iota {dimensions = array<i32: 1>} : vector<24x16xi32>
    %39 = vector.broadcast %37 : vector<24x1xi32> to vector<24x16xi32>
    %40 = arith.cmpi eq, %39, %38 : vector<24x16xi32>
    %41 = arith.extui %40 : vector<24x16xi1> to vector<24x16xi32>
    %42 = arith.sitofp %41 : vector<24x16xi32> to vector<24x16xf32>
    %c0_17 = arith.constant 0 : index
    %c0_18 = arith.constant 0 : index
    %43 = vector.load %arg6[%c0_17, %c0_18] : memref<24x1xi32, #tpu.memory_space<vmem>>, vector<24x1xi32>
    %44 = tpu.iota {dimensions = array<i32: 1>} : vector<24x16xi32>
    %45 = vector.broadcast %43 : vector<24x1xi32> to vector<24x16xi32>
    %46 = arith.cmpi eq, %45, %44 : vector<24x16xi32>
    %47 = arith.extui %46 : vector<24x16xi1> to vector<24x16xi32>
    %48 = arith.sitofp %47 : vector<24x16xi32> to vector<24x16xf32>
    %c0_19 = arith.constant 0 : index
    %c0_20 = arith.constant 0 : index
    %49 = vector.load %arg7[%c0_19, %c0_20] : memref<1x24xi32, #tpu.memory_space<vmem>>, vector<1x24xi32>
    %50 = tpu.iota {dimensions = array<i32: 0>} : vector<16x24xi32>
    %51 = vector.broadcast %49 : vector<1x24xi32> to vector<16x24xi32>
    %52 = arith.cmpi eq, %51, %50 : vector<16x24xi32>
    %53 = arith.extui %52 : vector<16x24xi1> to vector<16x24xi32>
    %54 = arith.sitofp %53 : vector<16x24xi32> to vector<16x24xf32>
    %c0_21 = arith.constant 0 : index
    %c0_22 = arith.constant 0 : index
    %55 = vector.load %arg8[%c0_21, %c0_22] : memref<1x24xi32, #tpu.memory_space<vmem>>, vector<1x24xi32>
    %56 = tpu.iota {dimensions = array<i32: 0>} : vector<16x24xi32>
    %57 = vector.broadcast %55 : vector<1x24xi32> to vector<16x24xi32>
    %58 = arith.cmpi eq, %57, %56 : vector<16x24xi32>
    %59 = arith.extui %58 : vector<16x24xi1> to vector<16x24xi32>
    %60 = arith.sitofp %59 : vector<16x24xi32> to vector<16x24xf32>
    %c0_23 = arith.constant 0 : index
    %c0_24 = arith.constant 0 : index
    %c0_25 = arith.constant 0 : index
    %61 = vector.load %arg9[%c0_23, %c0_24, %c0_25] : memref<4x32x32xf32, #tpu.memory_space<vmem>>, vector<1x32x32xf32>
    %62 = vector.shape_cast %61 : vector<1x32x32xf32> to vector<32x32xf32>
    %cst_26 = arith.constant dense<0.000000e+00> : vector<16x32xf32>
    %63 = tpu.matmul %35, %62, %cst_26 {dimension_numbers = #tpu.dot_dimension_numbers<[1], [0], [0], [1], [0, 0, 1, 1], [], []>} : vector<16x32xf32>, vector<32x32xf32>, vector<16x32xf32> -> vector<16x32xf32>
    %c0_27 = arith.constant 0 : index
    %c0_28 = arith.constant 0 : index
    %c0_29 = arith.constant 0 : index
    %64 = vector.load %arg10[%c0_27, %c0_28, %c0_29] : memref<4x1x32xf32, #tpu.memory_space<vmem>>, vector<1x1x32xf32>
    %65 = vector.shape_cast %64 : vector<1x1x32xf32> to vector<1x32xf32>
    %66 = vector.broadcast %65 : vector<1x32xf32> to vector<16x32xf32>
    %67 = arith.addf %63, %66 : vector<16x32xf32>
    %c0_30 = arith.constant 0 : index
    %c0_31 = arith.constant 0 : index
    %c0_32 = arith.constant 0 : index
    %68 = vector.load %arg12[%c0_30, %c0_31, %c0_32] : memref<4x32x32xf32, #tpu.memory_space<vmem>>, vector<1x32x32xf32>
    %69 = vector.shape_cast %68 : vector<1x32x32xf32> to vector<32x32xf32>
    %cst_33 = arith.constant dense<0.000000e+00> : vector<16x32xf32>
    %70 = tpu.matmul %17, %69, %cst_33 {dimension_numbers = #tpu.dot_dimension_numbers<[1], [0], [0], [1], [0, 0, 1, 1], [], []>} : vector<16x32xf32>, vector<32x32xf32>, vector<16x32xf32> -> vector<16x32xf32>
    %cst_34 = arith.constant dense<0.000000e+00> : vector<24x32xf32>
    %71 = tpu.matmul %48, %67, %cst_34 {dimension_numbers = #tpu.dot_dimension_numbers<[1], [0], [0], [1], [0, 0, 1, 1], [], []>} : vector<24x16xf32>, vector<16x32xf32>, vector<24x32xf32> -> vector<24x32xf32>
    %cst_35 = arith.constant dense<0.000000e+00> : vector<24x32xf32>
    %72 = tpu.matmul %42, %70, %cst_35 {dimension_numbers = #tpu.dot_dimension_numbers<[1], [0], [0], [1], [0, 0, 1, 1], [], []>} : vector<24x16xf32>, vector<16x32xf32>, vector<24x32xf32> -> vector<24x32xf32>
    %73 = arith.addf %71, %72 : vector<24x32xf32>
    %c0_36 = arith.constant 0 : index
    %c0_37 = arith.constant 0 : index
    %c0_38 = arith.constant 0 : index
    %74 = vector.load %arg11[%c0_36, %c0_37, %c0_38] : memref<4x1x32xf32, #tpu.memory_space<vmem>>, vector<1x1x32xf32>
    %75 = vector.shape_cast %74 : vector<1x1x32xf32> to vector<1x32xf32>
    %76 = vector.broadcast %36 : vector<24x1xf32> to vector<24x32xf32>
    %77 = vector.broadcast %75 : vector<1x32xf32> to vector<24x32xf32>
    %78 = arith.mulf %76, %77 : vector<24x32xf32>
    %79 = arith.addf %73, %78 : vector<24x32xf32>
    %cst_39 = arith.constant 0.000000e+00 : f32
    %80 = vector.broadcast %cst_39 : f32 to vector<24x32xf32>
    %81 = arith.maximumf %79, %80 : vector<24x32xf32>
    %c0_40 = arith.constant 0 : index
    %c0_41 = arith.constant 0 : index
    %c0_42 = arith.constant 0 : index
    %82 = vector.load %arg13[%c0_40, %c0_41, %c0_42] : memref<4x32x32xf32, #tpu.memory_space<vmem>>, vector<1x32x32xf32>
    %83 = vector.shape_cast %82 : vector<1x32x32xf32> to vector<32x32xf32>
    %cst_43 = arith.constant dense<0.000000e+00> : vector<24x32xf32>
    %84 = tpu.matmul %81, %83, %cst_43 {dimension_numbers = #tpu.dot_dimension_numbers<[1], [0], [0], [1], [0, 0, 1, 1], [], []>} : vector<24x32xf32>, vector<32x32xf32>, vector<24x32xf32> -> vector<24x32xf32>
    %c0_44 = arith.constant 0 : index
    %c0_45 = arith.constant 0 : index
    %c0_46 = arith.constant 0 : index
    %85 = vector.load %arg14[%c0_44, %c0_45, %c0_46] : memref<4x1x32xf32, #tpu.memory_space<vmem>>, vector<1x1x32xf32>
    %86 = vector.shape_cast %85 : vector<1x1x32xf32> to vector<1x32xf32>
    %87 = vector.broadcast %86 : vector<1x32xf32> to vector<24x32xf32>
    %88 = arith.addf %84, %87 : vector<24x32xf32>
    %cst_47 = arith.constant dense<0.000000e+00> : vector<16x32xf32>
    %89 = tpu.matmul %60, %88, %cst_47 {dimension_numbers = #tpu.dot_dimension_numbers<[1], [0], [0], [1], [0, 0, 1, 1], [], []>} : vector<16x24xf32>, vector<24x32xf32>, vector<16x32xf32> -> vector<16x32xf32>
    %c0_48 = arith.constant 0 : index
    %c0_49 = arith.constant 0 : index
    %c0_50 = arith.constant 0 : index
    %90 = vector.load %arg15[%c0_48, %c0_49, %c0_50] : memref<4x32x32xf32, #tpu.memory_space<vmem>>, vector<1x32x32xf32>
    %91 = vector.shape_cast %90 : vector<1x32x32xf32> to vector<32x32xf32>
    %cst_51 = arith.constant dense<0.000000e+00> : vector<16x32xf32>
    %92 = tpu.matmul %89, %91, %cst_51 {dimension_numbers = #tpu.dot_dimension_numbers<[1], [0], [0], [1], [0, 0, 1, 1], [], []>} : vector<16x32xf32>, vector<32x32xf32>, vector<16x32xf32> -> vector<16x32xf32>
    %c0_52 = arith.constant 0 : index
    %c0_53 = arith.constant 0 : index
    %c0_54 = arith.constant 0 : index
    %93 = vector.load %arg16[%c0_52, %c0_53, %c0_54] : memref<4x32x32xf32, #tpu.memory_space<vmem>>, vector<1x32x32xf32>
    %94 = vector.shape_cast %93 : vector<1x32x32xf32> to vector<32x32xf32>
    %cst_55 = arith.constant dense<0.000000e+00> : vector<16x32xf32>
    %95 = tpu.matmul %35, %94, %cst_55 {dimension_numbers = #tpu.dot_dimension_numbers<[1], [0], [0], [1], [0, 0, 1, 1], [], []>} : vector<16x32xf32>, vector<32x32xf32>, vector<16x32xf32> -> vector<16x32xf32>
    %96 = arith.addf %92, %95 : vector<16x32xf32>
    %c0_56 = arith.constant 0 : index
    %c0_57 = arith.constant 0 : index
    %c0_58 = arith.constant 0 : index
    %97 = vector.load %arg17[%c0_56, %c0_57, %c0_58] : memref<4x1x32xf32, #tpu.memory_space<vmem>>, vector<1x1x32xf32>
    %98 = vector.shape_cast %97 : vector<1x1x32xf32> to vector<1x32xf32>
    %99 = vector.broadcast %98 : vector<1x32xf32> to vector<16x32xf32>
    %100 = arith.addf %96, %99 : vector<16x32xf32>
    %cst_59 = arith.constant 0.000000e+00 : f32
    %101 = vector.broadcast %cst_59 : f32 to vector<16x32xf32>
    %102 = arith.maximumf %100, %101 : vector<16x32xf32>
    %c0_60 = arith.constant 0 : index
    %c0_61 = arith.constant 0 : index
    %c0_62 = arith.constant 0 : index
    %103 = vector.load %arg18[%c0_60, %c0_61, %c0_62] : memref<4x32x32xf32, #tpu.memory_space<vmem>>, vector<1x32x32xf32>
    %104 = vector.shape_cast %103 : vector<1x32x32xf32> to vector<32x32xf32>
    %cst_63 = arith.constant dense<0.000000e+00> : vector<16x32xf32>
    %105 = tpu.matmul %102, %104, %cst_63 {dimension_numbers = #tpu.dot_dimension_numbers<[1], [0], [0], [1], [0, 0, 1, 1], [], []>} : vector<16x32xf32>, vector<32x32xf32>, vector<16x32xf32> -> vector<16x32xf32>
    %c0_64 = arith.constant 0 : index
    %c0_65 = arith.constant 0 : index
    %c0_66 = arith.constant 0 : index
    %106 = vector.load %arg19[%c0_64, %c0_65, %c0_66] : memref<4x1x32xf32, #tpu.memory_space<vmem>>, vector<1x1x32xf32>
    %107 = vector.shape_cast %106 : vector<1x1x32xf32> to vector<1x32xf32>
    %108 = vector.broadcast %107 : vector<1x32xf32> to vector<16x32xf32>
    %109 = arith.addf %105, %108 : vector<16x32xf32>
    %cst_67 = arith.constant dense<0.000000e+00> : vector<16xf32>
    %110 = vector.multi_reduction <add>, %109, %cst_67 [1] : vector<16x32xf32> to vector<16xf32>
    %111 = vector.shape_cast %110 : vector<16xf32> to vector<16x1xf32>
    %cst_68 = arith.constant 3.200000e+01 : f32
    %112 = vector.broadcast %cst_68 : f32 to vector<16x1xf32>
    %113 = arith.divf %111, %112 : vector<16x1xf32>
    %114 = vector.broadcast %113 : vector<16x1xf32> to vector<16x32xf32>
    %115 = arith.subf %109, %114 : vector<16x32xf32>
    %116 = vector.broadcast %113 : vector<16x1xf32> to vector<16x32xf32>
    %117 = arith.subf %109, %116 : vector<16x32xf32>
    %118 = arith.mulf %115, %117 : vector<16x32xf32>
    %cst_69 = arith.constant dense<0.000000e+00> : vector<16xf32>
    %119 = vector.multi_reduction <add>, %118, %cst_69 [1] : vector<16x32xf32> to vector<16xf32>
    %120 = vector.shape_cast %119 : vector<16xf32> to vector<16x1xf32>
    %cst_70 = arith.constant 3.200000e+01 : f32
    %121 = vector.broadcast %cst_70 : f32 to vector<16x1xf32>
    %122 = arith.divf %120, %121 : vector<16x1xf32>
    %123 = vector.broadcast %113 : vector<16x1xf32> to vector<16x32xf32>
    %124 = arith.subf %109, %123 : vector<16x32xf32>
    %cst_71 = arith.constant 9.99999974E-6 : f32
    %125 = vector.broadcast %cst_71 : f32 to vector<16x1xf32>
    %126 = arith.addf %122, %125 : vector<16x1xf32>
    %127 = math.rsqrt %126 : vector<16x1xf32>
    %128 = vector.broadcast %127 : vector<16x1xf32> to vector<16x32xf32>
    %129 = arith.mulf %124, %128 : vector<16x32xf32>
    %c0_72 = arith.constant 0 : index
    %c0_73 = arith.constant 0 : index
    %c0_74 = arith.constant 0 : index
    %130 = vector.load %arg20[%c0_72, %c0_73, %c0_74] : memref<4x1x32xf32, #tpu.memory_space<vmem>>, vector<1x1x32xf32>
    %131 = vector.shape_cast %130 : vector<1x1x32xf32> to vector<1x32xf32>
    %132 = vector.broadcast %131 : vector<1x32xf32> to vector<16x32xf32>
    %133 = arith.mulf %129, %132 : vector<16x32xf32>
    %c0_75 = arith.constant 0 : index
    %c0_76 = arith.constant 0 : index
    %c0_77 = arith.constant 0 : index
    %134 = vector.load %arg21[%c0_75, %c0_76, %c0_77] : memref<4x1x32xf32, #tpu.memory_space<vmem>>, vector<1x1x32xf32>
    %135 = vector.shape_cast %134 : vector<1x1x32xf32> to vector<1x32xf32>
    %136 = vector.broadcast %135 : vector<1x32xf32> to vector<16x32xf32>
    %137 = arith.addf %133, %136 : vector<16x32xf32>
    %c0_78 = arith.constant 0 : index
    %c0_79 = arith.constant 0 : index
    %c0_80 = arith.constant 0 : index
    %138 = vector.load %arg23[%c0_78, %c0_79, %c0_80] : memref<2x16x32xf32, #tpu.memory_space<vmem>>, vector<1x16x32xf32>
    %139 = vector.shape_cast %138 : vector<1x16x32xf32> to vector<16x32xf32>
    %140 = vector.shape_cast %137 : vector<16x32xf32> to vector<1x16x32xf32>
    tpu.vector_store %arg23[%c0_78, %c0_79, %c0_80], %140 {strides = array<i32>} : memref<2x16x32xf32, #tpu.memory_space<vmem>>, vector<1x16x32xf32>,
    %c1 = arith.constant 1 : index
    %c0_81 = arith.constant 0 : index
    %c0_82 = arith.constant 0 : index
    %141 = vector.load %arg9[%c1, %c0_81, %c0_82] : memref<4x32x32xf32, #tpu.memory_space<vmem>>, vector<1x32x32xf32>
    %142 = vector.shape_cast %141 : vector<1x32x32xf32> to vector<32x32xf32>
    %cst_83 = arith.constant dense<0.000000e+00> : vector<16x32xf32>
    %143 = tpu.matmul %17, %142, %cst_83 {dimension_numbers = #tpu.dot_dimension_numbers<[1], [0], [0], [1], [0, 0, 1, 1], [], []>} : vector<16x32xf32>, vector<32x32xf32>, vector<16x32xf32> -> vector<16x32xf32>
    %c1_84 = arith.constant 1 : index
    %c0_85 = arith.constant 0 : index
    %c0_86 = arith.constant 0 : index
    %144 = vector.load %arg10[%c1_84, %c0_85, %c0_86] : memref<4x1x32xf32, #tpu.memory_space<vmem>>, vector<1x1x32xf32>
    %145 = vector.shape_cast %144 : vector<1x1x32xf32> to vector<1x32xf32>
    %146 = vector.broadcast %145 : vector<1x32xf32> to vector<16x32xf32>
    %147 = arith.addf %143, %146 : vector<16x32xf32>
    %c1_87 = arith.constant 1 : index
    %c0_88 = arith.constant 0 : index
    %c0_89 = arith.constant 0 : index
    %148 = vector.load %arg12[%c1_87, %c0_88, %c0_89] : memref<4x32x32xf32, #tpu.memory_space<vmem>>, vector<1x32x32xf32>
    %149 = vector.shape_cast %148 : vector<1x32x32xf32> to vector<32x32xf32>
    %cst_90 = arith.constant dense<0.000000e+00> : vector<16x32xf32>
    %150 = tpu.matmul %35, %149, %cst_90 {dimension_numbers = #tpu.dot_dimension_numbers<[1], [0], [0], [1], [0, 0, 1, 1], [], []>} : vector<16x32xf32>, vector<32x32xf32>, vector<16x32xf32> -> vector<16x32xf32>
    %cst_91 = arith.constant dense<0.000000e+00> : vector<24x32xf32>
    %151 = tpu.matmul %42, %147, %cst_91 {dimension_numbers = #tpu.dot_dimension_numbers<[1], [0], [0], [1], [0, 0, 1, 1], [], []>} : vector<24x16xf32>, vector<16x32xf32>, vector<24x32xf32> -> vector<24x32xf32>
    %cst_92 = arith.constant dense<0.000000e+00> : vector<24x32xf32>
    %152 = tpu.matmul %48, %150, %cst_92 {dimension_numbers = #tpu.dot_dimension_numbers<[1], [0], [0], [1], [0, 0, 1, 1], [], []>} : vector<24x16xf32>, vector<16x32xf32>, vector<24x32xf32> -> vector<24x32xf32>
    %153 = arith.addf %151, %152 : vector<24x32xf32>
    %c1_93 = arith.constant 1 : index
    %c0_94 = arith.constant 0 : index
    %c0_95 = arith.constant 0 : index
    %154 = vector.load %arg11[%c1_93, %c0_94, %c0_95] : memref<4x1x32xf32, #tpu.memory_space<vmem>>, vector<1x1x32xf32>
    %155 = vector.shape_cast %154 : vector<1x1x32xf32> to vector<1x32xf32>
    %156 = vector.broadcast %36 : vector<24x1xf32> to vector<24x32xf32>
    %157 = vector.broadcast %155 : vector<1x32xf32> to vector<24x32xf32>
    %158 = arith.mulf %156, %157 : vector<24x32xf32>
    %159 = arith.addf %153, %158 : vector<24x32xf32>
    %cst_96 = arith.constant 0.000000e+00 : f32
    %160 = vector.broadcast %cst_96 : f32 to vector<24x32xf32>
    %161 = arith.maximumf %159, %160 : vector<24x32xf32>
    %c1_97 = arith.constant 1 : index
    %c0_98 = arith.constant 0 : index
    %c0_99 = arith.constant 0 : index
    %162 = vector.load %arg13[%c1_97, %c0_98, %c0_99] : memref<4x32x32xf32, #tpu.memory_space<vmem>>, vector<1x32x32xf32>
    %163 = vector.shape_cast %162 : vector<1x32x32xf32> to vector<32x32xf32>
    %cst_100 = arith.constant dense<0.000000e+00> : vector<24x32xf32>
    %164 = tpu.matmul %161, %163, %cst_100 {dimension_numbers = #tpu.dot_dimension_numbers<[1], [0], [0], [1], [0, 0, 1, 1], [], []>} : vector<24x32xf32>, vector<32x32xf32>, vector<24x32xf32> -> vector<24x32xf32>
    %c1_101 = arith.constant 1 : index
    %c0_102 = arith.constant 0 : index
    %c0_103 = arith.constant 0 : index
    %165 = vector.load %arg14[%c1_101, %c0_102, %c0_103] : memref<4x1x32xf32, #tpu.memory_space<vmem>>, vector<1x1x32xf32>
    %166 = vector.shape_cast %165 : vector<1x1x32xf32> to vector<1x32xf32>
    %167 = vector.broadcast %166 : vector<1x32xf32> to vector<24x32xf32>
    %168 = arith.addf %164, %167 : vector<24x32xf32>
    %cst_104 = arith.constant dense<0.000000e+00> : vector<16x32xf32>
    %169 = tpu.matmul %54, %168, %cst_104 {dimension_numbers = #tpu.dot_dimension_numbers<[1], [0], [0], [1], [0, 0, 1, 1], [], []>} : vector<16x24xf32>, vector<24x32xf32>, vector<16x32xf32> -> vector<16x32xf32>
    %c1_105 = arith.constant 1 : index
    %c0_106 = arith.constant 0 : index
    %c0_107 = arith.constant 0 : index
    %170 = vector.load %arg15[%c1_105, %c0_106, %c0_107] : memref<4x32x32xf32, #tpu.memory_space<vmem>>, vector<1x32x32xf32>
    %171 = vector.shape_cast %170 : vector<1x32x32xf32> to vector<32x32xf32>
    %cst_108 = arith.constant dense<0.000000e+00> : vector<16x32xf32>
    %172 = tpu.matmul %169, %171, %cst_108 {dimension_numbers = #tpu.dot_dimension_numbers<[1], [0], [0], [1], [0, 0, 1, 1], [], []>} : vector<16x32xf32>, vector<32x32xf32>, vector<16x32xf32> -> vector<16x32xf32>
    %c1_109 = arith.constant 1 : index
    %c0_110 = arith.constant 0 : index
    %c0_111 = arith.constant 0 : index
    %173 = vector.load %arg16[%c1_109, %c0_110, %c0_111] : memref<4x32x32xf32, #tpu.memory_space<vmem>>, vector<1x32x32xf32>
    %174 = vector.shape_cast %173 : vector<1x32x32xf32> to vector<32x32xf32>
    %cst_112 = arith.constant dense<0.000000e+00> : vector<16x32xf32>
    %175 = tpu.matmul %17, %174, %cst_112 {dimension_numbers = #tpu.dot_dimension_numbers<[1], [0], [0], [1], [0, 0, 1, 1], [], []>} : vector<16x32xf32>, vector<32x32xf32>, vector<16x32xf32> -> vector<16x32xf32>
    %176 = arith.addf %172, %175 : vector<16x32xf32>
    %c1_113 = arith.constant 1 : index
    %c0_114 = arith.constant 0 : index
    %c0_115 = arith.constant 0 : index
    %177 = vector.load %arg17[%c1_113, %c0_114, %c0_115] : memref<4x1x32xf32, #tpu.memory_space<vmem>>, vector<1x1x32xf32>
    %178 = vector.shape_cast %177 : vector<1x1x32xf32> to vector<1x32xf32>
    %179 = vector.broadcast %178 : vector<1x32xf32> to vector<16x32xf32>
    %180 = arith.addf %176, %179 : vector<16x32xf32>
    %cst_116 = arith.constant 0.000000e+00 : f32
    %181 = vector.broadcast %cst_116 : f32 to vector<16x32xf32>
    %182 = arith.maximumf %180, %181 : vector<16x32xf32>
    %c1_117 = arith.constant 1 : index
    %c0_118 = arith.constant 0 : index
    %c0_119 = arith.constant 0 : index
    %183 = vector.load %arg18[%c1_117, %c0_118, %c0_119] : memref<4x32x32xf32, #tpu.memory_space<vmem>>, vector<1x32x32xf32>
    %184 = vector.shape_cast %183 : vector<1x32x32xf32> to vector<32x32xf32>
    %cst_120 = arith.constant dense<0.000000e+00> : vector<16x32xf32>
    %185 = tpu.matmul %182, %184, %cst_120 {dimension_numbers = #tpu.dot_dimension_numbers<[1], [0], [0], [1], [0, 0, 1, 1], [], []>} : vector<16x32xf32>, vector<32x32xf32>, vector<16x32xf32> -> vector<16x32xf32>
    %c1_121 = arith.constant 1 : index
    %c0_122 = arith.constant 0 : index
    %c0_123 = arith.constant 0 : index
    %186 = vector.load %arg19[%c1_121, %c0_122, %c0_123] : memref<4x1x32xf32, #tpu.memory_space<vmem>>, vector<1x1x32xf32>
    %187 = vector.shape_cast %186 : vector<1x1x32xf32> to vector<1x32xf32>
    %188 = vector.broadcast %187 : vector<1x32xf32> to vector<16x32xf32>
    %189 = arith.addf %185, %188 : vector<16x32xf32>
    %cst_124 = arith.constant dense<0.000000e+00> : vector<16xf32>
    %190 = vector.multi_reduction <add>, %189, %cst_124 [1] : vector<16x32xf32> to vector<16xf32>
    %191 = vector.shape_cast %190 : vector<16xf32> to vector<16x1xf32>
    %cst_125 = arith.constant 3.200000e+01 : f32
    %192 = vector.broadcast %cst_125 : f32 to vector<16x1xf32>
    %193 = arith.divf %191, %192 : vector<16x1xf32>
    %194 = vector.broadcast %193 : vector<16x1xf32> to vector<16x32xf32>
    %195 = arith.subf %189, %194 : vector<16x32xf32>
    %196 = vector.broadcast %193 : vector<16x1xf32> to vector<16x32xf32>
    %197 = arith.subf %189, %196 : vector<16x32xf32>
    %198 = arith.mulf %195, %197 : vector<16x32xf32>
    %cst_126 = arith.constant dense<0.000000e+00> : vector<16xf32>
    %199 = vector.multi_reduction <add>, %198, %cst_126 [1] : vector<16x32xf32> to vector<16xf32>
    %200 = vector.shape_cast %199 : vector<16xf32> to vector<16x1xf32>
    %cst_127 = arith.constant 3.200000e+01 : f32
    %201 = vector.broadcast %cst_127 : f32 to vector<16x1xf32>
    %202 = arith.divf %200, %201 : vector<16x1xf32>
    %203 = vector.broadcast %193 : vector<16x1xf32> to vector<16x32xf32>
    %204 = arith.subf %189, %203 : vector<16x32xf32>
    %cst_128 = arith.constant 9.99999974E-6 : f32
    %205 = vector.broadcast %cst_128 : f32 to vector<16x1xf32>
    %206 = arith.addf %202, %205 : vector<16x1xf32>
    %207 = math.rsqrt %206 : vector<16x1xf32>
    %208 = vector.broadcast %207 : vector<16x1xf32> to vector<16x32xf32>
    %209 = arith.mulf %204, %208 : vector<16x32xf32>
    %c1_129 = arith.constant 1 : index
    %c0_130 = arith.constant 0 : index
    %c0_131 = arith.constant 0 : index
    %210 = vector.load %arg20[%c1_129, %c0_130, %c0_131] : memref<4x1x32xf32, #tpu.memory_space<vmem>>, vector<1x1x32xf32>
    %211 = vector.shape_cast %210 : vector<1x1x32xf32> to vector<1x32xf32>
    %212 = vector.broadcast %211 : vector<1x32xf32> to vector<16x32xf32>
    %213 = arith.mulf %209, %212 : vector<16x32xf32>
    %c1_132 = arith.constant 1 : index
    %c0_133 = arith.constant 0 : index
    %c0_134 = arith.constant 0 : index
    %214 = vector.load %arg21[%c1_132, %c0_133, %c0_134] : memref<4x1x32xf32, #tpu.memory_space<vmem>>, vector<1x1x32xf32>
    %215 = vector.shape_cast %214 : vector<1x1x32xf32> to vector<1x32xf32>
    %216 = vector.broadcast %215 : vector<1x32xf32> to vector<16x32xf32>
    %217 = arith.addf %213, %216 : vector<16x32xf32>
    %c0_135 = arith.constant 0 : index
    %c0_136 = arith.constant 0 : index
    %c0_137 = arith.constant 0 : index
    %218 = vector.load %arg22[%c0_135, %c0_136, %c0_137] : memref<2x16x32xf32, #tpu.memory_space<vmem>>, vector<1x16x32xf32>
    %219 = vector.shape_cast %218 : vector<1x16x32xf32> to vector<16x32xf32>
    %220 = vector.shape_cast %217 : vector<16x32xf32> to vector<1x16x32xf32>
    tpu.vector_store %arg22[%c0_135, %c0_136, %c0_137], %220 {strides = array<i32>} : memref<2x16x32xf32, #tpu.memory_space<vmem>>, vector<1x16x32xf32>,
    %c2 = arith.constant 2 : index
    %c0_138 = arith.constant 0 : index
    %c0_139 = arith.constant 0 : index
    %221 = vector.load %arg9[%c2, %c0_138, %c0_139] : memref<4x32x32xf32, #tpu.memory_space<vmem>>, vector<1x32x32xf32>
    %222 = vector.shape_cast %221 : vector<1x32x32xf32> to vector<32x32xf32>
    %cst_140 = arith.constant dense<0.000000e+00> : vector<16x32xf32>
    %223 = tpu.matmul %35, %222, %cst_140 {dimension_numbers = #tpu.dot_dimension_numbers<[1], [0], [0], [1], [0, 0, 1, 1], [], []>} : vector<16x32xf32>, vector<32x32xf32>, vector<16x32xf32> -> vector<16x32xf32>
    %c2_141 = arith.constant 2 : index
    %c0_142 = arith.constant 0 : index
    %c0_143 = arith.constant 0 : index
    %224 = vector.load %arg10[%c2_141, %c0_142, %c0_143] : memref<4x1x32xf32, #tpu.memory_space<vmem>>, vector<1x1x32xf32>
    %225 = vector.shape_cast %224 : vector<1x1x32xf32> to vector<1x32xf32>
    %226 = vector.broadcast %225 : vector<1x32xf32> to vector<16x32xf32>
    %227 = arith.addf %223, %226 : vector<16x32xf32>
    %c2_144 = arith.constant 2 : index
    %c0_145 = arith.constant 0 : index
    %c0_146 = arith.constant 0 : index
    %228 = vector.load %arg12[%c2_144, %c0_145, %c0_146] : memref<4x32x32xf32, #tpu.memory_space<vmem>>, vector<1x32x32xf32>
    %229 = vector.shape_cast %228 : vector<1x32x32xf32> to vector<32x32xf32>
    %cst_147 = arith.constant dense<0.000000e+00> : vector<16x32xf32>
    %230 = tpu.matmul %17, %229, %cst_147 {dimension_numbers = #tpu.dot_dimension_numbers<[1], [0], [0], [1], [0, 0, 1, 1], [], []>} : vector<16x32xf32>, vector<32x32xf32>, vector<16x32xf32> -> vector<16x32xf32>
    %cst_148 = arith.constant dense<0.000000e+00> : vector<24x32xf32>
    %231 = tpu.matmul %48, %227, %cst_148 {dimension_numbers = #tpu.dot_dimension_numbers<[1], [0], [0], [1], [0, 0, 1, 1], [], []>} : vector<24x16xf32>, vector<16x32xf32>, vector<24x32xf32> -> vector<24x32xf32>
    %cst_149 = arith.constant dense<0.000000e+00> : vector<24x32xf32>
    %232 = tpu.matmul %42, %230, %cst_149 {dimension_numbers = #tpu.dot_dimension_numbers<[1], [0], [0], [1], [0, 0, 1, 1], [], []>} : vector<24x16xf32>, vector<16x32xf32>, vector<24x32xf32> -> vector<24x32xf32>
    %233 = arith.addf %231, %232 : vector<24x32xf32>
    %c2_150 = arith.constant 2 : index
    %c0_151 = arith.constant 0 : index
    %c0_152 = arith.constant 0 : index
    %234 = vector.load %arg11[%c2_150, %c0_151, %c0_152] : memref<4x1x32xf32, #tpu.memory_space<vmem>>, vector<1x1x32xf32>
    %235 = vector.shape_cast %234 : vector<1x1x32xf32> to vector<1x32xf32>
    %236 = vector.broadcast %36 : vector<24x1xf32> to vector<24x32xf32>
    %237 = vector.broadcast %235 : vector<1x32xf32> to vector<24x32xf32>
    %238 = arith.mulf %236, %237 : vector<24x32xf32>
    %239 = arith.addf %233, %238 : vector<24x32xf32>
    %cst_153 = arith.constant 0.000000e+00 : f32
    %240 = vector.broadcast %cst_153 : f32 to vector<24x32xf32>
    %241 = arith.maximumf %239, %240 : vector<24x32xf32>
    %c2_154 = arith.constant 2 : index
    %c0_155 = arith.constant 0 : index
    %c0_156 = arith.constant 0 : index
    %242 = vector.load %arg13[%c2_154, %c0_155, %c0_156] : memref<4x32x32xf32, #tpu.memory_space<vmem>>, vector<1x32x32xf32>
    %243 = vector.shape_cast %242 : vector<1x32x32xf32> to vector<32x32xf32>
    %cst_157 = arith.constant dense<0.000000e+00> : vector<24x32xf32>
    %244 = tpu.matmul %241, %243, %cst_157 {dimension_numbers = #tpu.dot_dimension_numbers<[1], [0], [0], [1], [0, 0, 1, 1], [], []>} : vector<24x32xf32>, vector<32x32xf32>, vector<24x32xf32> -> vector<24x32xf32>
    %c2_158 = arith.constant 2 : index
    %c0_159 = arith.constant 0 : index
    %c0_160 = arith.constant 0 : index
    %245 = vector.load %arg14[%c2_158, %c0_159, %c0_160] : memref<4x1x32xf32, #tpu.memory_space<vmem>>, vector<1x1x32xf32>
    %246 = vector.shape_cast %245 : vector<1x1x32xf32> to vector<1x32xf32>
    %247 = vector.broadcast %246 : vector<1x32xf32> to vector<24x32xf32>
    %248 = arith.addf %244, %247 : vector<24x32xf32>
    %cst_161 = arith.constant dense<0.000000e+00> : vector<16x32xf32>
    %249 = tpu.matmul %60, %248, %cst_161 {dimension_numbers = #tpu.dot_dimension_numbers<[1], [0], [0], [1], [0, 0, 1, 1], [], []>} : vector<16x24xf32>, vector<24x32xf32>, vector<16x32xf32> -> vector<16x32xf32>
    %c2_162 = arith.constant 2 : index
    %c0_163 = arith.constant 0 : index
    %c0_164 = arith.constant 0 : index
    %250 = vector.load %arg15[%c2_162, %c0_163, %c0_164] : memref<4x32x32xf32, #tpu.memory_space<vmem>>, vector<1x32x32xf32>
    %251 = vector.shape_cast %250 : vector<1x32x32xf32> to vector<32x32xf32>
    %cst_165 = arith.constant dense<0.000000e+00> : vector<16x32xf32>
    %252 = tpu.matmul %249, %251, %cst_165 {dimension_numbers = #tpu.dot_dimension_numbers<[1], [0], [0], [1], [0, 0, 1, 1], [], []>} : vector<16x32xf32>, vector<32x32xf32>, vector<16x32xf32> -> vector<16x32xf32>
    %c2_166 = arith.constant 2 : index
    %c0_167 = arith.constant 0 : index
    %c0_168 = arith.constant 0 : index
    %253 = vector.load %arg16[%c2_166, %c0_167, %c0_168] : memref<4x32x32xf32, #tpu.memory_space<vmem>>, vector<1x32x32xf32>
    %254 = vector.shape_cast %253 : vector<1x32x32xf32> to vector<32x32xf32>
    %cst_169 = arith.constant dense<0.000000e+00> : vector<16x32xf32>
    %255 = tpu.matmul %35, %254, %cst_169 {dimension_numbers = #tpu.dot_dimension_numbers<[1], [0], [0], [1], [0, 0, 1, 1], [], []>} : vector<16x32xf32>, vector<32x32xf32>, vector<16x32xf32> -> vector<16x32xf32>
    %256 = arith.addf %252, %255 : vector<16x32xf32>
    %c2_170 = arith.constant 2 : index
    %c0_171 = arith.constant 0 : index
    %c0_172 = arith.constant 0 : index
    %257 = vector.load %arg17[%c2_170, %c0_171, %c0_172] : memref<4x1x32xf32, #tpu.memory_space<vmem>>, vector<1x1x32xf32>
    %258 = vector.shape_cast %257 : vector<1x1x32xf32> to vector<1x32xf32>
    %259 = vector.broadcast %258 : vector<1x32xf32> to vector<16x32xf32>
    %260 = arith.addf %256, %259 : vector<16x32xf32>
    %cst_173 = arith.constant 0.000000e+00 : f32
    %261 = vector.broadcast %cst_173 : f32 to vector<16x32xf32>
    %262 = arith.maximumf %260, %261 : vector<16x32xf32>
    %c2_174 = arith.constant 2 : index
    %c0_175 = arith.constant 0 : index
    %c0_176 = arith.constant 0 : index
    %263 = vector.load %arg18[%c2_174, %c0_175, %c0_176] : memref<4x32x32xf32, #tpu.memory_space<vmem>>, vector<1x32x32xf32>
    %264 = vector.shape_cast %263 : vector<1x32x32xf32> to vector<32x32xf32>
    %cst_177 = arith.constant dense<0.000000e+00> : vector<16x32xf32>
    %265 = tpu.matmul %262, %264, %cst_177 {dimension_numbers = #tpu.dot_dimension_numbers<[1], [0], [0], [1], [0, 0, 1, 1], [], []>} : vector<16x32xf32>, vector<32x32xf32>, vector<16x32xf32> -> vector<16x32xf32>
    %c2_178 = arith.constant 2 : index
    %c0_179 = arith.constant 0 : index
    %c0_180 = arith.constant 0 : index
    %266 = vector.load %arg19[%c2_178, %c0_179, %c0_180] : memref<4x1x32xf32, #tpu.memory_space<vmem>>, vector<1x1x32xf32>
    %267 = vector.shape_cast %266 : vector<1x1x32xf32> to vector<1x32xf32>
    %268 = vector.broadcast %267 : vector<1x32xf32> to vector<16x32xf32>
    %269 = arith.addf %265, %268 : vector<16x32xf32>
    %cst_181 = arith.constant dense<0.000000e+00> : vector<16xf32>
    %270 = vector.multi_reduction <add>, %269, %cst_181 [1] : vector<16x32xf32> to vector<16xf32>
    %271 = vector.shape_cast %270 : vector<16xf32> to vector<16x1xf32>
    %cst_182 = arith.constant 3.200000e+01 : f32
    %272 = vector.broadcast %cst_182 : f32 to vector<16x1xf32>
    %273 = arith.divf %271, %272 : vector<16x1xf32>
    %274 = vector.broadcast %273 : vector<16x1xf32> to vector<16x32xf32>
    %275 = arith.subf %269, %274 : vector<16x32xf32>
    %276 = vector.broadcast %273 : vector<16x1xf32> to vector<16x32xf32>
    %277 = arith.subf %269, %276 : vector<16x32xf32>
    %278 = arith.mulf %275, %277 : vector<16x32xf32>
    %cst_183 = arith.constant dense<0.000000e+00> : vector<16xf32>
    %279 = vector.multi_reduction <add>, %278, %cst_183 [1] : vector<16x32xf32> to vector<16xf32>
    %280 = vector.shape_cast %279 : vector<16xf32> to vector<16x1xf32>
    %cst_184 = arith.constant 3.200000e+01 : f32
    %281 = vector.broadcast %cst_184 : f32 to vector<16x1xf32>
    %282 = arith.divf %280, %281 : vector<16x1xf32>
    %283 = vector.broadcast %273 : vector<16x1xf32> to vector<16x32xf32>
    %284 = arith.subf %269, %283 : vector<16x32xf32>
    %cst_185 = arith.constant 9.99999974E-6 : f32
    %285 = vector.broadcast %cst_185 : f32 to vector<16x1xf32>
    %286 = arith.addf %282, %285 : vector<16x1xf32>
    %287 = math.rsqrt %286 : vector<16x1xf32>
    %288 = vector.broadcast %287 : vector<16x1xf32> to vector<16x32xf32>
    %289 = arith.mulf %284, %288 : vector<16x32xf32>
    %c2_186 = arith.constant 2 : index
    %c0_187 = arith.constant 0 : index
    %c0_188 = arith.constant 0 : index
    %290 = vector.load %arg20[%c2_186, %c0_187, %c0_188] : memref<4x1x32xf32, #tpu.memory_space<vmem>>, vector<1x1x32xf32>
    %291 = vector.shape_cast %290 : vector<1x1x32xf32> to vector<1x32xf32>
    %292 = vector.broadcast %291 : vector<1x32xf32> to vector<16x32xf32>
    %293 = arith.mulf %289, %292 : vector<16x32xf32>
    %c2_189 = arith.constant 2 : index
    %c0_190 = arith.constant 0 : index
    %c0_191 = arith.constant 0 : index
    %294 = vector.load %arg21[%c2_189, %c0_190, %c0_191] : memref<4x1x32xf32, #tpu.memory_space<vmem>>, vector<1x1x32xf32>
    %295 = vector.shape_cast %294 : vector<1x1x32xf32> to vector<1x32xf32>
    %296 = vector.broadcast %295 : vector<1x32xf32> to vector<16x32xf32>
    %297 = arith.addf %293, %296 : vector<16x32xf32>
    %c1_192 = arith.constant 1 : index
    %c0_193 = arith.constant 0 : index
    %c0_194 = arith.constant 0 : index
    %298 = vector.load %arg23[%c1_192, %c0_193, %c0_194] : memref<2x16x32xf32, #tpu.memory_space<vmem>>, vector<1x16x32xf32>
    %299 = vector.shape_cast %298 : vector<1x16x32xf32> to vector<16x32xf32>
    %300 = vector.shape_cast %297 : vector<16x32xf32> to vector<1x16x32xf32>
    tpu.vector_store %arg23[%c1_192, %c0_193, %c0_194], %300 {strides = array<i32>} : memref<2x16x32xf32, #tpu.memory_space<vmem>>, vector<1x16x32xf32>,
    %c3 = arith.constant 3 : index
    %c0_195 = arith.constant 0 : index
    %c0_196 = arith.constant 0 : index
    %301 = vector.load %arg9[%c3, %c0_195, %c0_196] : memref<4x32x32xf32, #tpu.memory_space<vmem>>, vector<1x32x32xf32>
    %302 = vector.shape_cast %301 : vector<1x32x32xf32> to vector<32x32xf32>
    %cst_197 = arith.constant dense<0.000000e+00> : vector<16x32xf32>
    %303 = tpu.matmul %17, %302, %cst_197 {dimension_numbers = #tpu.dot_dimension_numbers<[1], [0], [0], [1], [0, 0, 1, 1], [], []>} : vector<16x32xf32>, vector<32x32xf32>, vector<16x32xf32> -> vector<16x32xf32>
    %c3_198 = arith.constant 3 : index
    %c0_199 = arith.constant 0 : index
    %c0_200 = arith.constant 0 : index
    %304 = vector.load %arg10[%c3_198, %c0_199, %c0_200] : memref<4x1x32xf32, #tpu.memory_space<vmem>>, vector<1x1x32xf32>
    %305 = vector.shape_cast %304 : vector<1x1x32xf32> to vector<1x32xf32>
    %306 = vector.broadcast %305 : vector<1x32xf32> to vector<16x32xf32>
    %307 = arith.addf %303, %306 : vector<16x32xf32>
    %c3_201 = arith.constant 3 : index
    %c0_202 = arith.constant 0 : index
    %c0_203 = arith.constant 0 : index
    %308 = vector.load %arg12[%c3_201, %c0_202, %c0_203] : memref<4x32x32xf32, #tpu.memory_space<vmem>>, vector<1x32x32xf32>
    %309 = vector.shape_cast %308 : vector<1x32x32xf32> to vector<32x32xf32>
    %cst_204 = arith.constant dense<0.000000e+00> : vector<16x32xf32>
    %310 = tpu.matmul %35, %309, %cst_204 {dimension_numbers = #tpu.dot_dimension_numbers<[1], [0], [0], [1], [0, 0, 1, 1], [], []>} : vector<16x32xf32>, vector<32x32xf32>, vector<16x32xf32> -> vector<16x32xf32>
    %cst_205 = arith.constant dense<0.000000e+00> : vector<24x32xf32>
    %311 = tpu.matmul %42, %307, %cst_205 {dimension_numbers = #tpu.dot_dimension_numbers<[1], [0], [0], [1], [0, 0, 1, 1], [], []>} : vector<24x16xf32>, vector<16x32xf32>, vector<24x32xf32> -> vector<24x32xf32>
    %cst_206 = arith.constant dense<0.000000e+00> : vector<24x32xf32>
    %312 = tpu.matmul %48, %310, %cst_206 {dimension_numbers = #tpu.dot_dimension_numbers<[1], [0], [0], [1], [0, 0, 1, 1], [], []>} : vector<24x16xf32>, vector<16x32xf32>, vector<24x32xf32> -> vector<24x32xf32>
    %313 = arith.addf %311, %312 : vector<24x32xf32>
    %c3_207 = arith.constant 3 : index
    %c0_208 = arith.constant 0 : index
    %c0_209 = arith.constant 0 : index
    %314 = vector.load %arg11[%c3_207, %c0_208, %c0_209] : memref<4x1x32xf32, #tpu.memory_space<vmem>>, vector<1x1x32xf32>
    %315 = vector.shape_cast %314 : vector<1x1x32xf32> to vector<1x32xf32>
    %316 = vector.broadcast %36 : vector<24x1xf32> to vector<24x32xf32>
    %317 = vector.broadcast %315 : vector<1x32xf32> to vector<24x32xf32>
    %318 = arith.mulf %316, %317 : vector<24x32xf32>
    %319 = arith.addf %313, %318 : vector<24x32xf32>
    %cst_210 = arith.constant 0.000000e+00 : f32
    %320 = vector.broadcast %cst_210 : f32 to vector<24x32xf32>
    %321 = arith.maximumf %319, %320 : vector<24x32xf32>
    %c3_211 = arith.constant 3 : index
    %c0_212 = arith.constant 0 : index
    %c0_213 = arith.constant 0 : index
    %322 = vector.load %arg13[%c3_211, %c0_212, %c0_213] : memref<4x32x32xf32, #tpu.memory_space<vmem>>, vector<1x32x32xf32>
    %323 = vector.shape_cast %322 : vector<1x32x32xf32> to vector<32x32xf32>
    %cst_214 = arith.constant dense<0.000000e+00> : vector<24x32xf32>
    %324 = tpu.matmul %321, %323, %cst_214 {dimension_numbers = #tpu.dot_dimension_numbers<[1], [0], [0], [1], [0, 0, 1, 1], [], []>} : vector<24x32xf32>, vector<32x32xf32>, vector<24x32xf32> -> vector<24x32xf32>
    %c3_215 = arith.constant 3 : index
    %c0_216 = arith.constant 0 : index
    %c0_217 = arith.constant 0 : index
    %325 = vector.load %arg14[%c3_215, %c0_216, %c0_217] : memref<4x1x32xf32, #tpu.memory_space<vmem>>, vector<1x1x32xf32>
    %326 = vector.shape_cast %325 : vector<1x1x32xf32> to vector<1x32xf32>
    %327 = vector.broadcast %326 : vector<1x32xf32> to vector<24x32xf32>
    %328 = arith.addf %324, %327 : vector<24x32xf32>
    %cst_218 = arith.constant dense<0.000000e+00> : vector<16x32xf32>
    %329 = tpu.matmul %54, %328, %cst_218 {dimension_numbers = #tpu.dot_dimension_numbers<[1], [0], [0], [1], [0, 0, 1, 1], [], []>} : vector<16x24xf32>, vector<24x32xf32>, vector<16x32xf32> -> vector<16x32xf32>
    %c3_219 = arith.constant 3 : index
    %c0_220 = arith.constant 0 : index
    %c0_221 = arith.constant 0 : index
    %330 = vector.load %arg15[%c3_219, %c0_220, %c0_221] : memref<4x32x32xf32, #tpu.memory_space<vmem>>, vector<1x32x32xf32>
    %331 = vector.shape_cast %330 : vector<1x32x32xf32> to vector<32x32xf32>
    %cst_222 = arith.constant dense<0.000000e+00> : vector<16x32xf32>
    %332 = tpu.matmul %329, %331, %cst_222 {dimension_numbers = #tpu.dot_dimension_numbers<[1], [0], [0], [1], [0, 0, 1, 1], [], []>} : vector<16x32xf32>, vector<32x32xf32>, vector<16x32xf32> -> vector<16x32xf32>
    %c3_223 = arith.constant 3 : index
    %c0_224 = arith.constant 0 : index
    %c0_225 = arith.constant 0 : index
    %333 = vector.load %arg16[%c3_223, %c0_224, %c0_225] : memref<4x32x32xf32, #tpu.memory_space<vmem>>, vector<1x32x32xf32>
    %334 = vector.shape_cast %333 : vector<1x32x32xf32> to vector<32x32xf32>
    %cst_226 = arith.constant dense<0.000000e+00> : vector<16x32xf32>
    %335 = tpu.matmul %17, %334, %cst_226 {dimension_numbers = #tpu.dot_dimension_numbers<[1], [0], [0], [1], [0, 0, 1, 1], [], []>} : vector<16x32xf32>, vector<32x32xf32>, vector<16x32xf32> -> vector<16x32xf32>
    %336 = arith.addf %332, %335 : vector<16x32xf32>
    %c3_227 = arith.constant 3 : index
    %c0_228 = arith.constant 0 : index
    %c0_229 = arith.constant 0 : index
    %337 = vector.load %arg17[%c3_227, %c0_228, %c0_229] : memref<4x1x32xf32, #tpu.memory_space<vmem>>, vector<1x1x32xf32>
    %338 = vector.shape_cast %337 : vector<1x1x32xf32> to vector<1x32xf32>
    %339 = vector.broadcast %338 : vector<1x32xf32> to vector<16x32xf32>
    %340 = arith.addf %336, %339 : vector<16x32xf32>
    %cst_230 = arith.constant 0.000000e+00 : f32
    %341 = vector.broadcast %cst_230 : f32 to vector<16x32xf32>
    %342 = arith.maximumf %340, %341 : vector<16x32xf32>
    %c3_231 = arith.constant 3 : index
    %c0_232 = arith.constant 0 : index
    %c0_233 = arith.constant 0 : index
    %343 = vector.load %arg18[%c3_231, %c0_232, %c0_233] : memref<4x32x32xf32, #tpu.memory_space<vmem>>, vector<1x32x32xf32>
    %344 = vector.shape_cast %343 : vector<1x32x32xf32> to vector<32x32xf32>
    %cst_234 = arith.constant dense<0.000000e+00> : vector<16x32xf32>
    %345 = tpu.matmul %342, %344, %cst_234 {dimension_numbers = #tpu.dot_dimension_numbers<[1], [0], [0], [1], [0, 0, 1, 1], [], []>} : vector<16x32xf32>, vector<32x32xf32>, vector<16x32xf32> -> vector<16x32xf32>
    %c3_235 = arith.constant 3 : index
    %c0_236 = arith.constant 0 : index
    %c0_237 = arith.constant 0 : index
    %346 = vector.load %arg19[%c3_235, %c0_236, %c0_237] : memref<4x1x32xf32, #tpu.memory_space<vmem>>, vector<1x1x32xf32>
    %347 = vector.shape_cast %346 : vector<1x1x32xf32> to vector<1x32xf32>
    %348 = vector.broadcast %347 : vector<1x32xf32> to vector<16x32xf32>
    %349 = arith.addf %345, %348 : vector<16x32xf32>
    %cst_238 = arith.constant dense<0.000000e+00> : vector<16xf32>
    %350 = vector.multi_reduction <add>, %349, %cst_238 [1] : vector<16x32xf32> to vector<16xf32>
    %351 = vector.shape_cast %350 : vector<16xf32> to vector<16x1xf32>
    %cst_239 = arith.constant 3.200000e+01 : f32
    %352 = vector.broadcast %cst_239 : f32 to vector<16x1xf32>
    %353 = arith.divf %351, %352 : vector<16x1xf32>
    %354 = vector.broadcast %353 : vector<16x1xf32> to vector<16x32xf32>
    %355 = arith.subf %349, %354 : vector<16x32xf32>
    %356 = vector.broadcast %353 : vector<16x1xf32> to vector<16x32xf32>
    %357 = arith.subf %349, %356 : vector<16x32xf32>
    %358 = arith.mulf %355, %357 : vector<16x32xf32>
    %cst_240 = arith.constant dense<0.000000e+00> : vector<16xf32>
    %359 = vector.multi_reduction <add>, %358, %cst_240 [1] : vector<16x32xf32> to vector<16xf32>
    %360 = vector.shape_cast %359 : vector<16xf32> to vector<16x1xf32>
    %cst_241 = arith.constant 3.200000e+01 : f32
    %361 = vector.broadcast %cst_241 : f32 to vector<16x1xf32>
    %362 = arith.divf %360, %361 : vector<16x1xf32>
    %363 = vector.broadcast %353 : vector<16x1xf32> to vector<16x32xf32>
    %364 = arith.subf %349, %363 : vector<16x32xf32>
    %cst_242 = arith.constant 9.99999974E-6 : f32
    %365 = vector.broadcast %cst_242 : f32 to vector<16x1xf32>
    %366 = arith.addf %362, %365 : vector<16x1xf32>
    %367 = math.rsqrt %366 : vector<16x1xf32>
    %368 = vector.broadcast %367 : vector<16x1xf32> to vector<16x32xf32>
    %369 = arith.mulf %364, %368 : vector<16x32xf32>
    %c3_243 = arith.constant 3 : index
    %c0_244 = arith.constant 0 : index
    %c0_245 = arith.constant 0 : index
    %370 = vector.load %arg20[%c3_243, %c0_244, %c0_245] : memref<4x1x32xf32, #tpu.memory_space<vmem>>, vector<1x1x32xf32>
    %371 = vector.shape_cast %370 : vector<1x1x32xf32> to vector<1x32xf32>
    %372 = vector.broadcast %371 : vector<1x32xf32> to vector<16x32xf32>
    %373 = arith.mulf %369, %372 : vector<16x32xf32>
    %c3_246 = arith.constant 3 : index
    %c0_247 = arith.constant 0 : index
    %c0_248 = arith.constant 0 : index
    %374 = vector.load %arg21[%c3_246, %c0_247, %c0_248] : memref<4x1x32xf32, #tpu.memory_space<vmem>>, vector<1x1x32xf32>
    %375 = vector.shape_cast %374 : vector<1x1x32xf32> to vector<1x32xf32>
    %376 = vector.broadcast %375 : vector<1x32xf32> to vector<16x32xf32>
    %377 = arith.addf %373, %376 : vector<16x32xf32>
    %c1_249 = arith.constant 1 : index
    %c0_250 = arith.constant 0 : index
    %c0_251 = arith.constant 0 : index
    %378 = vector.load %arg22[%c1_249, %c0_250, %c0_251] : memref<2x16x32xf32, #tpu.memory_space<vmem>>, vector<1x16x32xf32>
    %379 = vector.shape_cast %378 : vector<1x16x32xf32> to vector<16x32xf32>
    %380 = vector.shape_cast %377 : vector<16x32xf32> to vector<1x16x32xf32>
    tpu.vector_store %arg22[%c1_249, %c0_250, %c0_251], %380 {strides = array<i32>} : memref<2x16x32xf32, #tpu.memory_space<vmem>>, vector<1x16x32xf32>,
    return
  }
}

</mosaic_0001>

<bundles_post_ra>
// kernel: decoder_forward.5
= control target key start
LH: loop header
LB: loop body
LE: loop exit
PB: predicated region body
PF: predicated region fallthrough
CT: control target
= control target key end

     0   :  { %vm66_vm0 = vcmask 261120   ;;  %v984_v3 = vmov 0.0   ;;  %v50_v23 = vlaneseq  ;;  %vm405_vm2 = vcmask 1043456   ;;  %s1308_s2 = inlined_call_operand.vmem [shape: f32[2,32,32], index: 2, kind: input, shape index: {}]   ;;  %s1309_s0 = inlined_call_operand.vmem [shape: f32[2,16,32], index: 0, kind: input, shape index: {}]   ;;  %s1310_s6 = inlined_call_operand.vmem [shape: f32[32,8], index: 6, kind: input, shape index: {}]   ;;  %s1311_s3 = inlined_call_operand.vmem [shape: f32[1,32], index: 3, kind: input, shape index: {}]   ;;  %s1312_s4 = inlined_call_operand.vmem [shape: f32[1,32], index: 4, kind: input, shape index: {}]   ;;  %s1313_s5 = inlined_call_operand.vmem [shape: f32[1,32], index: 5, kind: input, shape index: {}]   ;;  %s1314_s9 = inlined_call_operand.vmem [shape: f32[4,256], index: 9, kind: input, shape index: {}]   ;;  %s1315_s8 = inlined_call_operand.vmem [shape: f32[8,256], index: 8, kind: input, shape index: {}]   ;;  %s1316_s1 = inlined_call_operand.vmem [shape: f32[16,4], index: 1, kind: input, shape index: {}]   ;;  %s1317_s7 = inlined_call_operand.vmem [shape: f32[1,8], index: 7, kind: input, shape index: {}]   ;;  %s1318_s13 = inlined_call_operand.vmem [shape: f32[256,8], index: 13, kind: input, shape index: {}]   ;;  %s1319_s10 = inlined_call_operand.vmem [shape: f32[1,256], index: 10, kind: input, shape index: {}]   ;;  %s1320_s11 = inlined_call_operand.vmem [shape: f32[1,256], index: 11, kind: input, shape index: {}]   ;;  %s1321_s12 = inlined_call_operand.vmem [shape: f32[1,256], index: 12, kind: input, shape index: {}]   ;;  %s1322_s14 = inlined_call_operand.vmem [shape: f32[1,8], index: 14, kind: input, shape index: {}]   ;;  %s1323_s15 = inlined_call_operand.vmem [shape: f32[16,8], index: 15, kind: output, shape index: {}]  }
   0x1   :  { %v62_v0 = vld [vmem:[%s1308_s2] sm:$0xff]  ;;  %v63_v1 = vld [vmem:[%s1308_s2 + $0x8] sm:$0xff]  ;;  %v64_v2 = vld [vmem:[%s1308_s2 + $0x10] sm:$0xff]  ;;  %474 = vmatprep.mubr.f32.mxu0 %v984_v3  ;;  %vm398_vm3 = vcmask 31744   ;;  %vm487_vm4 = vcmask 64512  }
   0x2   :  { %v912_v4 = vpack.c.bf16 %v63_v1, %v62_v0  ;;  %v65_v5 = vld [vmem:[%s1308_s2 + $0x18] sm:$0xff]  ;;  %v60_v6 = vld [vmem:[%s1309_s0] sm:$0xff]  ;;  %v806_v9 = vld [vmem:[%s1308_s2 + $0x28] sm:$0xff]  ;;  %v1118_v24 = vshrl.u32 %v50_v23, 7 }
   0x3   :  { %v916_v7 = vpack.c.bf16 %v65_v5, %v64_v2  ;;  %887 = vmatprep.mubr.msk.f32.mxu1 %vm66_vm0, %v60_v6  ;;  %v805_v8 = vld [vmem:[%s1308_s2 + $0x20] sm:$0xff]  ;;  %v807_v11 = vld [vmem:[%s1308_s2 + $0x30] sm:$0xff]  ;;  %v808_v12 = vld [vmem:[%s1308_s2 + $0x38] sm:$0xff] }
   0x4   :  { %913 = vmatprep.subr.bf16.mxu1 %v912_v4  ;;  %v920_v10 = vpack.c.bf16 %v806_v9, %v805_v8  ;;  %v61_v13 = vld [vmem:[%s1309_s0 + $0x8] sm:$0xff]  ;;  %v924_v14 = vpack.c.bf16 %v808_v12, %v807_v11  ;;  %v803_v15 = vld [vmem:[%s1309_s0 + $0x10] sm:$0xff]  ;;  %v804_v16 = vld [vmem:[%s1309_s0 + $0x18] sm:$0xff]  ;;  %v52_v25 = vadd.s32 8, %v1118_v24 }
   0x5   :  { %915 = vmatpush3.bf16.msra.mxu1 %v912_v4  ;;  %v299_v17 = vld [vmem:[%s1310_s6] sm:$0xff]  ;;  %v300_v18 = vld [vmem:[%s1310_s6 + $0x8] sm:$0xff]  ;;  %v301_v20 = vld [vmem:[%s1310_s6 + $0x10] sm:$0xff] }
   0x6   :  { %917 = vmatprep.subr.bf16.mxu1 %v916_v7  ;;  %v928_v19 = vpack.c.bf16 %v300_v18, %v299_v17  ;;  %v302_v21 = vld [vmem:[%s1310_s6 + $0x18] sm:$0xff]  ;;  %vm54_vm1 = vcmp.lt.s32.totalorder %v52_v25, 10  ;;  %v802_v26 = vld [vmem:[%s1311_s3] ss:$0 sm:$0xff]  ;;  %v392_v9 = vld [vmem:[%s1315_s8 + $0x8] sm:$0xff] }
   0x7   :  { %v932_v22 = vpack.c.bf16 %v302_v21, %v301_v20  ;;  %v1125_v27 = vsel %vm54_vm1, 1.0, %v984_v3  ;;  %v811_v60 = vld [vmem:[%s1312_s4] ss:$0 sm:$0xff]  ;;  %v394_v12 = vld [vmem:[%s1316_s1 + $0x8] sm:$0xff] }
   0x8   :  { %v812_v63 = vld [vmem:[%s1313_s5] ss:$0 sm:$0xff]  ;;  %v696_v23 = vld [vmem:[%s1318_s13 + $0x88] sm:$0xff] }
   0x9   :  { %919 = vmatpush3.bf16.msra.mxu1 %v916_v7  ;;  %v395_v7 = vld [vmem:[%s1314_s9] sm:$0xff] }
   0xa   :  { %921 = vmatprep.subr.bf16.mxu1 %v920_v10  ;;  %v397_v8 = vcombine.high %v395_v7, %v395_v7  ;;  %v393_v11 = vld [vmem:[%s1316_s1] sm:$0xff] }
   0xb   :  { %v679_v25 = vld [vmem:[%s1318_s13] sm:$0xff] }
   0xc   :  { %888 = vmatmul.mubr.msk.f32.vlgmr.msra.gmra.mrb[0].mxu1 %vm66_vm0, %v61_v13  ;;  %816 = vmatprep.subr.msk.mxu0 %vm405_vm2, %v397_v8  ;;  %v813_v13 = vld [vmem:[%s1317_s7] ss:$0 sm:$0xff] }
   0xd   :  { %923 = vmatpush3.bf16.msra.mxu1 %v920_v10  ;;  %898 = vmatprep.mubr.msk.f32.mxu1 %vm66_vm0, %v803_v15  ;;  %v391_v10 = vld [vmem:[%s1315_s8] sm:$0xff] }
   0xe   :  { %925 = vmatprep.subr.bf16.mxu1 %v924_v14  ;;  %817 = vmatpush1.msk.msra.mxu0 %vm405_vm2, %v395_v7 }
   0xf   :  { %818 = vmatmul.mubr.msk.f32.vlgmr.msra.gmra.mrb[0].mxu0 %vm398_vm3, %v393_v11 }
  0x10   :  { %480 = vmatprep.mubr.f32.mxu0 %v984_v3 }
  0x11   :  { %927 = vmatpush3.bf16.msra.mxu1 %v924_v14 }
  0x12   :  { %929 = vmatprep.subr.bf16.mxu1 %v928_v19 }
  0x13   :  { %819 = vmatmul.mubr.msk.f32.gmra.mrb[2].mxu0 %vm398_vm3, %v394_v12  ;;  %v571_v12 = vld [vmem:[%s1319_s10] sm:$0x3] }
  0x14   :  { %899 = vmatmul.mubr.msk.f32.vlgmr.msra.gmra.mrb[0].mxu1 %vm66_vm0, %v804_v16 }
  0x15   :  { %931 = vmatpush3.bf16.msra.mxu1 %v928_v19 }
  0x16   :  { %933 = vmatprep.subr.bf16.mxu1 %v932_v22 }
  0x19   :  { %935 = vmatpush3.bf16.msra.mxu1 %v932_v22  ;;  %v695_v22 = vld [vmem:[%s1318_s13 + $0x80] sm:$0xff] }
  0x1a   :  { %494 = vmatprep.subr.mxu1 %v392_v9 }
  0xe2   :  { %v1164_v18 = vpop.f32.mrb[0].mxu0 }
  0xe3   :  { %v1166_v19 = vpop.f32.mrb[1].mxu0 }
  0xe6   :  { %v1168_v20 = vpop.f32.mrb[2].mxu0 }
  0xe7   :  { %v900_v28 = vpop.f32.mrb[0].mxu1  ;;  %v1170_v21 = vpop.f32.mrb[3].mxu0 }
  0xe8   :  { %v968_v29 = vadd.f32 %v900_v28, %v802_v26  ;;  %v236_v30 = vpop.f32.mrb[1].mxu1 }
  0xe9   :  { %v969_v31 = vadd.f32 %v802_v26, %v236_v30  ;;  %v680_v26 = vld [vmem:[%s1318_s13 + $0x8] sm:$0xff]  ;;  %v698_v30 = vld [vmem:[%s1318_s13 + $0x98] sm:$0xff] }
  0xea   :  { %v250_v32 = vmul.f32 %v968_v29, %v1125_v27  ;;  %v938_v28 = vpack.c.bf16 %v680_v26, %v679_v25 }
  0xeb   :  { %v251_v33 = vsel %vm66_vm0, %v969_v31, 0.0 }
  0xec   :  { %v252_v34 = vsel %vm66_vm0, %v250_v32, 0.0  ;;  %v681_v32 = vld [vmem:[%s1318_s13 + $0x10] sm:$0xff] }
  0xed   :  { %v253_v35 = vadd.f32 %v252_v34, %v251_v33  ;;  %v682_v33 = vld [vmem:[%s1318_s13 + $0x18] sm:$0xff] }
  0xee   :  { %v942_v34 = vpack.c.bf16 %v682_v33, %v681_v32 }
  0xef   :  { %v254_v36 = vrot.slane %v253_v35, 4 }
  0xf1   :  { %v255_v37 = vadd.f32 %v254_v36, %v253_v35  ;;  %v699_v35 = vld [vmem:[%s1318_s13 + $0xa0] sm:$0xff]  ;;  %v700_v36 = vld [vmem:[%s1318_s13 + $0xa8] sm:$0xff] }
  0xf3   :  { %v256_v38 = vrot.slane %v255_v37, 2 }
  0xf5   :  { %v257_v39 = vadd.f32 %v256_v38, %v255_v37  ;;  %v944_v37 = vpack.c.bf16 %v700_v36, %v699_v35  ;;  %v683_v38 = vld [vmem:[%s1318_s13 + $0x20] sm:$0xff] }
  0xf7   :  { %v258_v40 = vrot.slane %v257_v39, 1 }
  0xf9   :  { %v259_v41 = vadd.f32 %v258_v40, %v257_v39  ;;  %v684_v39 = vld [vmem:[%s1318_s13 + $0x28] sm:$0xff] }
  0xfa   :  { %v946_v40 = vpack.c.bf16 %v684_v39, %v683_v38 }
  0xfb   :  { %v260_v42 = vmul.f32 0.1, %v259_v41  ;;  %v701_v41 = vld [vmem:[%s1318_s13 + $0xb0] sm:$0xff] }
  0xfd   :  { %v261_v43 = vsub.f32 %v969_v31, %v260_v42  ;;  %v262_v44 = vsub.f32 %v968_v29, %v260_v42  ;;  %v697_v29 = vld [vmem:[%s1318_s13 + $0x90] sm:$0xff]  ;;  %v702_v42 = vld [vmem:[%s1318_s13 + $0xb8] sm:$0xff] }
  0xfe   :  { %v940_v31 = vpack.c.bf16 %v698_v30, %v697_v29 }
  0xff   :  { %v264_v45 = vmul.f32 %v1125_v27, %v262_v44  ;;  %v265_v46 = vmul.f32 %v261_v43, %v261_v43 }
 0x101   :  { %v266_v47 = vmul.f32 %v264_v45, %v264_v45  ;;  %v267_v48 = vsel %vm66_vm0, %v265_v46, 0.0  ;;  %v686_v45 = vld [vmem:[%s1318_s13 + $0x38] sm:$0xff] }
 0x103   :  { %v268_v49 = vsel %vm66_vm0, %v266_v47, 0.0  ;;  %v703_v47 = vld [vmem:[%s1318_s13 + $0xc0] sm:$0xff] }
 0x104   :  { %v269_v50 = vadd.f32 %v268_v49, %v267_v48  ;;  %v704_v48 = vld [vmem:[%s1318_s13 + $0xc8] sm:$0xff] }
 0x105   :  { %v952_v49 = vpack.c.bf16 %v704_v48, %v703_v47 }
 0x106   :  { %v270_v51 = vrot.slane %v269_v50, 4 }
 0x108   :  { %v271_v52 = vadd.f32 %v270_v51, %v269_v50  ;;  %v687_v50 = vld [vmem:[%s1318_s13 + $0x40] sm:$0xff]  ;;  %v688_v51 = vld [vmem:[%s1318_s13 + $0x48] sm:$0xff] }
 0x10a   :  { %v272_v53 = vrot.slane %v271_v52, 2 }
 0x10c   :  { %v273_v54 = vadd.f32 %v272_v53, %v271_v52  ;;  %v954_v52 = vpack.c.bf16 %v688_v51, %v687_v50  ;;  %v705_v53 = vld [vmem:[%s1318_s13 + $0xd0] sm:$0xff] }
 0x10e   :  { %v274_v55 = vrot.slane %v273_v54, 1 }
 0x110   :  { %v275_v56 = vadd.f32 %v274_v55, %v273_v54  ;;  %v706_v54 = vld [vmem:[%s1318_s13 + $0xd8] sm:$0xff] }
 0x111   :  { %v956_v55 = vpack.c.bf16 %v706_v54, %v705_v53 }
 0x112   :  { %v276_v57 = vmul.f32 0.1, %v275_v56  ;;  %v689_v56 = vld [vmem:[%s1318_s13 + $0x50] sm:$0xff] }
 0x114   :  { %v277_v58 = vadd.f32 1e-05, %v276_v57  ;;  %v690_v57 = vld [vmem:[%s1318_s13 + $0x58] sm:$0xff] }
 0x116   :  { %978 = vrsqrt.f32 %v277_v58  ;;  %v958_v58 = vpack.c.bf16 %v690_v57, %v689_v56 }
 0x120   :  { %v979_v59 = vpop.eup %978 }
 0x121   :  { %v279_v61 = vmul.f32 %v979_v59, %v261_v43  ;;  %v280_v62 = vmul.f32 %v979_v59, %v262_v44  ;;  %v948_v43 = vpack.c.bf16 %v702_v42, %v701_v41  ;;  %v685_v44 = vld [vmem:[%s1318_s13 + $0x30] sm:$0xff]  ;;  %v707_v59 = vld [vmem:[%s1318_s13 + $0xe0] sm:$0xff] }
 0x122   :  { %v950_v46 = vpack.c.bf16 %v686_v45, %v685_v44 }
 0x123   :  { %v287_v0 = vmul.f32 %v811_v60, %v279_v61  ;;  %v288_v1 = vmul.f32 %v811_v60, %v280_v62  ;;  %v708_v60 = vld [vmem:[%s1318_s13 + $0xe8] sm:$0xff]  ;;  %v691_v62 = vld [vmem:[%s1318_s13 + $0x60] sm:$0xff] }
 0x124   :  { %v960_v61 = vpack.c.bf16 %v708_v60, %v707_v59 }
 0x125   :  { %v295_v2 = vadd.f32 %v812_v63, %v287_v0  ;;  %v296_v4 = vadd.f32 %v812_v63, %v288_v1  ;;  %v692_v63 = vld [vmem:[%s1318_s13 + $0x68] sm:$0xff]  ;;  %v709_v1 = vld [vmem:[%s1318_s13 + $0xf0] sm:$0xff] }
 0x126   :  { %v962_v0 = vpack.c.bf16 %v692_v63, %v691_v62 }
 0x127   :  { %v297_v5 = vmax.f32 %v295_v2, 0.0  ;;  %v298_v6 = vmax.f32 %v296_v4, 0.0  ;;  %v710_v2 = vld [vmem:[%s1318_s13 + $0xf8] sm:$0xff]  ;;  %v693_v4 = vld [vmem:[%s1318_s13 + $0x70] sm:$0xff] }
 0x129   :  { %909 = vmatprep.mubr.msk.f32.mxu1 %vm66_vm0, %v297_v5  ;;  %v964_v5 = vpack.c.bf16 %v710_v2, %v709_v1 }
 0x12a   :  { %910 = vmatmul.mubr.msk.f32.vlgmr.msra.gmra.mrb[2].mxu1 %vm66_vm0, %v298_v6  ;;  %v694_v6 = vld [vmem:[%s1318_s13 + $0x78] sm:$0xff] }
 0x12b   :  { %558 = vmatprep.mubr.f32.mxu1 %v984_v3  ;;  %495 = vmatpush1.msra.mxu1 %v391_v10  ;;  %v966_v7 = vpack.c.bf16 %v694_v6, %v693_v4  ;;  %v1270_v10 = vsub.s32 0, %v1118_v24 }
 0x1fd   :  { %v911_v14 = vpop.f32.mrb[2].mxu1 }
 0x1fe   :  { %v382_v15 = vpop.f32.mrb[3].mxu1  ;;  %v388_v17 = vadd.f32 %v911_v14, %v813_v13  ;;  %v1277_v14 = vsub.s32 1, %v1118_v24 }
 0x1ff   :  { %v383_v16 = vadd.f32 %v813_v13, %v382_v15 }
 0x201   :  { %820 = vmatmul.mubr.msk.f32.vlgmr.msra.gmra.mrb[4].mxu1 %vm487_vm4, %v383_v16  ;;  %v576_v16 = vrot.slane %v571_v12, %v1270_v10 }
 0x202   :  { %564 = vmatprep.mubr.f32.mxu1 %v984_v3  ;;  %v936_v3 = vpack.c.bf16 %v696_v23, %v695_v22 }
 0x204   :  { %937 = vmatprep.subr.bf16.mxu0 %v936_v3 }
 0x205   :  { %821 = vmatmul.mubr.msk.f32.gmra.mrb[6].mxu1 %vm487_vm4, %v388_v17  ;;  %939 = vmatpush3.bf16.msra.mxu0 %v938_v28 }
 0x206   :  { %941 = vmatprep.subr.bf16.mxu0 %v940_v31 }
 0x209   :  { %943 = vmatpush3.bf16.msra.mxu0 %v942_v34 }
 0x20a   :  { %945 = vmatprep.subr.bf16.mxu0 %v944_v37 }
 0x20d   :  { %947 = vmatpush3.bf16.msra.mxu0 %v946_v40 }
 0x20e   :  { %949 = vmatprep.subr.bf16.mxu0 %v948_v43 }
 0x211   :  { %951 = vmatpush3.bf16.msra.mxu0 %v950_v46 }
 0x212   :  { %953 = vmatprep.subr.bf16.mxu0 %v952_v49 }
 0x215   :  { %955 = vmatpush3.bf16.msra.mxu0 %v954_v52 }
 0x216   :  { %957 = vmatprep.subr.bf16.mxu0 %v956_v55 }
 0x219   :  { %959 = vmatpush3.bf16.msra.mxu0 %v958_v58 }
 0x21a   :  { %961 = vmatprep.subr.bf16.mxu0 %v960_v61 }
 0x21d   :  { %963 = vmatpush3.bf16.msra.mxu0 %v962_v0 }
 0x21e   :  { %965 = vmatprep.subr.bf16.mxu0 %v964_v5 }
 0x221   :  { %967 = vmatpush3.bf16.msra.mxu0 %v966_v7  ;;  %v587_v7 = vld [vmem:[%s1320_s11] sm:$0x3] }
 0x2d4   :  { %v560_v8 = vpop.f32.mrb[4].mxu1 }
 0x2d5   :  { %v561_v9 = vadd.f32 %v560_v8, %v1164_v18  ;;  %v562_v11 = vpop.f32.mrb[5].mxu1  ;;  %v580_v18 = vrot.slane %v571_v12, %v1277_v14  ;;  %v588_v8 = vld [vmem:[%s1321_s12] sm:$0x3]  ;;  %v653_v12 = vrot.slane %v587_v7, %v1277_v14 }
 0x2d6   :  { %v563_v13 = vadd.f32 %v562_v11, %v1166_v19 }
 0x2d7   :  { %v583_v26 = vadd.f32 %v576_v16, %v561_v9  ;;  %v649_v9 = vrot.slane %v587_v7, %v1270_v10 }
 0x2d8   :  { %v566_v15 = vpop.f32.mrb[6].mxu1  ;;  %v584_v29 = vadd.f32 %v580_v18, %v563_v13 }
 0x2d9   :  { %v567_v17 = vadd.f32 %v566_v15, %v1168_v20  ;;  %v568_v22 = vpop.f32.mrb[7].mxu1 }
 0x2da   :  { %v569_v23 = vadd.f32 %v568_v22, %v1170_v21 }
 0x2db   :  { %v585_v3 = vadd.f32 %v576_v16, %v567_v17  ;;  %v664_v17 = vrot.slane %v588_v8, %v1270_v10 }
 0x2dc   :  { %v586_v25 = vadd.f32 %v580_v18, %v569_v23  ;;  %v668_v23 = vrot.slane %v588_v8, %v1277_v14  ;;  %v822_v14 = vld [vmem:[%s1322_s14] ss:$0 sm:$0xff] }
 0x2dd   :  { %v591_v28 = vmul.f32 %v1125_v27, %v585_v3 }
 0x2de   :  { %v592_v19 = vmul.f32 %v1125_v27, %v586_v25 }
 0x2df   :  { %v593_v24 = vadd.f32 %v591_v28, %v583_v26 }
 0x2e0   :  { %v600_v30 = vadd.f32 %v592_v19, %v584_v29 }
 0x2e1   :  { %v594_v31 = vrot.slane %v593_v24, 4 }
 0x2e2   :  { %v601_v32 = vrot.slane %v600_v30, 4 }
 0x2e3   :  { %v595_v33 = vadd.f32 %v594_v31, %v593_v24 }
 0x2e4   :  { %v602_v34 = vadd.f32 %v601_v32, %v600_v30 }
 0x2e5   :  { %v596_v20 = vrot.slane %v595_v33, 2 }
 0x2e6   :  { %v603_v35 = vrot.slane %v602_v34, 2 }
 0x2e7   :  { %v597_v36 = vadd.f32 %v596_v20, %v595_v33 }
 0x2e8   :  { %v604_v37 = vadd.f32 %v603_v35, %v602_v34 }
 0x2e9   :  { %v598_v38 = vrot.slane %v597_v36, 1 }
 0x2ea   :  { %v605_v21 = vrot.slane %v604_v37, 1 }
 0x2eb   :  { %v599_v39 = vadd.f32 %v598_v38, %v597_v36 }
 0x2ec   :  { %v606_v40 = vadd.f32 %v605_v21, %v604_v37 }
 0x2ed   :  { %v607_v41 = vmul.f32 0.1, %v599_v39 }
 0x2ee   :  { %v608_v42 = vmul.f32 0.1, %v606_v40 }
 0x2ef   :  { %v609_v43 = vsub.f32 %v583_v26, %v607_v41  ;;  %v611_v44 = vsub.f32 %v585_v3, %v607_v41 }
 0x2f0   :  { %v610_v45 = vsub.f32 %v584_v29, %v608_v42  ;;  %v612_v46 = vsub.f32 %v586_v25, %v608_v42 }
 0x2f1   :  { %v615_v47 = vmul.f32 %v1125_v27, %v611_v44  ;;  %v617_v49 = vmul.f32 %v609_v43, %v609_v43 }
 0x2f2   :  { %v616_v48 = vmul.f32 %v1125_v27, %v612_v46  ;;  %v618_v51 = vmul.f32 %v610_v45, %v610_v45 }
 0x2f3   :  { %v619_v50 = vmul.f32 %v615_v47, %v615_v47 }
 0x2f4   :  { %v620_v52 = vmul.f32 %v616_v48, %v616_v48 }
 0x2f5   :  { %v621_v53 = vadd.f32 %v619_v50, %v617_v49 }
 0x2f6   :  { %v628_v54 = vadd.f32 %v620_v52, %v618_v51 }
 0x2f7   :  { %v622_v55 = vrot.slane %v621_v53, 4 }
 0x2f8   :  { %v629_v56 = vrot.slane %v628_v54, 4 }
 0x2f9   :  { %v623_v57 = vadd.f32 %v622_v55, %v621_v53 }
 0x2fa   :  { %v630_v58 = vadd.f32 %v629_v56, %v628_v54 }
 0x2fb   :  { %v624_v59 = vrot.slane %v623_v57, 2 }
 0x2fc   :  { %v631_v60 = vrot.slane %v630_v58, 2 }
 0x2fd   :  { %v625_v61 = vadd.f32 %v624_v59, %v623_v57 }
 0x2fe   :  { %v632_v62 = vadd.f32 %v631_v60, %v630_v58 }
 0x2ff   :  { %v626_v63 = vrot.slane %v625_v61, 1 }
 0x300   :  { %v633_v0 = vrot.slane %v632_v62, 1 }
 0x301   :  { %v627_v1 = vadd.f32 %v626_v63, %v625_v61 }
 0x302   :  { %v634_v2 = vadd.f32 %v633_v0, %v632_v62 }
 0x303   :  { %v635_v4 = vmul.f32 0.1, %v627_v1 }
 0x304   :  { %v636_v27 = vmul.f32 0.1, %v634_v2 }
 0x305   :  { %v637_v5 = vadd.f32 1e-05, %v635_v4 }
 0x306   :  { %v638_v6 = vadd.f32 1e-05, %v636_v27 }
 0x307   :  { %980 = vrsqrt.f32 %v637_v5 }
 0x308   :  { %982 = vrsqrt.f32 %v638_v6 }
 0x311   :  { %v981_v11 = vpop.eup %980 }
 0x312   :  { %v983_v13 = vpop.eup %982  ;;  %v641_v15 = vmul.f32 %v981_v11, %v609_v43  ;;  %v643_v16 = vmul.f32 %v981_v11, %v611_v44 }
 0x313   :  { %v644_v22 = vmul.f32 %v983_v13, %v612_v46  ;;  %v642_v18 = vmul.f32 %v983_v13, %v610_v45 }
 0x314   :  { %v656_v3 = vmul.f32 %v649_v9, %v641_v15  ;;  %v658_v29 = vmul.f32 %v649_v9, %v643_v16 }
 0x315   :  { %v657_v25 = vmul.f32 %v653_v12, %v642_v18  ;;  %v659_v26 = vmul.f32 %v653_v12, %v644_v22 }
 0x316   :  { %v671_v28 = vadd.f32 %v664_v17, %v656_v3  ;;  %v673_v32 = vadd.f32 %v664_v17, %v658_v29 }
 0x317   :  { %v672_v19 = vadd.f32 %v668_v23, %v657_v25  ;;  %v674_v24 = vadd.f32 %v668_v23, %v659_v26 }
 0x318   :  { %v675_v31 = vmax.f32 %v671_v28, 0.0  ;;  %v677_v34 = vmax.f32 %v673_v32, 0.0 }
 0x319   :  { %v676_v30 = vmax.f32 %v672_v19, 0.0  ;;  %v678_v33 = vmax.f32 %v674_v24, 0.0 }
 0x31b   :  { %782 = vmatprep.mubr.f32.mxu0 %v676_v30 }
 0x31c   :  { %783 = vmatmul.mubr.f32.vlgmr.msra.gmra.mrb[4].mxu0 %v675_v31 }
 0x31d   :  { %787 = vmatprep.mubr.f32.mxu0 %v678_v33 }
 0x320   :  { %788 = vmatmul.mubr.f32.gmra.mrb[6].mxu0 %v677_v34 }
 0x3ef   :  { %v873_v10 = vpop.f32.mrb[4].mxu0 }
 0x3f0   :  { %v874_v20 = vpop.f32.mrb[5].mxu0 }
 0x3f1   :  { %v875_v35 = vadd.f32 %v874_v20, %v873_v10 }
 0x3f3   :  { %v785_v36 = vadd.f32 %v875_v35, %v822_v14  ;;  %v876_v37 = vpop.f32.mrb[6].mxu0 }
 0x3f4   :  { %v877_v38 = vpop.f32.mrb[7].mxu0 }
 0x3f5   :  { %793 = vst.msk [vmem:[%s1323_s15] sm:$0xff] %vm487_vm4, %v785_v36  ;;  %v878_v21 = vadd.f32 %v877_v38, %v876_v37 }
 0x3f7   :  { %v790_v39 = vadd.f32 %v878_v21, %v822_v14 }
 0x3f9   :  { %794 = vst.msk [vmem:[%s1323_s15 + $0x8] sm:$0xff] %vm487_vm4, %v790_v39 }

// kernel: decoder_forward.4
= control target key start
LH: loop header
LB: loop body
LE: loop exit
PB: predicated region body
PF: predicated region fallthrough
CT: control target
= control target key end

     0   :  { %vm66_vm0 = vcmask 261120   ;;  %vm405_vm1 = vcmask 1043456   ;;  %v50_v24 = vlaneseq  ;;  %v946_v28 = vmov 0.0   ;;  %s1227_s2 = inlined_call_operand.vmem [shape: f32[2,32,32], index: 2, kind: input, shape index: {}]   ;;  %s1228_s0 = inlined_call_operand.vmem [shape: f32[2,16,32], index: 0, kind: input, shape index: {}]   ;;  %s1229_s6 = inlined_call_operand.vmem [shape: f32[32,8], index: 6, kind: input, shape index: {}]   ;;  %s1230_s9 = inlined_call_operand.vmem [shape: f32[4,160], index: 9, kind: input, shape index: {}]   ;;  %s1231_s3 = inlined_call_operand.vmem [shape: f32[1,32], index: 3, kind: input, shape index: {}]   ;;  %s1232_s4 = inlined_call_operand.vmem [shape: f32[1,32], index: 4, kind: input, shape index: {}]   ;;  %s1233_s5 = inlined_call_operand.vmem [shape: f32[1,32], index: 5, kind: input, shape index: {}]   ;;  %s1234_s8 = inlined_call_operand.vmem [shape: f32[8,160], index: 8, kind: input, shape index: {}]   ;;  %s1235_s1 = inlined_call_operand.vmem [shape: f32[16,4], index: 1, kind: input, shape index: {}]   ;;  %s1236_s7 = inlined_call_operand.vmem [shape: f32[1,8], index: 7, kind: input, shape index: {}]   ;;  %s1237_s13 = inlined_call_operand.vmem [shape: f32[160,5], index: 13, kind: input, shape index: {}]   ;;  %s1238_s10 = inlined_call_operand.vmem [shape: f32[1,160], index: 10, kind: input, shape index: {}]   ;;  %s1239_s11 = inlined_call_operand.vmem [shape: f32[1,160], index: 11, kind: input, shape index: {}]   ;;  %s1240_s12 = inlined_call_operand.vmem [shape: f32[1,160], index: 12, kind: input, shape index: {}]   ;;  %s1241_s14 = inlined_call_operand.vmem [shape: f32[1,5], index: 14, kind: input, shape index: {}]   ;;  %s1242_s15 = inlined_call_operand.vmem [shape: f32[16,5], index: 15, kind: output, shape index: {}]  }
   0x1   :  { %v62_v0 = vld [vmem:[%s1227_s2] sm:$0xff]  ;;  %v63_v1 = vld [vmem:[%s1227_s2 + $0x8] sm:$0xff]  ;;  %v64_v2 = vld [vmem:[%s1227_s2 + $0x10] sm:$0xff]  ;;  %vm398_vm3 = vcmask 31744   ;;  %vm487_vm4 = vcmask 64512   ;;  %vm791_vm5 = vcmask 39936  }
   0x2   :  { %v875_v3 = vpack.c.bf16 %v63_v1, %v62_v0  ;;  %v65_v4 = vld [vmem:[%s1227_s2 + $0x18] sm:$0xff]  ;;  %v60_v5 = vld [vmem:[%s1228_s0] sm:$0xff]  ;;  %v805_v8 = vld [vmem:[%s1227_s2 + $0x28] sm:$0xff]  ;;  %v1084_v25 = vshrl.u32 %v50_v24, 7 }
   0x3   :  { %v879_v6 = vpack.c.bf16 %v65_v4, %v64_v2  ;;  %850 = vmatprep.mubr.msk.f32.mxu1 %vm66_vm0, %v60_v5  ;;  %v804_v7 = vld [vmem:[%s1227_s2 + $0x20] sm:$0xff]  ;;  %v806_v10 = vld [vmem:[%s1227_s2 + $0x30] sm:$0xff]  ;;  %v807_v11 = vld [vmem:[%s1227_s2 + $0x38] sm:$0xff] }
   0x4   :  { %876 = vmatprep.subr.bf16.mxu1 %v875_v3  ;;  %v883_v9 = vpack.c.bf16 %v805_v8, %v804_v7  ;;  %v61_v12 = vld [vmem:[%s1228_s0 + $0x8] sm:$0xff]  ;;  %v887_v13 = vpack.c.bf16 %v807_v11, %v806_v10  ;;  %v802_v14 = vld [vmem:[%s1228_s0 + $0x10] sm:$0xff]  ;;  %v803_v15 = vld [vmem:[%s1228_s0 + $0x18] sm:$0xff]  ;;  %v52_v26 = vadd.s32 8, %v1084_v25 }
   0x5   :  { %878 = vmatpush3.bf16.msra.mxu1 %v875_v3  ;;  %v299_v16 = vld [vmem:[%s1229_s6] sm:$0xff]  ;;  %v300_v17 = vld [vmem:[%s1229_s6 + $0x8] sm:$0xff]  ;;  %v301_v19 = vld [vmem:[%s1229_s6 + $0x10] sm:$0xff] }
   0x6   :  { %880 = vmatprep.subr.bf16.mxu1 %v879_v6  ;;  %v891_v18 = vpack.c.bf16 %v300_v17, %v299_v16  ;;  %v302_v20 = vld [vmem:[%s1229_s6 + $0x18] sm:$0xff]  ;;  %v395_v22 = vld [vmem:[%s1230_s9] sm:$0xff]  ;;  %vm54_vm2 = vcmp.lt.s32.totalorder %v52_v26, 12  ;;  %v392_v8 = vld [vmem:[%s1234_s8 + $0x8] sm:$0xff] }
   0x7   :  { %v895_v21 = vpack.c.bf16 %v302_v20, %v301_v19  ;;  %v397_v23 = vcombine.high %v395_v22, %v395_v22  ;;  %v801_v27 = vld [vmem:[%s1231_s3] ss:$0 sm:$0xff]  ;;  %v1091_v29 = vsel %vm54_vm2, 1.0, %v946_v28  ;;  %v394_v11 = vld [vmem:[%s1235_s1 + $0x8] sm:$0xff]  ;;  %v947_v20 = vmov 0.0|0.0  }
   0x8   :  { %v810_v62 = vld [vmem:[%s1232_s4] ss:$0 sm:$0xff]  ;;  %899 = vmatprep.subr.bf16.mxu0 %v947_v20  ;;  %v688_v26 = vld [vmem:[%s1237_s13 + $0x28] sm:$0xff] }
   0x9   :  { %882 = vmatpush3.bf16.msra.mxu1 %v879_v6  ;;  %v811_v1 = vld [vmem:[%s1233_s5] ss:$0 sm:$0xff] }
   0xa   :  { %884 = vmatprep.subr.bf16.mxu1 %v883_v9  ;;  %v391_v10 = vld [vmem:[%s1234_s8] sm:$0xff] }
   0xb   :  { %v683_v17 = vld [vmem:[%s1237_s13] sm:$0xff] }
   0xc   :  { %851 = vmatmul.mubr.msk.f32.vlgmr.msra.gmra.mrb[0].mxu1 %vm66_vm0, %v61_v12  ;;  %v812_v12 = vld [vmem:[%s1236_s7] ss:$0 sm:$0xff] }
   0xd   :  { %886 = vmatpush3.bf16.msra.mxu1 %v883_v9  ;;  %861 = vmatprep.mubr.msk.f32.mxu1 %vm66_vm0, %v802_v14  ;;  %v393_v9 = vld [vmem:[%s1235_s1] sm:$0xff] }
   0xe   :  { %888 = vmatprep.subr.bf16.mxu1 %v887_v13  ;;  %v687_v24 = vld [vmem:[%s1237_s13 + $0x20] sm:$0xff] }
  0x11   :  { %890 = vmatpush3.bf16.msra.mxu1 %v887_v13 }
  0x12   :  { %892 = vmatprep.subr.bf16.mxu1 %v891_v18 }
  0x14   :  { %862 = vmatmul.mubr.msk.f32.vlgmr.msra.gmra.mrb[0].mxu1 %vm66_vm0, %v803_v15 }
  0x15   :  { %894 = vmatpush3.bf16.msra.mxu1 %v891_v18  ;;  %v684_v18 = vld [vmem:[%s1237_s13 + $0x8] sm:$0xff] }
  0x16   :  { %896 = vmatprep.subr.bf16.mxu1 %v895_v21  ;;  %v900_v19 = vpack.c.bf16 %v684_v18, %v683_v17 }
  0x18   :  { %901 = vmatpush1.bf16.msra.mxu0 %v900_v19 }
  0x19   :  { %898 = vmatpush3.bf16.msra.mxu1 %v895_v21  ;;  %902 = vmatprep.subr.bf16.mxu0 %v947_v20  ;;  %v685_v21 = vld [vmem:[%s1237_s13 + $0x10] sm:$0xff] }
  0x1a   :  { %815 = vmatprep.subr.msk.mxu1 %vm405_vm1, %v397_v23 }
  0xe7   :  { %v863_v30 = vpop.f32.mrb[0].mxu1 }
  0xe8   :  { %v929_v31 = vadd.f32 %v863_v30, %v801_v27  ;;  %v236_v32 = vpop.f32.mrb[1].mxu1  ;;  %v690_v30 = vld [vmem:[%s1237_s13 + $0x38] sm:$0xff] }
  0xe9   :  { %v930_v33 = vadd.f32 %v801_v27, %v236_v32  ;;  %v906_v27 = vpack.c.bf16 %v688_v26, %v687_v24  ;;  %v691_v32 = vld [vmem:[%s1237_s13 + $0x40] sm:$0xff] }
  0xea   :  { %v250_v34 = vmul.f32 %v929_v31, %v1091_v29 }
  0xeb   :  { %v251_v35 = vsel %vm66_vm0, %v930_v33, 0.0 }
  0xec   :  { %v252_v36 = vsel %vm66_vm0, %v250_v34, 0.0 }
  0xed   :  { %v253_v37 = vadd.f32 %v252_v36, %v251_v35  ;;  %v693_v35 = vld [vmem:[%s1237_s13 + $0x50] sm:$0xff]  ;;  %v694_v36 = vld [vmem:[%s1237_s13 + $0x58] sm:$0xff] }
  0xef   :  { %v254_v38 = vrot.slane %v253_v37, 4 }
  0xf1   :  { %v255_v39 = vadd.f32 %v254_v38, %v253_v37  ;;  %v915_v37 = vpack.c.bf16 %v694_v36, %v693_v35  ;;  %v695_v38 = vld [vmem:[%s1237_s13 + $0x60] sm:$0xff] }
  0xf3   :  { %v256_v40 = vrot.slane %v255_v39, 2 }
  0xf5   :  { %v257_v41 = vadd.f32 %v256_v40, %v255_v39  ;;  %v696_v39 = vld [vmem:[%s1237_s13 + $0x68] sm:$0xff] }
  0xf6   :  { %v918_v40 = vpack.c.bf16 %v696_v39, %v695_v38 }
  0xf7   :  { %v258_v42 = vrot.slane %v257_v41, 1 }
  0xf9   :  { %v259_v43 = vadd.f32 %v258_v42, %v257_v41  ;;  %v697_v41 = vld [vmem:[%s1237_s13 + $0x70] sm:$0xff]  ;;  %v698_v42 = vld [vmem:[%s1237_s13 + $0x78] sm:$0xff] }
  0xfb   :  { %v260_v44 = vmul.f32 0.083333336, %v259_v43  ;;  %v921_v43 = vpack.c.bf16 %v698_v42, %v697_v41 }
  0xfd   :  { %v261_v45 = vsub.f32 %v930_v33, %v260_v44  ;;  %v262_v46 = vsub.f32 %v929_v31, %v260_v44  ;;  %v692_v33 = vld [vmem:[%s1237_s13 + $0x48] sm:$0xff]  ;;  %v699_v44 = vld [vmem:[%s1237_s13 + $0x80] sm:$0xff] }
  0xfe   :  { %v912_v34 = vpack.c.bf16 %v692_v33, %v691_v32 }
  0xff   :  { %v264_v47 = vmul.f32 %v1091_v29, %v262_v46  ;;  %v265_v48 = vmul.f32 %v261_v45, %v261_v45 }
 0x101   :  { %v266_v49 = vmul.f32 %v264_v47, %v264_v47  ;;  %v267_v50 = vsel %vm66_vm0, %v265_v48, 0.0  ;;  %v701_v47 = vld [vmem:[%s1237_s13 + $0x90] sm:$0xff]  ;;  %v702_v48 = vld [vmem:[%s1237_s13 + $0x98] sm:$0xff] }
 0x103   :  { %v268_v51 = vsel %vm66_vm0, %v266_v49, 0.0  ;;  %v927_v49 = vpack.c.bf16 %v702_v48, %v701_v47 }
 0x104   :  { %v269_v52 = vadd.f32 %v268_v51, %v267_v50  ;;  %v1188_v50 = vsub.s32 1, %v1084_v25  ;;  %v571_v51 = vld [vmem:[%s1238_s10] sm:$0x3] }
 0x106   :  { %v270_v53 = vrot.slane %v269_v52, 4 }
 0x108   :  { %v271_v54 = vadd.f32 %v270_v53, %v269_v52  ;;  %v1194_v52 = vsub.s32 0, %v1084_v25 }
 0x10a   :  { %v272_v55 = vrot.slane %v271_v54, 2 }
 0x10c   :  { %v273_v56 = vadd.f32 %v272_v55, %v271_v54  ;;  %v580_v55 = vrot.slane %v571_v51, %v1188_v50 }
 0x10e   :  { %v274_v57 = vrot.slane %v273_v56, 1 }
 0x110   :  { %v275_v58 = vadd.f32 %v274_v57, %v273_v56  ;;  %v576_v56 = vrot.slane %v571_v51, %v1194_v52 }
 0x112   :  { %v276_v59 = vmul.f32 0.083333336, %v275_v58 }
 0x114   :  { %v277_v60 = vadd.f32 1e-05, %v276_v59 }
 0x116   :  { %940 = vrsqrt.f32 %v277_v60 }
 0x120   :  { %v941_v61 = vpop.eup %940 }
 0x121   :  { %v279_v63 = vmul.f32 %v941_v61, %v261_v45  ;;  %v280_v0 = vmul.f32 %v941_v61, %v262_v46  ;;  %v700_v45 = vld [vmem:[%s1237_s13 + $0x88] sm:$0xff] }
 0x122   :  { %v924_v46 = vpack.c.bf16 %v700_v45, %v699_v44 }
 0x123   :  { %v287_v2 = vmul.f32 %v810_v62, %v279_v63  ;;  %v288_v3 = vmul.f32 %v810_v62, %v280_v0 }
 0x125   :  { %v295_v4 = vadd.f32 %v811_v1, %v287_v2  ;;  %v296_v5 = vadd.f32 %v811_v1, %v288_v3 }
 0x127   :  { %v297_v6 = vmax.f32 %v295_v4, 0.0  ;;  %v298_v7 = vmax.f32 %v296_v5, 0.0 }
 0x129   :  { %872 = vmatprep.mubr.msk.f32.mxu1 %vm66_vm0, %v297_v6 }
 0x12a   :  { %873 = vmatmul.mubr.msk.f32.vlgmr.msra.gmra.mrb[2].mxu1 %vm66_vm0, %v298_v7 }
 0x12b   :  { %816 = vmatpush1.msk.msra.mxu1 %vm405_vm1, %v395_v22  ;;  %474 = vmatprep.mubr.f32.mxu1 %v946_v28  ;;  %v686_v22 = vld [vmem:[%s1237_s13 + $0x18] sm:$0xff] }
 0x12c   :  { %494 = vmatprep.subr.mxu1 %v392_v8  ;;  %v903_v23 = vpack.c.bf16 %v686_v22, %v685_v21 }
 0x12e   :  { %817 = vmatmul.mubr.msk.f32.vlgmr.msra.gmra.mrb[4].mxu1 %vm398_vm3, %v393_v9  ;;  %904 = vmatpush1.bf16.msra.mxu0 %v903_v23 }
 0x12f   :  { %495 = vmatpush1.msra.mxu1 %v391_v10  ;;  %480 = vmatprep.mubr.f32.mxu1 %v946_v28 }
 0x130   :  { %905 = vmatprep.subr.bf16.mxu0 %v947_v20 }
 0x132   :  { %818 = vmatmul.mubr.msk.f32.gmra.mrb[6].mxu1 %vm398_vm3, %v394_v11  ;;  %907 = vmatpush1.bf16.msra.mxu0 %v906_v27 }
 0x133   :  { %558 = vmatprep.mubr.f32.mxu1 %v946_v28  ;;  %908 = vmatprep.subr.bf16.mxu0 %v947_v20 }
 0x1fd   :  { %v874_v13 = vpop.f32.mrb[2].mxu1 }
 0x1fe   :  { %v382_v14 = vpop.f32.mrb[3].mxu1  ;;  %v388_v16 = vadd.f32 %v874_v13, %v812_v12 }
 0x1ff   :  { %v383_v15 = vadd.f32 %v812_v12, %v382_v14 }
 0x201   :  { %819 = vmatmul.mubr.msk.f32.vlgmr.msra.gmra.mrb[4].mxu1 %vm487_vm4, %v383_v15 }
 0x202   :  { %564 = vmatprep.mubr.f32.mxu1 %v946_v28  ;;  %v689_v28 = vld [vmem:[%s1237_s13 + $0x30] sm:$0xff] }
 0x203   :  { %v909_v31 = vpack.c.bf16 %v690_v30, %v689_v28 }
 0x205   :  { %820 = vmatmul.mubr.msk.f32.gmra.mrb[6].mxu1 %vm487_vm4, %v388_v16  ;;  %910 = vmatpush1.bf16.msra.mxu0 %v909_v31 }
 0x206   :  { %911 = vmatprep.subr.bf16.mxu0 %v947_v20 }
 0x209   :  { %913 = vmatpush1.bf16.msra.mxu0 %v912_v34 }
 0x20a   :  { %914 = vmatprep.subr.bf16.mxu0 %v947_v20 }
 0x20d   :  { %916 = vmatpush1.bf16.msra.mxu0 %v915_v37 }
 0x20e   :  { %917 = vmatprep.subr.bf16.mxu0 %v947_v20 }
 0x211   :  { %919 = vmatpush1.bf16.msra.mxu0 %v918_v40 }
 0x212   :  { %920 = vmatprep.subr.bf16.mxu0 %v947_v20 }
 0x215   :  { %922 = vmatpush1.bf16.msra.mxu0 %v921_v43 }
 0x216   :  { %923 = vmatprep.subr.bf16.mxu0 %v947_v20 }
 0x219   :  { %925 = vmatpush1.bf16.msra.mxu0 %v924_v46 }
 0x21a   :  { %926 = vmatprep.subr.bf16.mxu0 %v947_v20 }
 0x21d   :  { %928 = vmatpush1.bf16.msra.mxu0 %v927_v49  ;;  %v587_v49 = vld [vmem:[%s1239_s11] sm:$0x3] }
 0x21e   :  { %v653_v51 = vrot.slane %v587_v49, %v1194_v52 }
 0x2d4   :  { %v560_v53 = vpop.f32.mrb[4].mxu1 }
 0x2d5   :  { %v562_v54 = vpop.f32.mrb[5].mxu1  ;;  %v583_v62 = vadd.f32 %v576_v56, %v560_v53 }
 0x2d6   :  { %v584_v60 = vadd.f32 %v580_v55, %v562_v54  ;;  %v588_v54 = vld [vmem:[%s1240_s12] sm:$0x3] }
 0x2d8   :  { %v566_v57 = vpop.f32.mrb[6].mxu1  ;;  %v600_v25 = vsel %vm66_vm0, %v584_v60, 0.0 }
 0x2d9   :  { %v585_v58 = vadd.f32 %v576_v56, %v566_v57  ;;  %v568_v59 = vpop.f32.mrb[7].mxu1  ;;  %v657_v57 = vrot.slane %v587_v49, %v1188_v50 }
 0x2da   :  { %v586_v61 = vadd.f32 %v580_v55, %v568_v59  ;;  %v668_v59 = vrot.slane %v588_v54, %v1194_v52 }
 0x2db   :  { %v591_v63 = vmul.f32 %v1091_v29, %v585_v58 }
 0x2dc   :  { %v592_v0 = vmul.f32 %v1091_v29, %v586_v61 }
 0x2dd   :  { %v593_v1 = vadd.f32 %v591_v63, %v583_v62  ;;  %v672_v63 = vrot.slane %v588_v54, %v1188_v50  ;;  %v821_v50 = vld [vmem:[%s1241_s14] ss:$0 sm:$0xff] }
 0x2de   :  { %v601_v2 = vsel %vm66_vm0, %v592_v0, 0.0 }
 0x2df   :  { %v594_v3 = vrot.slane %v593_v1, 4  ;;  %v602_v4 = vadd.f32 %v601_v2, %v600_v25 }
 0x2e1   :  { %v595_v5 = vadd.f32 %v594_v3, %v593_v1  ;;  %v603_v6 = vrot.slane %v602_v4, 4 }
 0x2e3   :  { %v596_v7 = vrot.slane %v595_v5, 2  ;;  %v604_v8 = vadd.f32 %v603_v6, %v602_v4 }
 0x2e5   :  { %v597_v9 = vadd.f32 %v596_v7, %v595_v5  ;;  %v605_v10 = vrot.slane %v604_v8, 2 }
 0x2e7   :  { %v598_v11 = vrot.slane %v597_v9, 1  ;;  %v606_v12 = vadd.f32 %v605_v10, %v604_v8 }
 0x2e9   :  { %v599_v13 = vadd.f32 %v598_v11, %v597_v9  ;;  %v607_v14 = vrot.slane %v606_v12, 1 }
 0x2eb   :  { %v609_v15 = vmul.f32 0.083333336, %v599_v13  ;;  %v608_v16 = vadd.f32 %v607_v14, %v606_v12 }
 0x2ed   :  { %v611_v17 = vsub.f32 %v583_v62, %v609_v15  ;;  %v613_v18 = vsub.f32 %v585_v58, %v609_v15  ;;  %v610_v19 = vmul.f32 0.083333336, %v608_v16 }
 0x2ef   :  { %v617_v20 = vmul.f32 %v1091_v29, %v613_v18  ;;  %v612_v21 = vsub.f32 %v584_v60, %v610_v19  ;;  %v614_v22 = vsub.f32 %v586_v61, %v610_v19  ;;  %v619_v23 = vmul.f32 %v611_v17, %v611_v17 }
 0x2f1   :  { %v621_v24 = vmul.f32 %v617_v20, %v617_v20  ;;  %v618_v26 = vmul.f32 %v1091_v29, %v614_v22  ;;  %v620_v27 = vmul.f32 %v612_v21, %v612_v21 }
 0x2f3   :  { %v623_v28 = vadd.f32 %v621_v24, %v619_v23  ;;  %v622_v30 = vmul.f32 %v618_v26, %v618_v26  ;;  %v630_v32 = vsel %vm66_vm0, %v620_v27, 0.0 }
 0x2f5   :  { %v624_v31 = vrot.slane %v623_v28, 4  ;;  %v631_v33 = vsel %vm66_vm0, %v622_v30, 0.0 }
 0x2f6   :  { %v632_v34 = vadd.f32 %v631_v33, %v630_v32 }
 0x2f7   :  { %v625_v35 = vadd.f32 %v624_v31, %v623_v28 }
 0x2f8   :  { %v633_v36 = vrot.slane %v632_v34, 4 }
 0x2f9   :  { %v626_v37 = vrot.slane %v625_v35, 2 }
 0x2fa   :  { %v634_v38 = vadd.f32 %v633_v36, %v632_v34 }
 0x2fb   :  { %v627_v39 = vadd.f32 %v626_v37, %v625_v35 }
 0x2fc   :  { %v635_v40 = vrot.slane %v634_v38, 2 }
 0x2fd   :  { %v628_v41 = vrot.slane %v627_v39, 1 }
 0x2fe   :  { %v636_v42 = vadd.f32 %v635_v40, %v634_v38 }
 0x2ff   :  { %v629_v43 = vadd.f32 %v628_v41, %v627_v39 }
 0x300   :  { %v637_v44 = vrot.slane %v636_v42, 1 }
 0x301   :  { %v639_v29 = vmul.f32 0.083333336, %v629_v43 }
 0x302   :  { %v638_v45 = vadd.f32 %v637_v44, %v636_v42 }
 0x303   :  { %v641_v46 = vadd.f32 1e-05, %v639_v29 }
 0x304   :  { %v640_v47 = vmul.f32 0.083333336, %v638_v45 }
 0x305   :  { %942 = vrsqrt.f32 %v641_v46 }
 0x306   :  { %v642_v48 = vadd.f32 1e-05, %v640_v47 }
 0x308   :  { %944 = vrsqrt.f32 %v642_v48 }
 0x30f   :  { %v943_v53 = vpop.eup %942 }
 0x310   :  { %v647_v55 = vmul.f32 %v943_v53, %v613_v18  ;;  %v645_v56 = vmul.f32 %v943_v53, %v611_v17 }
 0x312   :  { %v945_v58 = vpop.eup %944  ;;  %v660_v60 = vmul.f32 %v653_v51, %v645_v56  ;;  %v662_v2 = vmul.f32 %v653_v51, %v647_v55 }
 0x313   :  { %v648_v61 = vmul.f32 %v945_v58, %v614_v22  ;;  %v646_v62 = vmul.f32 %v945_v58, %v612_v21 }
 0x314   :  { %v675_v25 = vadd.f32 %v668_v59, %v660_v60  ;;  %v677_v7 = vadd.f32 %v668_v59, %v662_v2 }
 0x315   :  { %v661_v0 = vmul.f32 %v657_v57, %v646_v62  ;;  %v663_v1 = vmul.f32 %v657_v57, %v648_v61 }
 0x316   :  { %v679_v6 = vmax.f32 %v675_v25, 0.0  ;;  %v681_v52 = vmax.f32 %v677_v7, 0.0 }
 0x317   :  { %v676_v3 = vadd.f32 %v672_v63, %v661_v0  ;;  %v678_v4 = vadd.f32 %v672_v63, %v663_v1 }
 0x319   :  { %v680_v5 = vmax.f32 %v676_v3, 0.0  ;;  %v682_v8 = vmax.f32 %v678_v4, 0.0 }
 0x31b   :  { %822 = vmatprep.mubr.msk.f32.mxu0 %vm66_vm0, %v680_v5 }
 0x31c   :  { %781 = vmatmul.mubr.f32.vlgmr.msra.gmra.mrb[0].mxu0 %v679_v6 }
 0x31d   :  { %823 = vmatprep.mubr.msk.f32.mxu0 %vm66_vm0, %v682_v8 }
 0x320   :  { %786 = vmatmul.mubr.f32.gmra.mrb[2].mxu0 %v681_v52 }
 0x3ef   :  { %v782_v9 = vpop.f32.mrb[0].mxu0 }
 0x3f0   :  { %v783_v10 = vadd.f32 %v821_v50, %v782_v9  ;;  %v784_v11 = vpop.f32.mrb[1].mxu0 }
 0x3f2   :  { %792 = vst.msk [vmem:[%s1242_s15] sm:$0xff] %vm791_vm5, %v783_v10 }
 0x3f3   :  { %v787_v12 = vpop.f32.mrb[2].mxu0 }
 0x3f4   :  { %v788_v13 = vadd.f32 %v821_v50, %v787_v12  ;;  %v789_v14 = vpop.f32.mrb[3].mxu0 }
 0x3f6   :  { %793 = vst.msk [vmem:[%s1242_s15 + $0x8] sm:$0xff] %vm791_vm5, %v788_v13 }

// kernel: decoder_forward.3
= control target key start
LH: loop header
LB: loop body
LE: loop exit
PB: predicated region body
PF: predicated region fallthrough
CT: control target
= control target key end

     0   :  { %s7494_s0 = inlined_call_operand.vmem [shape: f32[16,2], index: 0, kind: input, shape index: {}]   ;;  %s7495_s1 = inlined_call_operand.vmem [shape: f32[16,2], index: 1, kind: input, shape index: {}]   ;;  %s7496_s2 = inlined_call_operand.vmem [shape: f32[2,16], index: 2, kind: input, shape index: {}, may-alias: {2,3}]   ;;  %s7497_s3 = inlined_call_operand.vmem [shape: f32[2,16], index: 3, kind: input, shape index: {}, may-alias: {2,3}]   ;;  %s7498_s4 = inlined_call_operand.vmem [shape: f32[24,1], index: 4, kind: input, shape index: {}]   ;;  %s7499_s5 = inlined_call_operand.vmem [shape: s32[24,1], index: 5, kind: input, shape index: {}]   ;;  %s7500_s6 = inlined_call_operand.vmem [shape: s32[24,1], index: 6, kind: input, shape index: {}]   ;;  %s7501_s7 = inlined_call_operand.vmem [shape: s32[1,24], index: 7, kind: input, shape index: {}]   ;;  %s7502_s8 = inlined_call_operand.vmem [shape: s32[1,24], index: 8, kind: input, shape index: {}]   ;;  %s7503_s9 = inlined_call_operand.vmem [shape: f32[4,32,32], index: 9, kind: input, shape index: {}]   ;;  %s7504_s10 = inlined_call_operand.vmem [shape: f32[4,1,32], index: 10, kind: input, shape index: {}]   ;;  %s7505_s11 = inlined_call_operand.vmem [shape: f32[4,1,32], index: 11, kind: input, shape index: {}]   ;;  %s7506_s12 = inlined_call_operand.vmem [shape: f32[4,32,32], index: 12, kind: input, shape index: {}]   ;;  %s7507_s13 = inlined_call_operand.hbm [shape: f32[4,32,32], index: 13, kind: input, shape index: {}]   ;;  %s7508_s14 = inlined_call_operand.vmem [shape: f32[4,1,32], index: 14, kind: input, shape index: {}]   ;;  %s7509_s15 = inlined_call_operand.hbm [shape: f32[4,32,32], index: 15, kind: input, shape index: {}]   ;;  %s7510_s16 = inlined_call_operand.hbm [shape: f32[4,32,32], index: 16, kind: input, shape index: {}]   ;;  %s7511_s17 = inlined_call_operand.vmem [shape: f32[4,1,32], index: 17, kind: input, shape index: {}]   ;;  %s7512_s18 = inlined_call_operand.hbm [shape: f32[4,32,32], index: 18, kind: input, shape index: {}]   ;;  %s7513_s19 = inlined_call_operand.vmem [shape: f32[4,1,32], index: 19, kind: input, shape index: {}]   ;;  %s7514_s20 = inlined_call_operand.vmem [shape: f32[4,1,32], index: 20, kind: input, shape index: {}]   ;;  %s7515_s21 = inlined_call_operand.vmem [shape: f32[4,1,32], index: 21, kind: input, shape index: {}]   ;;  %s7516_s22 = inlined_call_operand.vmem [shape: f32[2,16,32], index: 22, kind: output, shape index: {0}]   ;;  %s7517_s23 = inlined_call_operand.vmem [shape: f32[2,16,32], index: 23, kind: output, shape index: {1}]  }
   0x1   :  { %7523 = sst [smem:[#allocation12_spill]] %s7494_s0 }
   0x2   :  { %7524 = sst [smem:[#allocation13_spill]] %s7495_s1 }
   0x3   :  { %7525 = sst [smem:[#allocation14_spill]] %s7496_s2 }
   0x4   :  { %7526 = sst [smem:[#allocation15_spill]] %s7497_s3 }
   0x5   :  { %7527 = sst [smem:[#allocation16_spill]] %s7498_s4 }
   0x6   :  { %7528 = sst [smem:[#allocation17_spill]] %s7499_s5 }
   0x7   :  { %7529 = sst [smem:[#allocation18_spill]] %s7500_s6 }
   0x8   :  { %7530 = sst [smem:[#allocation19_spill]] %s7501_s7 }
   0x9   :  { %29 = vsyncpa [#allocation3], 0 }
   0xa   :  { %30 = vsyncpa [#allocation5], 0 }
   0xb   :  { %31 = vsyncpa [#allocation8], 0  ;;  %s6311_s4 = smov [#allocation4]   ;;  %s6312_s24 = smov [#allocation2]  }
   0xc   :  { %s77_s30 = sshll.u32 %s6311_s4, 4  ;;  %s63_s25 = sshll.u32 %s6312_s24, 4  ;;  %s78_s30 = int_to_ptr.vmem [resolvable:$true] %s77_s30  ;;  %s6448_s25 = int_to_ptr.vmem [resolvable:$true] %s63_s25 }
   0xd   :  { %s6217_s26 = scalar_lea.hbm %s7509_s15, 2048 }
   0xe   :  { %p6218_p0 = scmp.ne.s32.totalorder %s7509_s15, %s6217_s26  ;;  %p6221_p1 = scmp.lt.u32.totalorder %s6217_s26, %s7509_s15 }
  0x10   :  { %p6223_p2 = pnand %p6221_p1, %p6218_p0 }
  0x12   :  { %6226 = shalt.err (!%p6223_p2)
}
  0x13   :  { %s6227_s28 = scalar_lea.vmem %s78_s30, 2048  ;;  %p6232_p4 = scmp.lt.s32.totalorder %s78_s30, %s78_s30 }
  0x14   :  { %p6228_p3 = scmp.ne.s32.totalorder %s78_s30, %s6227_s28  ;;  %p6233_p5 = scmp.lt.s32.totalorder %s6227_s28, %s6227_s28 }
  0x16   :  { %p6234_p6 = por %p6233_p5, %p6232_p4 }
  0x18   :  { %p6235_p7 = pnand %p6234_p6, %p6228_p3 }
  0x1a   :  { %6238 = shalt.err (!%p6235_p7)
}
  0x1b   :  { %s6313_s29 = smov 128   ;;  %s6314_s3 = smov 8  }
  0x1c   :  { %83 = dma.hbm_to_vmem [thread:$0]  %s7509_s15, 2048, %s78_s30, [#allocation5], %s6313_s29, %s6313_s29, %s6314_s3  }
  0x1d   :  { %s6239_s1 = scalar_lea.hbm %s7507_s13, 2048 }
  0x1e   :  { %p6240_p8 = scmp.ne.s32.totalorder %s7507_s13, %s6239_s1  ;;  %p6243_p9 = scmp.lt.u32.totalorder %s6239_s1, %s7507_s13 }
  0x20   :  { %p6245_p10 = pnand %p6243_p9, %p6240_p8 }
  0x22   :  { %6248 = shalt.err (!%p6245_p10)
}
  0x23   :  { %s6249_s7 = scalar_lea.vmem %s6448_s25, 2048  ;;  %p6254_p12 = scmp.lt.s32.totalorder %s6448_s25, %s6448_s25 }
  0x24   :  { %p6250_p11 = scmp.ne.s32.totalorder %s6448_s25, %s6249_s7  ;;  %p6255_p13 = scmp.lt.s32.totalorder %s6249_s7, %s6249_s7 }
  0x26   :  { %p6256_p0 = por %p6255_p13, %p6254_p12 }
  0x28   :  { %p6257_p1 = pnand %p6256_p0, %p6250_p11 }
  0x2a   :  { %6260 = shalt.err (!%p6257_p1)
}
  0x2b   :  { %69 = dma.hbm_to_vmem [thread:$0]  %s7507_s13, 2048, %s6448_s25, [#allocation3], %s6313_s29, %s6313_s29, %s6314_s3  }
  0x2c   :  { %s6315_s28 = smov [#allocation6]   ;;  %s6316_s4 = smov [#allocation7]  }
  0x2d   :  { %s89_s0 = sshll.u32 %s6315_s28, 4  ;;  %s103_s24 = sshll.u32 %s6316_s4, 4  ;;  %s90_s0 = int_to_ptr.vmem [resolvable:$true] %s89_s0  ;;  %s6485_s24 = int_to_ptr.vmem [resolvable:$true] %s103_s24 }
  0x2e   :  { %s6261_s26 = scalar_lea.hbm %s7510_s16, 2048 }
  0x2f   :  { %p6262_p2 = scmp.ne.s32.totalorder %s7510_s16, %s6261_s26  ;;  %p6265_p3 = scmp.lt.u32.totalorder %s6261_s26, %s7510_s16 }
  0x31   :  { %p6267_p4 = pnand %p6265_p3, %p6262_p2 }
  0x33   :  { %6270 = shalt.err (!%p6267_p4)
}
  0x34   :  { %s6271_s13 = scalar_lea.vmem %s90_s0, 2048  ;;  %p6276_p6 = scmp.lt.s32.totalorder %s90_s0, %s90_s0 }
  0x35   :  { %p6272_p5 = scmp.ne.s32.totalorder %s90_s0, %s6271_s13  ;;  %p6277_p7 = scmp.lt.s32.totalorder %s6271_s13, %s6271_s13 }
  0x37   :  { %p6278_p8 = por %p6277_p7, %p6276_p6 }
  0x39   :  { %p6279_p9 = pnand %p6278_p8, %p6272_p5 }
  0x3b   :  { %6282 = shalt.err (!%p6279_p9)
}
  0x3c   :  { %95 = dma.hbm_to_vmem [thread:$0]  %s7510_s16, 2048, %s90_s0, [#allocation5], %s6313_s29, %s6313_s29, %s6314_s3  }
  0x3d   :  { %s6283_s4 = scalar_lea.hbm %s7512_s18, 2048 }
  0x3e   :  { %p6284_p10 = scmp.ne.s32.totalorder %s7512_s18, %s6283_s4  ;;  %p6287_p11 = scmp.lt.u32.totalorder %s6283_s4, %s7512_s18 }
  0x40   :  { %p6289_p12 = pnand %p6287_p11, %p6284_p10 }
  0x42   :  { %6292 = shalt.err (!%p6289_p12)
}
  0x43   :  { %s6293_s6 = scalar_lea.vmem %s6485_s24, 2048  ;;  %p6298_p0 = scmp.lt.s32.totalorder %s6485_s24, %s6485_s24 }
  0x44   :  { %p6294_p13 = scmp.ne.s32.totalorder %s6485_s24, %s6293_s6  ;;  %p6299_p1 = scmp.lt.s32.totalorder %s6293_s6, %s6293_s6 }
  0x46   :  { %p6300_p2 = por %p6299_p1, %p6298_p0 }
  0x48   :  { %p6301_p3 = pnand %p6300_p2, %p6294_p13 }
  0x4a   :  { %6304 = shalt.err (!%p6301_p3)
}
  0x4b   :  { %109 = dma.hbm_to_vmem [thread:$0]  %s7512_s18, 2048, %s6485_s24, [#allocation8], %s6313_s29, %s6313_s29, %s6314_s3  }
  0x4c   :  { %6305 = dma.done.wait [#allocation3], 2048  }
  0x4d   :  { %6306 = vsyncadd [#allocation3], 4294965248 }
  0x4e   :  { %6307 = dma.done.wait [#allocation5], 4096  }
  0x4f   :  { %6308 = vsyncadd [#allocation5], 4294963200 }
  0x50   :  { %6309 = dma.done.wait [#allocation8], 2048  }
  0x51   :  { %6310 = vsyncadd [#allocation8], 4294965248  ;;  %vm138_vm0 = vcmask 1041408   ;;  %vm131_vm1 = vcmask 15360   ;;  %s7531_s13 = sld [smem:[#allocation14_spill]]  ;;  %s7532_s30 = sld [smem:[#allocation15_spill]]  ;;  %v217_v6 = vlaneseq }
  0x52   :  { %s7533_s5 = sld [smem:[#allocation12_spill]]  ;;  %s7534_s3 = sld [smem:[#allocation13_spill]]  ;;  %v6317_v20 = vmov 1.0|1.0   ;;  %v6318_v42 = vmov 683565275  }
  0x53   :  { %v6540_v7 = vshrl.u32 %v217_v6, 7  ;;  %v6542_v8 = vand.u32 127, %v217_v6  ;;  %v6319_v44 = vmov 2475754826   ;;  %v6320_v46 = vmov 2131351028  }
  0x54   :  { %v6321_v48 = vmov 2102212464   ;;  %v6322_v50 = vmov 920167782   ;;  %v6323_v59 = vmov 1326507024  }
  0x55   :  { %v6545_v9 = vadd.s32 8, %v6540_v7  ;;  %v228_v10 = vadd.s32 16, %v6540_v7  ;;  %s7541_s2 = sld [smem:[#allocation17_spill]]  ;;  %s7542_s7 = sld [smem:[#allocation18_spill]] }
  0x56   :  { %s7543_s29 = sld [smem:[#allocation16_spill]]  ;;  %s7544_s18 = sld [smem:[#allocation19_spill]] }
  0x57   :  { %v130_v0 = vld [vmem:[%s7531_s13] sm:$0x3]  ;;  %v229_v11 = vadd.s32 16, %v6545_v9  ;;  %vm230_vm2 = vcmp.eq.s32.totalorder %v6542_v8, %v228_v10 }
  0x58   :  { %v815_v1 = vld [vmem:[%s7532_s30] sm:$0x3]  ;;  %5432 = vmatprep.subr.msk.mxu1 %vm138_vm0, %v130_v0  ;;  %v129_v4 = vld [vmem:[%s7533_s5 + $0x8] sm:$0xff] }
  0x59   :  { %v128_v2 = vld [vmem:[%s7533_s5] sm:$0xff]  ;;  %5451 = vmatprep.subr.msk.mxu0 %vm138_vm0, %v815_v1  ;;  %v814_v5 = vld [vmem:[%s7534_s3 + $0x8] sm:$0xff]  ;;  %5433 = vmatpush3.msk.msra.mxu1 %vm138_vm0, %v130_v0  ;;  %vm231_vm3 = vcmp.eq.s32.totalorder %v6542_v8, %v229_v11 }
  0x5a   :  { %v813_v3 = vld [vmem:[%s7534_s3] sm:$0xff]  ;;  %5434 = vmatprep.mubr.msk.f32.mxu1 %vm131_vm1, %v128_v2  ;;  %5452 = vmatpush3.msk.msra.mxu0 %vm138_vm0, %v815_v1  ;;  %vm5898_vm4 = vmpackc.low %vm231_vm3, %vm230_vm2 }
  0x5b   :  { %5453 = vmatprep.mubr.msk.f32.mxu0 %vm131_vm1, %v813_v3  ;;  %5435 = vmatmul.mubr.msk.f32.vlgmr.msra.gmra.mrb[0].mxu1 %vm131_vm1, %v129_v4 }
  0x5c   :  { %5454 = vmatmul.mubr.msk.f32.vlgmr.msra.gmra.mrb[0].mxu0 %vm131_vm1, %v814_v5  ;;  %5899 = vmatprep.subr.msk.bf16.mxu1 %vm5898_vm4, %v6317_v20 }
  0x5d   :  { %5907 = vmatprep.subr.msk.bf16.mxu0 %vm5898_vm4, %v6317_v20  ;;  %5901 = vmatpush3.bf16.msk.msra.mxu1 %vm5898_vm4, %v6317_v20 }
  0x5e   :  { %5909 = vmatpush3.bf16.msk.msra.mxu0 %vm5898_vm4, %v6317_v20 }
 0x12e   :  { %v6550_v12 = vpop.f32.mrb[0].mxu1 }
 0x12f   :  { %v6552_v13 = vpop.f32.mrb[0].mxu0  ;;  %v340_v14 = vand.u32 2147483647, %v6550_v12  ;;  %v343_v15 = vand.u32 2139095040, %v6550_v12  ;;  %v6559_v18 = vpop.f32.mrb[1].mxu1 }
 0x130   :  { %v1004_v16 = vand.u32 2147483647, %v6552_v13  ;;  %v1007_v17 = vand.u32 2139095040, %v6552_v13  ;;  %v6561_v19 = vpop.f32.mrb[1].mxu0  ;;  %v239_v25 = vand.u32 2139095040, %v6559_v18 }
 0x131   :  { %v344_v21 = vshrl.u32 %v343_v15, 23  ;;  %v347_v22 = vand.u32 8388607, %v340_v14 }
 0x132   :  { %v1008_v23 = vshrl.u32 %v1007_v17, 23  ;;  %v1011_v24 = vand.u32 8388607, %v1004_v16  ;;  %v240_v28 = vshrl.u32 %v239_v25, 23 }
 0x133   :  { %v4982_v26 = vadd.s32 4294967169, %v344_v21  ;;  %v348_v30 = vor.u32 8388608, %v347_v22 }
 0x134   :  { %v5009_v27 = vadd.s32 4294967169, %v1008_v23  ;;  %v1012_v31 = vor.u32 8388608, %v1011_v24  ;;  %v4978_v34 = vadd.s32 4294967169, %v240_v28 }
 0x135   :  { %v350_v29 = vadd.s32 1, %v4982_v26  ;;  %v6572_v38 = vshll.u32 %v348_v30, 8 }
 0x136   :  { %v1014_v32 = vadd.s32 1, %v5009_v27  ;;  %v6576_v40 = vshll.u32 %v1012_v31, 8  ;;  %v6585_v53 = vadd.s32 1, %v4978_v34 }
 0x137   :  { %vm351_vm5 = vcmp.gt.s32.totalorder %v350_v29, 0 }
 0x138   :  { %v352_v33 = vsel %vm351_vm5, %v350_v29, 0  ;;  %vm1015_vm6 = vcmp.gt.s32.totalorder %v1014_v32, 0  ;;  %vm247_vm11 = vcmp.gt.s32.totalorder %v6585_v53, 0 }
 0x139   :  { %v354_v35 = vand.u32 31, %v352_v33  ;;  %v1016_v36 = vsel %vm1015_vm6, %v1014_v32, 0  ;;  %v353_v37 = vshrl.u32 %v352_v33, 5 }
 0x13a   :  { %v6574_v39 = vand.u32 31, %v1016_v36  ;;  %v6583_v52 = vshrl.u32 %v1016_v36, 5 }
 0x13b   :  { %v355_v41 = vsub.s32 32, %v354_v35  ;;  %v357_v43 = vshll.u32 %v6318_v42, %v354_v35  ;;  %v360_v45 = vshll.u32 %v6319_v44, %v354_v35  ;;  %v363_v47 = vshll.u32 %v6320_v46, %v354_v35 }
 0x13c   :  { %v366_v49 = vshll.u32 %v6321_v48, %v354_v35  ;;  %v369_v51 = vshll.u32 %v6322_v50, %v354_v35  ;;  %vm372_vm7 = vcmp.lt.s32.totalorder %v353_v37, 1  ;;  %vm373_vm8 = vcmp.lt.s32.totalorder %v353_v37, 2 }
 0x13d   :  { %v356_v54 = vshrl.u32 %v6318_v42, %v355_v41  ;;  %v358_v55 = vshrl.u32 %v6319_v44, %v355_v41  ;;  %v361_v56 = vshrl.u32 %v6320_v46, %v355_v41  ;;  %v364_v57 = vshrl.u32 %v6321_v48, %v355_v41 }
 0x13e   :  { %v367_v58 = vshrl.u32 %v6322_v50, %v355_v41  ;;  %v370_v60 = vshrl.u32 %v6323_v59, %v355_v41  ;;  %v1019_v0 = vsub.s32 32, %v6574_v39  ;;  %vm374_vm9 = vcmp.lt.s32.totalorder %v353_v37, 3 }
 0x13f   :  { %v359_v61 = vor.u32 %v358_v55, %v357_v43  ;;  %v362_v62 = vor.u32 %v361_v56, %v360_v45  ;;  %v365_v63 = vor.u32 %v364_v57, %v363_v47  ;;  %vm375_vm10 = vcmp.lt.s32.totalorder %v353_v37, 4 }
 0x140   :  { %v368_v1 = vor.u32 %v367_v58, %v366_v49  ;;  %v371_v2 = vor.u32 %v370_v60, %v369_v51  ;;  %v1021_v17 = vshll.u32 %v6318_v42, %v6574_v39  ;;  %v1022_v23 = vshrl.u32 %v6319_v44, %v1019_v0 }
 0x141   :  { %v376_v3 = vsel %vm372_vm7, %v356_v54, %v359_v61  ;;  %v377_v4 = vsel %vm375_vm10, %v365_v63, 2102212464  ;;  %v380_v5 = vsel %vm372_vm7, %v359_v61, %v362_v62  ;;  %v384_v6 = vsel %vm372_vm7, %v362_v62, %v365_v63 }
 0x142   :  { %v378_v10 = vsel %vm374_vm9, %v362_v62, %v377_v4  ;;  %v381_v11 = vsel %vm375_vm10, %v368_v1, 920167782  ;;  %v385_v15 = vsel %vm375_vm10, %v371_v2, 1326507024  ;;  %v1024_v24 = vshll.u32 %v6319_v44, %v6574_v39 }
 0x143   :  { %v382_v21 = vsel %vm374_vm9, %v365_v63, %v381_v11  ;;  %v386_v22 = vsel %vm374_vm9, %v368_v1, %v385_v15  ;;  %v379_v25 = vsel %vm373_vm8, %v376_v3, %v378_v10  ;;  %v1025_v28 = vshrl.u32 %v6320_v46, %v1019_v0 }
 0x144   :  { %v383_v26 = vsel %vm373_vm8, %v380_v5, %v382_v21  ;;  %v387_v27 = vsel %vm373_vm8, %v384_v6, %v386_v22  ;;  %v1023_v33 = vor.u32 %v1022_v23, %v1021_v17  ;;  %v1027_v35 = vshll.u32 %v6320_v46, %v6574_v39 }
 0x145   :  { %v6605_v29 = vmul.u32.u64.low %v6572_v38, %v387_v27  ;;  %v6606_v30 = vmul.u32.u64.high %v6572_v38, %v387_v27, %v6605_v29  ;;  %v6609_v31 = vmul.u32.u64.low %v6572_v38, %v383_v26  ;;  %v6610_v32 = vmul.u32.u64.high %v6572_v38, %v383_v26, %v6609_v31 }
 0x146   :  { %v1026_v34 = vor.u32 %v1025_v28, %v1024_v24  ;;  %v1028_v36 = vshrl.u32 %v6321_v48, %v1019_v0  ;;  %v1020_v37 = vshrl.u32 %v6318_v42, %v1019_v0  ;;  %v1030_v41 = vshll.u32 %v6321_v48, %v6574_v39 }
 0x147   :  { %v1031_v43 = vshrl.u32 %v6322_v50, %v1019_v0  ;;  %v1034_v45 = vshrl.u32 %v6323_v59, %v1019_v0  ;;  %v395_v47 = vmul.u32 %v6572_v38, %v379_v25  ;;  %v1033_v51 = vshll.u32 %v6322_v50, %v6574_v39 }
 0x148   :  { %v1029_v49 = vor.u32 %v1028_v36, %v1027_v35  ;;  %vm1036_vm12 = vcmp.lt.s32.totalorder %v6583_v52, 1  ;;  %vm397_vm13 = vc.u32 %v6606_v30, %v6609_v31  ;;  %v398_v54 = vadd.s32 1, %v6610_v32 }
 0x149   :  { %v1032_v55 = vor.u32 %v1031_v43, %v1030_v41  ;;  %vm1037_vm14 = vcmp.lt.s32.totalorder %v6583_v52, 2  ;;  %v1035_v56 = vor.u32 %v1034_v45, %v1033_v51  ;;  %vm1038_vm15 = vcmp.lt.s32.totalorder %v6583_v52, 3 }
 0x14a   :  { %vm1039_vm0 = vcmp.lt.s32.totalorder %v6583_v52, 4  ;;  %v1044_v38 = vsel %vm1036_vm12, %v1023_v33, %v1026_v34  ;;  %v399_v57 = vsel %vm397_vm13, %v398_v54, %v6610_v32  ;;  %v1048_v60 = vsel %vm1036_vm12, %v1026_v34, %v1029_v49 }
 0x14b   :  { %v1041_v58 = vsel %vm1039_vm0, %v1029_v49, 2102212464  ;;  %v1045_v39 = vsel %vm1039_vm0, %v1032_v55, 920167782  ;;  %v400_v61 = vadd.s32 %v399_v57, %v395_v47  ;;  %v1040_v62 = vsel %vm1036_vm12, %v1020_v37, %v1023_v33 }
 0x14c   :  { %v1046_v63 = vsel %vm1038_vm15, %v1029_v49, %v1045_v39  ;;  %v1049_v0 = vsel %vm1039_vm0, %v1035_v56, 1326507024  ;;  %v1042_v1 = vsel %vm1038_vm15, %v1026_v34, %v1041_v58  ;;  %v248_v4 = vsel %vm247_vm11, %v6585_v53, 0 }
 0x14d   :  { %v1047_v2 = vsel %vm1037_vm14, %v1044_v38, %v1046_v63  ;;  %v1050_v3 = vsel %vm1038_vm15, %v1032_v55, %v1049_v0  ;;  %v401_v5 = vadd.s32 536870912, %v400_v61  ;;  %v1043_v22 = vsel %vm1037_vm14, %v1040_v62, %v1042_v1 }
 0x14e   :  { %v1051_v6 = vsel %vm1037_vm14, %v1048_v60, %v1050_v3  ;;  %v6640_v10 = vmul.u32.u64.low %v6576_v40, %v1047_v2  ;;  %v6641_v11 = vmul.u32.u64.high %v6576_v40, %v1047_v2, %v6640_v10  ;;  %v236_v53 = vand.u32 2147483647, %v6559_v18 }
 0x14f   :  { %v6645_v15 = vmul.u32.u64.low %v6576_v40, %v1051_v6  ;;  %v6646_v17 = vmul.u32.u64.high %v6576_v40, %v1051_v6, %v6645_v15  ;;  %v6648_v21 = vshrl.u32 %v401_v5, 30  ;;  %v250_v23 = vand.u32 31, %v248_v4 }
 0x150   :  { %v1062_v25 = vadd.s32 1, %v6641_v11  ;;  %v903_v27 = vand.u32 2139095040, %v6561_v19  ;;  %v1059_v28 = vmul.u32 %v6576_v40, %v1043_v22  ;;  %v243_v32 = vand.u32 8388607, %v236_v53 }
 0x151   :  { %v403_v24 = vshll.u32 %v6648_v21, 30  ;;  %v251_v26 = vsub.s32 32, %v250_v23  ;;  %vm1061_vm1 = vc.u32 %v6646_v17, %v6640_v10  ;;  %v253_v34 = vshll.u32 %v6318_v42, %v250_v23 }
 0x152   :  { %v1063_v52 = vsel %vm1061_vm1, %v1062_v25, %v6641_v11  ;;  %v249_v40 = vshrl.u32 %v248_v4, 5  ;;  %v256_v41 = vshll.u32 %v6319_v44, %v250_v23  ;;  %v904_v43 = vshrl.u32 %v903_v27, 23 }
 0x153   :  { %v6659_v29 = vsub.s32 %v400_v61, %v403_v24  ;;  %v1064_v33 = vadd.s32 %v1063_v52, %v1059_v28  ;;  %v254_v35 = vshrl.u32 %v6319_v44, %v251_v26  ;;  %v257_v36 = vshrl.u32 %v6320_v46, %v251_v26 }
 0x154   :  { %v259_v49 = vshll.u32 %v6320_v46, %v250_v23  ;;  %v260_v51 = vshrl.u32 %v6321_v48, %v251_v26  ;;  %v262_v56 = vshll.u32 %v6321_v48, %v250_v23  ;;  %v263_v38 = vshrl.u32 %v6322_v50, %v251_v26 }
 0x155   :  { %v406_v37 = vsub.s32 0, %v6659_v29  ;;  %v1065_v45 = vadd.s32 536870912, %v1064_v33  ;;  %v255_v47 = vor.u32 %v254_v35, %v253_v34  ;;  %v258_v55 = vor.u32 %v257_v36, %v256_v41 }
 0x156   :  { %v261_v58 = vor.u32 %v260_v51, %v259_v49  ;;  %v265_v39 = vshll.u32 %v6322_v50, %v250_v23  ;;  %v266_v60 = vshrl.u32 %v6323_v59, %v251_v26  ;;  %v264_v62 = vor.u32 %v263_v38, %v262_v56 }
 0x157   :  { %v4983_v54 = vmin.u32 %v406_v37, %v6659_v29  ;;  %v6674_v57 = vshrl.u32 %v1065_v45, 30  ;;  %v244_v0 = vor.u32 8388608, %v243_v32  ;;  %vm271_vm2 = vcmp.lt.s32.totalorder %v249_v40, 4 }
 0x158   :  { %v267_v1 = vor.u32 %v266_v60, %v265_v39  ;;  %vm268_vm3 = vcmp.lt.s32.totalorder %v249_v40, 1  ;;  %vm270_vm4 = vcmp.lt.s32.totalorder %v249_v40, 3  ;;  %v277_v3 = vsel %vm271_vm2, %v264_v62, 920167782 }
 0x159   :  { %v408_v61 = vclz %v4983_v54  ;;  %v1067_v63 = vshll.u32 %v6674_v57, 30  ;;  %v276_v5 = vsel %vm268_vm3, %v255_v47, %v258_v55  ;;  %v278_v6 = vsel %vm270_vm4, %v261_v58, %v277_v3 }
 0x15a   :  { %v5005_v11 = vadd.s32 4294967169, %v904_v43  ;;  %vm269_vm6 = vcmp.lt.s32.totalorder %v249_v40, 2  ;;  %v280_v15 = vsel %vm268_vm3, %v258_v55, %v261_v58  ;;  %v281_v22 = vsel %vm271_vm2, %v267_v1, 1326507024 }
 0x15b   :  { %v4984_v2 = vadd.s32 4294967294, %v408_v61  ;;  %v6680_v4 = vsub.s32 %v1064_v33, %v1067_v63  ;;  %v252_v25 = vshrl.u32 %v6318_v42, %v251_v26  ;;  %v273_v27 = vsel %vm271_vm2, %v261_v58, 2102212464 }
 0x15c   :  { %v279_v52 = vsel %vm269_vm6, %v276_v5, %v278_v6  ;;  %v282_v32 = vsel %vm270_vm4, %v264_v62, %v281_v22  ;;  %v284_v33 = vshll.u32 %v244_v0, 8  ;;  %v274_v41 = vsel %vm270_vm4, %v258_v55, %v273_v27 }
 0x15d   :  { %vm4985_vm5 = vcmp.lt.s32.totalorder %v4984_v2, 0  ;;  %v1070_v24 = vsub.s32 0, %v6680_v4  ;;  %v272_v35 = vsel %vm268_vm3, %v252_v25, %v255_v47  ;;  %v283_v36 = vsel %vm269_vm6, %v280_v15, %v282_v32 }
 0x15e   :  { %v411_v23 = vsel %vm4985_vm5, 0, %v4984_v2  ;;  %v6695_v43 = vmul.u32.u64.low %v284_v33, %v283_v36  ;;  %v6696_v45 = vmul.u32.u64.high %v284_v33, %v283_v36, %v6695_v43  ;;  %v910_v54 = vadd.s32 1, %v5005_v11 }
 0x15f   :  { %v416_v28 = vsub.s32 4294967266, %v411_v23  ;;  %v5010_v34 = vmin.u32 %v1070_v24, %v6680_v4  ;;  %v412_v37 = vsub.s32 32, %v411_v23  ;;  %v396_v56 = vadd.s32 %v6609_v31, %v6606_v30 }
 0x160   :  { %v6698_v49 = vmul.u32.u64.low %v284_v33, %v279_v52  ;;  %v6699_v51 = vmul.u32.u64.high %v284_v33, %v279_v52, %v6698_v49  ;;  %v275_v47 = vsel %vm269_vm6, %v272_v35, %v274_v41  ;;  %vm911_vm7 = vcmp.gt.s32.totalorder %v910_v54, 0 }
 0x161   :  { %v417_v26 = vadd.s32 127, %v416_v28  ;;  %v1072_v38 = vclz %v5010_v34  ;;  %v900_v55 = vand.u32 2147483647, %v6561_v19  ;;  %v414_v58 = vshrl.u32 %v396_v56, %v412_v37 }
 0x162   :  { %vm293_vm8 = vc.u32 %v6696_v45, %v6698_v49  ;;  %v294_v60 = vadd.s32 1, %v6699_v51  ;;  %v912_v61 = vsel %vm911_vm7, %v910_v54, 0  ;;  %v291_v62 = vmul.u32 %v284_v33, %v275_v47 }
 0x163   :  { %v418_v39 = vshll.u32 %v417_v26, 23  ;;  %v914_v63 = vand.u32 31, %v912_v61  ;;  %v413_v0 = vshll.u32 %v6659_v29, %v411_v23  ;;  %v5011_v1 = vadd.s32 4294967294, %v1072_v38 }
 0x164   :  { %v295_v30 = vsel %vm293_vm8, %v294_v60, %v6699_v51  ;;  %v907_v40 = vand.u32 8388607, %v900_v55  ;;  %v913_v33 = vshrl.u32 %v912_v61, 5  ;;  %vm342_vm15 = vcmp.lt.s32.totalorder %v6550_v12, 0 }
 0x165   :  { %v296_v31 = vadd.s32 %v295_v30, %v291_v62  ;;  %v915_v2 = vsub.s32 32, %v914_v63  ;;  %v415_v3 = vor.u32 %v414_v58, %v413_v0  ;;  %v419_v5 = vor.u32 4788187, %v418_v39 }
 0x166   :  { %vm5012_vm9 = vcmp.lt.s32.totalorder %v5011_v1, 0  ;;  %v908_v24 = vor.u32 8388608, %v907_v40  ;;  %v917_v27 = vshll.u32 %v6318_v42, %v914_v63  ;;  %v920_v28 = vshll.u32 %v6319_v44, %v914_v63 }
 0x167   :  { %v297_v6 = vadd.s32 536870912, %v296_v31  ;;  %v918_v11 = vshrl.u32 %v6319_v44, %v915_v2  ;;  %v921_v15 = vshrl.u32 %v6320_v46, %v915_v2  ;;  %v924_v29 = vshrl.u32 %v6321_v48, %v915_v2 }
 0x168   :  { %v420_v23 = vand.u32 2147483647, %v419_v5  ;;  %v422_v25 = vcvt.s32.f32 %v415_v3  ;;  %v6720_v52 = vsel %vm5012_vm9, 0, %v5011_v1  ;;  %v923_v34 = vshll.u32 %v6320_v46, %v914_v63 }
 0x169   :  { %v6715_v22 = vshrl.u32 %v297_v6, 30  ;;  %v919_v35 = vor.u32 %v918_v11, %v917_v27  ;;  %v922_v36 = vor.u32 %v921_v15, %v920_v28  ;;  %v926_v37 = vshll.u32 %v6321_v48, %v914_v63 }
 0x16a   :  { %v927_v41 = vshrl.u32 %v6322_v50, %v915_v2  ;;  %v925_v26 = vor.u32 %v924_v29, %v923_v34  ;;  %v929_v51 = vshll.u32 %v6322_v50, %v914_v63  ;;  %v930_v54 = vshrl.u32 %v6323_v59, %v915_v2 }
 0x16b   :  { %v299_v32 = vshll.u32 %v6715_v22, 30  ;;  %v1080_v44 = vsub.s32 4294967266, %v6720_v52  ;;  %v948_v38 = vshll.u32 %v908_v24, 8  ;;  %v423_v47 = vmul.f32 %v422_v25, %v420_v23 }
 0x16c   :  { %v928_v56 = vor.u32 %v927_v41, %v926_v37  ;;  %v931_v39 = vor.u32 %v930_v54, %v929_v51  ;;  %vm932_vm10 = vcmp.lt.s32.totalorder %v913_v33, 1  ;;  %v916_v46 = vshrl.u32 %v6318_v42, %v915_v2 }
 0x16d   :  { %v300_v43 = vsub.s32 %v296_v31, %v299_v32  ;;  %vm934_vm11 = vcmp.lt.s32.totalorder %v913_v33, 3  ;;  %vm935_vm12 = vcmp.lt.s32.totalorder %v913_v33, 4  ;;  %v940_v48 = vsel %vm932_vm10, %v919_v35, %v922_v36 }
 0x16e   :  { %v937_v61 = vsel %vm935_vm12, %v925_v26, 2102212464  ;;  %v941_v62 = vsel %vm935_vm12, %v928_v56, 920167782  ;;  %v944_v0 = vsel %vm932_vm10, %v922_v36, %v925_v26  ;;  %v1081_v50 = vadd.s32 127, %v1080_v44 }
 0x16f   :  { %v302_v58 = vsub.s32 0, %v300_v43  ;;  %vm933_vm13 = vcmp.lt.s32.totalorder %v913_v33, 2  ;;  %v942_v59 = vsel %vm934_vm11, %v925_v26, %v941_v62  ;;  %v945_v63 = vsel %vm935_vm12, %v931_v39, 1326507024 }
 0x170   :  { %v936_v30 = vsel %vm932_vm10, %v916_v46, %v919_v35  ;;  %v943_v31 = vsel %vm933_vm13, %v940_v48, %v942_v59  ;;  %v946_v40 = vsel %vm934_vm11, %v928_v56, %v945_v63  ;;  %v938_v3 = vsel %vm934_vm11, %v922_v36, %v937_v61 }
 0x171   :  { %v4979_v60 = vmin.u32 %v302_v58, %v300_v43  ;;  %v947_v5 = vsel %vm933_vm13, %v944_v0, %v946_v40  ;;  %v6732_v42 = vmul.u32.u64.low %v948_v38, %v943_v31  ;;  %v6733_v2 = vmul.u32.u64.high %v948_v38, %v943_v31, %v6732_v42 }
 0x172   :  { %v6736_v11 = vmul.u32.u64.low %v948_v38, %v947_v5  ;;  %v6737_v15 = vmul.u32.u64.high %v948_v38, %v947_v5, %v6736_v11  ;;  %v1076_v24 = vsub.s32 32, %v6720_v52  ;;  %v1060_v29 = vadd.s32 %v6640_v10, %v6646_v17 }
 0x173   :  { %v304_v1 = vclz %v4979_v60  ;;  %v939_v23 = vsel %vm933_vm13, %v936_v30, %v938_v3  ;;  %v424_v25 = vxor.u32 2147483648, %v423_v47  ;;  %v1082_v27 = vshll.u32 %v1081_v50, 23 }
 0x174   :  { %v958_v32 = vadd.s32 1, %v6733_v2  ;;  %v292_v34 = vadd.s32 %v6698_v49, %v6696_v45  ;;  %v1077_v37 = vshll.u32 %v6680_v4, %v6720_v52  ;;  %v1078_v41 = vshrl.u32 %v1060_v29, %v1076_v24 }
 0x175   :  { %v4980_v6 = vadd.s32 4294967294, %v304_v1  ;;  %v955_v10 = vmul.u32 %v948_v38, %v939_v23  ;;  %vm957_vm0 = vc.u32 %v6737_v15, %v6732_v42  ;;  %v425_v54 = vsel %vm342_vm15, %v424_v25, %v423_v47 }
 0x176   :  { %v959_v51 = vsel %vm957_vm0, %v958_v32, %v6733_v2  ;;  %v1083_v44 = vor.u32 4788187, %v1082_v27  ;;  %vm222_vm1 = vcmp.eq.s32.totalorder %v6542_v8, %v6540_v7  ;;  %vm223_vm2 = vcmp.eq.s32.totalorder %v6542_v8, %v6545_v9 }
 0x177   :  { %vm4981_vm14 = vcmp.lt.s32.totalorder %v4980_v6, 0  ;;  %v960_v45 = vadd.s32 %v959_v51, %v955_v10  ;;  %vm6760_vm3 = vcmp.le.f32.partialorder %v340_v14, 0.7853982  ;;  %vm6764_vm4 = vmpackc.low %vm223_vm2, %vm222_vm1  ;;  %v426_v62 = vsub.s32 4, %v6648_v21 }
 0x178   :  { %v307_v28 = vsel %vm4981_vm14, 0, %v4980_v6  ;;  %v428_v47 = vsel %vm6760_vm3, %v6550_v12, %v425_v54  ;;  %5903 = vmatprep.subr.msk.bf16.mxu1 %vm6764_vm4, %v6317_v20  ;;  %5911 = vmatprep.subr.msk.bf16.mxu0 %vm6764_vm4, %v6317_v20  ;;  %v1084_v14 = vand.u32 2147483647, %v1083_v44  ;;  %v322_v50 = vsub.s32 4, %v6715_v22 }
 0x179   :  { %v308_v35 = vsub.s32 32, %v307_v28  ;;  %v312_v36 = vsub.s32 4294967266, %v307_v28  ;;  %v309_v17 = vshll.u32 %v300_v43, %v307_v28  ;;  %v1079_v43 = vor.u32 %v1078_v41, %v1077_v37 }
 0x17a   :  { %v961_v56 = vadd.s32 536870912, %v960_v45  ;;  %6185 = vsinq.f32 %v428_v47  ;;  %vm238_vm5 = vcmp.lt.s32.totalorder %v6559_v18, 0  ;;  %v427_v31 = vsel %vm342_vm15, %v426_v62, %v6648_v21 }
 0x17b   :  { %v310_v33 = vshrl.u32 %v292_v34, %v308_v35  ;;  %v313_v26 = vadd.s32 127, %v312_v36  ;;  %v1086_v60 = vcvt.s32.f32 %v1079_v43  ;;  %6187 = vcosq.f32 %v428_v47 }
 0x17c   :  { %v6777_v39 = vshrl.u32 %v961_v56, 30  ;;  %vm237_vm6 = vcmp.le.f32.partialorder %v236_v53, 0.7853982  ;;  %v323_v3 = vsel %vm238_vm5, %v322_v50, %v6715_v22  ;;  %v429_v11 = vsel %vm6760_vm3, 0, %v427_v31 }
 0x17d   :  { %v311_v49 = vor.u32 %v310_v33, %v309_v17  ;;  %v314_v4 = vshll.u32 %v313_v26, 23  ;;  %v1087_v59 = vmul.f32 %v1086_v60, %v1084_v14  ;;  %v325_v24 = vsel %vm237_vm6, 0, %v323_v3 }
 0x17e   :  { %v963_v61 = vshll.u32 %v6777_v39, 30  ;;  %vm1006_vm7 = vcmp.lt.s32.totalorder %v6552_v13, 0  ;;  %v433_v25 = vadd.s32 3, %v429_v11  ;;  %v640_v27 = vand.u32 3, %v429_v11 }
 0x17f   :  { %v315_v58 = vor.u32 4788187, %v314_v4  ;;  %v318_v48 = vcvt.s32.f32 %v311_v49  ;;  %v1088_v5 = vxor.u32 2147483648, %v1087_v59  ;;  %v329_v28 = vadd.s32 3, %v325_v24 }
 0x180   :  { %v964_v63 = vsub.s32 %v960_v45, %v963_v61  ;;  %vm6801_vm8 = vcmp.le.f32.partialorder %v1004_v16, 0.7853982  ;;  %v537_v36 = vand.u32 3, %v325_v24  ;;  %vm650_vm10 = vcmask 130048  }
 0x181   :  { %v316_v46 = vand.u32 2147483647, %v315_v58  ;;  %v1089_v53 = vsel %vm1006_vm7, %v1088_v5, %v1087_v59  ;;  %v956_v41 = vadd.s32 %v6732_v42, %v6737_v15  ;;  %vm328_vm11 = vweird.f32 %v6559_v18 }
 0x182   :  { %v966_v30 = vsub.s32 0, %v964_v63  ;;  %v1092_v34 = vsel %vm6801_vm8, %v6552_v13, %v1089_v53  ;;  %v6813_v33 = vand.u32 3, %v433_v25  ;;  %vm641_vm12 = vcmp.lt.s32.totalorder %v640_v27, 2 }
 0x183   :  { %v319_v0 = vmul.f32 %v318_v48, %v316_v46  ;;  %vm642_vm13 = vcmp.eq.s32.totalorder %v640_v27, 0  ;;  %v330_v26 = vand.u32 3, %v329_v28  ;;  %vm538_vm14 = vcmp.lt.s32.totalorder %v537_v36, 2  ;;  %v1543_v46 = vld [vmem:[%s7503_s9] sm:$0xff]  ;;  %v1544_v48 = vld [vmem:[%s7503_s9 + $0x8] sm:$0xff] }
 0x184   :  { %v5006_v6 = vmin.u32 %v966_v30, %v964_v63  ;;  %v6793_v21 = vpop.eup %6185  ;;  %vm645_vm15 = vcmp.eq.s32.totalorder %v640_v27, 2  ;;  %vm539_vm0 = vcmp.eq.s32.totalorder %v537_v36, 0  ;;  %vm542_vm1 = vcmp.eq.s32.totalorder %v537_v36, 2 }
 0x185   :  { %v320_v1 = vxor.u32 2147483648, %v319_v0  ;;  %v6797_v22 = vpop.eup %6187  ;;  %v437_v37 = vxor.u32 2147483648, %v6793_v21  ;;  %vm335_vm2 = vcmp.eq.s32.totalorder %v330_v26, 2  ;;  %vm332_vm3 = vcmp.eq.s32.totalorder %v330_v26, 0 }
 0x186   :  { %v968_v29 = vclz %v5006_v6  ;;  %v440_v16 = vxor.u32 2147483648, %v6797_v22  ;;  %v5914_v30 = vpack.c.bf16 %v1544_v48, %v1543_v46  ;;  %v1090_v31 = vsub.s32 4, %v6674_v57 }
 0x187   :  { %v321_v40 = vsel %vm238_vm5, %v320_v1, %v319_v0  ;;  %v644_v42 = vsel %vm642_vm13, %v6797_v22, %v437_v37  ;;  %vm331_vm5 = vcmp.lt.s32.totalorder %v330_v26, 2  ;;  %v986_v3 = vsub.s32 4, %v6777_v39 }
 0x188   :  { %v324_v2 = vsel %vm237_vm6, %v6559_v18, %v321_v40  ;;  %v5007_v23 = vadd.s32 4294967294, %v968_v29  ;;  %v647_v43 = vsel %vm645_vm15, %v440_v16, %v6793_v21  ;;  %vm432_vm6 = vweird.f32 %v6550_v12 }
 0x189   :  { %6189 = vcosq.f32 %v324_v2  ;;  %v648_v61 = vsel %vm641_vm12, %v644_v42, %v647_v43  ;;  %vm439_vm12 = vcmp.eq.s32.totalorder %v6813_v33, 2  ;;  %vm902_vm13 = vcmp.lt.s32.totalorder %v6561_v19, 0 }
 0x18a   :  { %6191 = vsinq.f32 %v324_v2  ;;  %vm5008_vm9 = vcmp.lt.s32.totalorder %v5007_v23, 0  ;;  %v649_v5 = vsel %vm432_vm6, nan, %v648_v61  ;;  %v441_v29 = vsel %vm439_vm12, %v440_v16, %v6793_v21  ;;  %v1545_v21 = vld [vmem:[%s7503_s9 + $0x10] sm:$0xff] }
 0x18b   :  { %v971_v35 = vsel %vm5008_vm9, 0, %v5007_v23  ;;  %6193 = vcosq.f32 %v1092_v34  ;;  %vm436_vm9 = vcmp.eq.s32.totalorder %v6813_v33, 0  ;;  %v1091_v18 = vsel %vm1006_vm7, %v1090_v31, %v6674_v57  ;;  %v1638_v61 = vld [vmem:[%s7506_s12 + $0x10] sm:$0xff] }
 0x18c   :  { %v972_v10 = vsub.s32 32, %v971_v35  ;;  %v976_v17 = vsub.s32 4294967266, %v971_v35  ;;  %v973_v51 = vshll.u32 %v964_v63, %v971_v35  ;;  %6195 = vsinq.f32 %v1092_v34  ;;  %v1502_v31 = vld [vmem:[%s7542_s7 + $0x10] sm:$0xff] }
 0x18d   :  { %v438_v24 = vsel %vm436_vm9, %v6797_v22, %v437_v37  ;;  %v987_v25 = vsel %vm902_vm13, %v986_v3, %v6777_v39  ;;  %v1093_v57 = vsel %vm6801_vm8, 0, %v1091_v18  ;;  %vm992_vm9 = vweird.f32 %v6561_v19  ;;  %v1477_v3 = vld [vmem:[%s7543_s29 + $0x8] sm:$0xff] }
 0x18e   :  { %v974_v54 = vshrl.u32 %v956_v41, %v972_v10  ;;  %v977_v44 = vadd.s32 127, %v976_v17  ;;  %v1304_v35 = vand.u32 3, %v1093_v57  ;;  %v1097_v10 = vadd.s32 3, %v1093_v57 }
 0x18f   :  { %vm1096_vm12 = vweird.f32 %v6552_v13  ;;  %v1500_v13 = vld [vmem:[%s7542_s7] sm:$0xff] }
 0x190   :  { %v975_v49 = vor.u32 %v974_v54, %v973_v51  ;;  %v978_v4 = vshll.u32 %v977_v44, 23  ;;  %vm1306_vm7 = vcmp.eq.s32.totalorder %v1304_v35, 0  ;;  %vm1309_vm8 = vcmp.eq.s32.totalorder %v1304_v35, 2 }
 0x191   :  { %v1098_v51 = vand.u32 3, %v1097_v10  ;;  %vm1305_vm15 = vcmp.lt.s32.totalorder %v1304_v35, 2 }
 0x192   :  { %v979_v47 = vor.u32 4788187, %v978_v4  ;;  %v982_v50 = vcvt.s32.f32 %v975_v49  ;;  %v1636_v49 = vld [vmem:[%s7506_s12] sm:$0xff]  ;;  %v1637_v4 = vld [vmem:[%s7506_s12 + $0x8] sm:$0xff] }
 0x193   :  { %v6190_v45 = vpop.eup %6189 }
 0x194   :  { %v6192_v15 = vpop.eup %6191  ;;  %v336_v52 = vxor.u32 2147483648, %v6190_v45  ;;  %v980_v0 = vand.u32 2147483647, %v979_v47 }
 0x195   :  { %v333_v56 = vxor.u32 2147483648, %v6192_v15  ;;  %v6838_v6 = vpop.eup %6193 }
 0x196   :  { %v544_v58 = vsel %vm542_vm1, %v336_v52, %v6192_v15  ;;  %v337_v14 = vsel %vm335_vm2, %v336_v52, %v6192_v15  ;;  %v983_v40 = vmul.f32 %v982_v50, %v980_v0  ;;  %v6846_v53 = vpop.eup %6195  ;;  %v1104_v41 = vxor.u32 2147483648, %v6838_v6 }
 0x197   :  { %v541_v60 = vsel %vm539_vm0, %v6190_v45, %v333_v56  ;;  %v334_v62 = vsel %vm332_vm3, %v6190_v45, %v333_v56  ;;  %v1101_v37 = vxor.u32 2147483648, %v6846_v53 }
 0x198   :  { %v545_v59 = vsel %vm538_vm14, %v541_v60, %v544_v58  ;;  %v338_v63 = vsel %vm331_vm5, %v334_v62, %v337_v14  ;;  %v984_v11 = vxor.u32 2147483648, %v983_v40  ;;  %vm435_vm14 = vcmp.lt.s32.totalorder %v6813_v33, 2  ;;  %v1639_v62 = vld [vmem:[%s7506_s12 + $0x18] sm:$0xff] }
 0x199   :  { %v546_v1 = vsel %vm328_vm11, nan, %v545_v59  ;;  %v339_v2 = vsel %vm328_vm11, nan, %v338_v63  ;;  %vm901_vm11 = vcmp.le.f32.partialorder %v900_v55, 0.7853982  ;;  %v1546_v55 = vld [vmem:[%s7503_s9 + $0x18] sm:$0xff]  ;;  %v442_v27 = vsel %vm435_vm14, %v438_v24, %v441_v29  ;;  %v1480_v59 = vld [vmem:[%s7541_s2 + $0x8] sm:$0xff] }
 0x19a   :  { %5441 = vmatprep.mubr.msk.f32.mxu1 %vm650_vm10, %v546_v1  ;;  %v985_v23 = vsel %vm902_vm13, %v984_v11, %v983_v40  ;;  %v989_v28 = vsel %vm901_vm11, 0, %v987_v25  ;;  %v5918_v39 = vpack.c.bf16 %v1546_v55, %v1545_v21  ;;  %v443_v34 = vsel %vm432_vm6, nan, %v442_v27  ;;  %v1501_v1 = vld [vmem:[%s7542_s7 + $0x8] sm:$0xff]  ;;  %v1476_v40 = vld [vmem:[%s7543_s29] sm:$0xff] }
 0x19b   :  { %5442 = vmatmul.mubr.msk.f32.vlgmr.msra.gmra.mrb[2].mxu1 %vm650_vm10, %v649_v5  ;;  %v988_v22 = vsel %vm901_vm11, %v6561_v19, %v985_v23  ;;  %v993_v36 = vadd.s32 3, %v989_v28  ;;  %v1201_v17 = vand.u32 3, %v989_v28  ;;  %v1308_v16 = vsel %vm1306_vm7, %v6838_v6, %v1101_v37  ;;  %v1478_v5 = vld [vmem:[%s7543_s29 + $0x10] sm:$0xff] }
 0x19c   :  { %5448 = vmatprep.mubr.msk.f32.mxu1 %vm650_vm10, %v339_v2  ;;  %5905 = vmatpush3.bf16.msk.msra.mxu1 %vm6764_vm4, %v6317_v20  ;;  %6197 = vcosq.f32 %v988_v22  ;;  %v1311_v12 = vsel %vm1309_vm8, %v1104_v41, %v6846_v53  ;;  %v5922_v14 = vpack.c.bf16 %v1637_v4, %v1636_v49  ;;  %vm1100_vm11 = vcmp.eq.s32.totalorder %v1098_v51, 0 }
 0x19d   :  { %5915 = vmatprep.subr.bf16.mxu1 %v5914_v30  ;;  %6199 = vsinq.f32 %v988_v22  ;;  %v994_v32 = vand.u32 3, %v993_v36  ;;  %vm1206_vm0 = vcmp.eq.s32.totalorder %v1201_v17, 2  ;;  %v1312_v45 = vsel %vm1305_vm15, %v1308_v16, %v1311_v12 }
 0x19e   :  { %vm1203_vm2 = vcmp.eq.s32.totalorder %v1201_v17, 0  ;;  %vm1202_vm5 = vcmp.lt.s32.totalorder %v1201_v17, 2  ;;  %v1313_v46 = vsel %vm1096_vm12, nan, %v1312_v45  ;;  %vm1103_vm13 = vcmp.eq.s32.totalorder %v1098_v51, 2 }
 0x19f   :  { %vm999_vm1 = vcmp.eq.s32.totalorder %v994_v32, 2  ;;  %vm996_vm3 = vcmp.eq.s32.totalorder %v994_v32, 0  ;;  %vm995_vm6 = vcmp.lt.s32.totalorder %v994_v32, 2  ;;  %v1102_v19 = vsel %vm1100_vm11, %v6838_v6, %v1101_v37 }
 0x1a0   :  { %v1105_v60 = vsel %vm1103_vm13, %v1104_v41, %v6846_v53  ;;  %vm1099_vm14 = vcmp.lt.s32.totalorder %v1098_v51, 2  ;;  %v5926_v50 = vpack.c.bf16 %v1639_v62, %v1638_v61  ;;  %v6324_v63 = vmov 0   ;;  %v1931_v51 = vld [vmem:[#allocation2 + $0x8] sm:$0xff] }
 0x1a1   :  { %v1106_v0 = vsel %vm1099_vm14, %v1102_v19, %v1105_v60  ;;  %6183 = vset.pattern.permute.xlu0 %v6324_v63  ;;  %6184 = vset.pattern.permute.xlu1 %v6324_v63  ;;  %v6325_v29 = vmov 0.0|0.0   ;;  %vm6326_vm7 = vmmov 0   ;;  %v6327_v53 = vmov 0.0  }
 0x1a2   :  { %v1107_v38 = vsel %vm1096_vm12, nan, %v1106_v0  ;;  %1486 = vperm.xlu1 %6184, %v1480_v59   ;;  %v2118_v0 = vld [vmem:[#allocation6 + $0x10] sm:$0xff] }
 0x1a3   :  { %5449 = vmatmul.mubr.msk.f32.vlgmr.msra.gmra.mrb[2].mxu1 %vm650_vm10, %v443_v34  ;;  %v5041_v34 = vld [vmem:[%s7504_s10] ss:$0 sm:$0xff] }
 0x1a4   :  { %5917 = vmatpush3.bf16.msra.mxu1 %v5914_v30  ;;  %v1481_v30 = vld [vmem:[%s7541_s2 + $0x10] sm:$0xff] }
 0x1a5   :  { %5919 = vmatprep.subr.bf16.mxu1 %v5918_v39 }
 0x1a6   :  { %v6198_v33 = vpop.eup %6197  ;;  %1507 = vperm.xlu1 %6184, %v1501_v1  }
 0x1a7   :  { %v6200_v26 = vpop.eup %6199  ;;  %v1000_v54 = vxor.u32 2147483648, %v6198_v33 }
 0x1a8   :  { %5921 = vmatpush3.bf16.msra.mxu1 %v5918_v39  ;;  %v997_v44 = vxor.u32 2147483648, %v6200_v26 }
 0x1a9   :  { %v1208_v42 = vsel %vm1206_vm0, %v1000_v54, %v6200_v26  ;;  %v1001_v15 = vsel %vm999_vm1, %v1000_v54, %v6200_v26  ;;  %5930 = vmatprep.subr.bf16.mxu1 %v6325_v29  ;;  %v1930_v26 = vld [vmem:[#allocation2] sm:$0xff] }
 0x1aa   :  { %v1205_v52 = vsel %vm1203_vm2, %v6198_v33, %v997_v44  ;;  %v998_v43 = vsel %vm996_vm3, %v6198_v33, %v997_v44  ;;  %1510 = vperm.xlu1 %6184, %v1502_v31   ;;  %v5937_v54 = vpack.c.bf16 %v1931_v51, %v1930_v26  ;;  %v1932_v44 = vld [vmem:[#allocation2 + $0x10] sm:$0xff]  ;;  %v5053_v26 = vld [vmem:[%s7508_s14] ss:$0 sm:$0xff] }
 0x1ab   :  { %v1209_v56 = vsel %vm1202_vm5, %v1205_v52, %v1208_v42  ;;  %v1002_v47 = vsel %vm995_vm6, %v998_v43, %v1001_v15  ;;  %v2116_v42 = vld [vmem:[#allocation6] sm:$0xff]  ;;  %v2117_v15 = vld [vmem:[#allocation6 + $0x8] sm:$0xff]  ;;  %vm2030_vm6 = vcmask 195584  }
 0x1ac   :  { %v1210_v58 = vsel %vm992_vm9, nan, %v1209_v56  ;;  %v1003_v48 = vsel %vm992_vm9, nan, %v1002_v47  ;;  %v5946_v49 = vpack.c.bf16 %v2117_v15, %v2116_v42 }
 0x1ad   :  { %5460 = vmatprep.mubr.msk.f32.mxu0 %vm650_vm10, %v1210_v58 }
 0x1ae   :  { %5461 = vmatmul.mubr.msk.f32.vlgmr.msra.gmra.mrb[2].mxu0 %vm650_vm10, %v1313_v46  ;;  %1907 = vperm.xlu1 %6184, %v1477_v3  }
 0x1af   :  { %5467 = vmatprep.mubr.msk.f32.mxu0 %vm650_vm10, %v1003_v48  ;;  %5913 = vmatpush3.bf16.msk.msra.mxu0 %vm6764_vm4, %v6317_v20  ;;  %v1479_v20 = vld [vmem:[%s7541_s2] sm:$0xff]  ;;  %vm1554_vm4 = vcmask 261120  }
 0x1b0   :  { %5923 = vmatprep.subr.bf16.mxu0 %v5922_v14  ;;  %1483 = vperm.xlu0 %6183, %v1479_v20  }
 0x1b4   :  { %1504 = vperm.xlu0 %6183, %v1500_v13  }
 0x1b6   :  { %5468 = vmatmul.mubr.msk.f32.vlgmr.msra.gmra.mrb[2].mxu0 %vm650_vm10, %v1107_v38 }
 0x1b7   :  { %5925 = vmatpush3.bf16.msra.mxu0 %v5922_v14  ;;  %v5052_v14 = vld [vmem:[%s7505_s11] ss:$0 sm:$0xff] }
 0x1b8   :  { %5927 = vmatprep.subr.bf16.mxu0 %v5926_v50  ;;  %1489 = vperm.xlu0 %6183, %v1481_v30  }
 0x1bb   :  { %5929 = vmatpush3.bf16.msra.mxu0 %v5926_v50  ;;  %v2119_v50 = vld [vmem:[#allocation6 + $0x18] sm:$0xff] }
 0x1bc   :  { %1902 = vperm.xlu0 %6183, %v1476_v40   ;;  %5933 = vmatprep.subr.bf16.mxu0 %v6325_v29  ;;  %v5950_v30 = vpack.c.bf16 %v2119_v50, %v2118_v0  ;;  %v2289_v50 = vld [vmem:[#allocation7 + $0x10] sm:$0xff] }
 0x1c0   :  { %1912 = vperm.xlu0 %6183, %v1478_v5  }
 0x221   :  { %v1487_v27 = vpop.permute.xlu1 %1486 }
 0x222   :  { %vm1492_vm15 = vcmp.eq.s32.totalorder %v1487_v27, %v6542_v8  ;;  %v5038_v27 = vld [vmem:[%s7502_s8] ss:$0 sm:$0xff] }
 0x223   :  { %v6959_v57 = vsel %vm1492_vm15, 1.0, %v6327_v53  ;;  %vm1537_vm5 = vcmp.eq.s32.totalorder %v5038_v27, %v6540_v7  ;;  %vm1538_vm9 = vcmp.eq.s32.totalorder %v5038_v27, %v6545_v9 }
 0x225   :  { %v1508_v17 = vpop.permute.xlu1 %1507 }
 0x226   :  { %vm1513_vm2 = vcmp.eq.s32.totalorder %v1508_v17, %v6542_v8 }
 0x227   :  { %v6986_v16 = vsel %vm1513_vm2, 1.0, %v6327_v53 }
 0x229   :  { %v1511_v12 = vpop.permute.xlu1 %1510 }
 0x22a   :  { %vm1514_vm3 = vcmp.eq.s32.totalorder %v1511_v12, %v6542_v8 }
 0x22b   :  { %v6994_v33 = vsel %vm1514_vm3, 1.0, %v6327_v53 }
 0x22d   :  { %v7005_v62 = vpop.permute.xlu1 %1907 }
 0x22e   :  { %v1922_v13 = vmul.f32 %v5052_v14, %v7005_v62 }
 0x22f   :  { %v1484_v18 = vpop.permute.xlu0 %1483 }
 0x230   :  { %vm1491_vm8 = vcmp.eq.s32.totalorder %v1484_v18, %v6542_v8 }
 0x231   :  { %v6951_v22 = vsel %vm1491_vm8, 1.0, %v6327_v53 }
 0x233   :  { %v1505_v55 = vpop.permute.xlu0 %1504 }
 0x234   :  { %vm1512_vm1 = vcmp.eq.s32.totalorder %v1505_v55, %v6542_v8 }
 0x235   :  { %v6978_v32 = vsel %vm1512_vm1, 1.0, %v6327_v53 }
 0x237   :  { %v1490_v28 = vpop.permute.xlu0 %1489 }
 0x238   :  { %vm1493_vm0 = vcmp.eq.s32.totalorder %v1490_v28, %v6542_v8  ;;  %v1933_v8 = vld [vmem:[#allocation2 + $0x18] sm:$0xff]  ;;  %v7027_v28 = vsel %vm1537_vm5, 1.0, %v6327_v53 }
 0x239   :  { %v6967_v39 = vsel %vm1493_vm0, 1.0, %v6327_v53  ;;  %v5940_v45 = vpack.c.bf16 %v1933_v8, %v1932_v44 }
 0x23b   :  { %v7002_v46 = vpop.permute.xlu0 %1902 }
 0x23c   :  { %v1921_v60 = vmul.f32 %v5052_v14, %v7002_v46 }
 0x23f   :  { %v7008_v31 = vpop.permute.xlu0 %1912 }
 0x276   :  { %v6926_v2 = vpop.f32.mrb[2].mxu1 }
 0x277   :  { %v6928_v6 = vpop.f32.mrb[3].mxu1 }
 0x278   :  { %5489 = vmatprep.mubr.msk.f32.mxu0 %vm1554_vm4, %v6928_v6 }
 0x279   :  { %5490 = vmatmul.mubr.msk.f32.vlgmr.msra.gmra.mrb[4].mxu0 %vm1554_vm4, %v6926_v2 }
 0x27a   :  { %5509 = vmatprep.mubr.msk.f32.mxu0 %vm6326_vm7, %v6327_v53 }
 0x289   :  { %v6934_v11 = vpop.f32.mrb[2].mxu0 }
 0x28a   :  { %v6936_v24 = vpop.f32.mrb[3].mxu0 }
 0x28b   :  { %5478 = vmatprep.mubr.msk.f32.mxu1 %vm1554_vm4, %v6936_v24 }
 0x28c   :  { %5479 = vmatmul.mubr.msk.f32.vlgmr.msra.gmra.mrb[4].mxu1 %vm1554_vm4, %v6934_v11 }
 0x28d   :  { %5496 = vmatprep.mubr.msk.f32.mxu1 %vm6326_vm7, %v6327_v53 }
 0x34c   :  { %v5491_v23 = vpop.f32.mrb[4].mxu0 }
 0x34d   :  { %v1712_v25 = vpop.f32.mrb[5].mxu0 }
 0x34e   :  { %v5931_v21 = vpack.c.bf16 %v5491_v23, %v1712_v25  ;;  %v1923_v23 = vmul.f32 %v5052_v14, %v7008_v31 }
 0x350   :  { %5932 = vmatpush3.bf16.msra.mxu1 %v5931_v21 }
 0x351   :  { %5936 = vmatprep.subr.bf16.mxu1 %v6325_v29 }
 0x353   :  { %5497 = vmatmul.mubr.msk.f32.vlgmr.msra.gmra.mrb[6].mxu1 %vm650_vm10, %v6951_v22 }
 0x354   :  { %5499 = vmatprep.mubr.msk.f32.mxu1 %vm6326_vm7, %v6327_v53  ;;  %5938 = vmatpush3.bf16.msra.mxu1 %v5937_v54 }
 0x355   :  { %5939 = vmatprep.subr.bf16.mxu1 %v6325_v29 }
 0x357   :  { %5500 = vmatmul.mubr.msk.f32.gmra.mrb[8].mxu1 %vm650_vm10, %v6959_v57 }
 0x358   :  { %5502 = vmatprep.mubr.msk.f32.mxu1 %vm6326_vm7, %v6327_v53  ;;  %5941 = vmatpush3.bf16.msra.mxu1 %v5940_v45 }
 0x359   :  { %5947 = vmatprep.subr.bf16.mxu1 %v5946_v49 }
 0x35b   :  { %5503 = vmatmul.mubr.msk.f32.gmra.mrb[10].mxu1 %vm650_vm10, %v6967_v39 }
 0x35c   :  { %5526 = vmatprep.mubr.msk.f32.mxu1 %vm6326_vm7, %v6327_v53 }
 0x35f   :  { %v5480_v35 = vpop.f32.mrb[4].mxu1 }
 0x360   :  { %v1633_v36 = vadd.f32 %v5480_v35, %v5041_v34  ;;  %v1627_v37 = vpop.f32.mrb[5].mxu1  ;;  %v2113_v35 = vld [vmem:[#allocation4 + $0x8] sm:$0xff] }
 0x361   :  { %v1628_v41 = vadd.f32 %v5041_v34, %v1627_v37  ;;  %v2112_v34 = vld [vmem:[#allocation4] sm:$0xff] }
 0x362   :  { %v5954_v37 = vpack.c.bf16 %v2113_v35, %v2112_v34 }
 0x363   :  { %v5934_v10 = vpack.c.bf16 %v1633_v36, %v1628_v41  ;;  %v2114_v36 = vld [vmem:[#allocation4 + $0x10] sm:$0xff]  ;;  %v2115_v41 = vld [vmem:[#allocation4 + $0x18] sm:$0xff] }
 0x365   :  { %5935 = vmatpush3.bf16.msra.mxu0 %v5934_v10  ;;  %v5958_v10 = vpack.c.bf16 %v2115_v41, %v2114_v36  ;;  %v5064_v36 = vld [vmem:[%s7513_s19] ss:$0 sm:$0xff] }
 0x368   :  { %5510 = vmatmul.mubr.msk.f32.vlgmr.msra.gmra.mrb[6].mxu0 %vm650_vm10, %v6978_v32 }
 0x369   :  { %5512 = vmatprep.mubr.msk.f32.mxu0 %vm6326_vm7, %v6327_v53 }
 0x36c   :  { %5513 = vmatmul.mubr.msk.f32.gmra.mrb[8].mxu0 %vm650_vm10, %v6986_v16 }
 0x36d   :  { %5515 = vmatprep.mubr.msk.f32.mxu0 %vm6326_vm7, %v6327_v53 }
 0x370   :  { %5516 = vmatmul.mubr.msk.f32.gmra.mrb[10].mxu0 %vm650_vm10, %v6994_v33 }
 0x371   :  { %5541 = vmatprep.mubr.msk.f32.mxu0 %vm2030_vm6, %v7027_v28 }
 0x426   :  { %v1796_v4 = vpop.f32.mrb[6].mxu1 }
 0x427   :  { %v5498_v52 = vpop.f32.mrb[7].mxu1 }
 0x428   :  { %v5077_v52 = vld [vmem:[%s7506_s12 + $0x20] sm:$0xff] }
 0x42a   :  { %v1801_v43 = vpop.f32.mrb[8].mxu1 }
 0x42b   :  { %v5501_v56 = vpop.f32.mrb[9].mxu1 }
 0x42e   :  { %v1806_v47 = vpop.f32.mrb[10].mxu1 }
 0x42f   :  { %v5504_v58 = vpop.f32.mrb[11].mxu1 }
 0x430   :  { %v2288_v58 = vld [vmem:[#allocation7 + $0x8] sm:$0xff] }
 0x43b   :  { %v1885_v48 = vpop.f32.mrb[6].mxu0 }
 0x43c   :  { %v1886_v19 = vadd.f32 %v1885_v48, %v1796_v4  ;;  %v5511_v61 = vpop.f32.mrb[7].mxu0  ;;  %v7036_v4 = vsel %vm1538_vm9, 1.0, %v6327_v53  ;;  %v5079_v48 = vld [vmem:[%s7506_s12 + $0x30] sm:$0xff] }
 0x43e   :  { %v1924_v38 = vadd.f32 %v1921_v60, %v1886_v19  ;;  %v5080_v19 = vld [vmem:[%s7506_s12 + $0x38] sm:$0xff] }
 0x43f   :  { %v1890_v20 = vpop.f32.mrb[8].mxu0  ;;  %v5982_v0 = vpack.c.bf16 %v5080_v19, %v5079_v48  ;;  %v2774_v19 = vld [vmem:[#allocation2 + $0x30] sm:$0xff] }
 0x440   :  { %v1927_v59 = vmax.f32 %v1924_v38, 0.0  ;;  %v1891_v63 = vadd.f32 %v1890_v20, %v1801_v43  ;;  %v5514_v1 = vpop.f32.mrb[9].mxu0  ;;  %v5078_v43 = vld [vmem:[%s7506_s12 + $0x28] sm:$0xff]  ;;  %v2290_v38 = vld [vmem:[#allocation7 + $0x18] sm:$0xff] }
 0x441   :  { %v5978_v56 = vpack.c.bf16 %v5078_v43, %v5077_v52  ;;  %v5966_v20 = vpack.c.bf16 %v2290_v38, %v2289_v50  ;;  %v5063_v1 = vld [vmem:[%s7511_s17] ss:$0 sm:$0xff]  ;;  %v2961_v50 = vld [vmem:[#allocation6 + $0x28] sm:$0xff] }
 0x442   :  { %v1925_v40 = vadd.f32 %v1922_v13, %v1891_v63  ;;  %5527 = vmatmul.mubr.msk.f32.vlgmr.msra.gmra.mrb[12].mxu1 %vm1554_vm4, %v1927_v59  ;;  %v5069_v59 = vld [vmem:[%s7503_s9 + $0x20] sm:$0xff]  ;;  %v5070_v63 = vld [vmem:[%s7503_s9 + $0x28] sm:$0xff] }
 0x443   :  { %v1895_v3 = vpop.f32.mrb[10].mxu0  ;;  %5529 = vmatprep.mubr.msk.f32.mxu1 %vm6326_vm7, %v6327_v53  ;;  %5949 = vmatpush3.bf16.msra.mxu1 %v5946_v49  ;;  %v5970_v13 = vpack.c.bf16 %v5070_v63, %v5069_v59 }
 0x444   :  { %v1928_v5 = vmax.f32 %v1925_v40, 0.0  ;;  %v1896_v18 = vadd.f32 %v1895_v3, %v1806_v47  ;;  %v5517_v25 = vpop.f32.mrb[11].mxu0  ;;  %5951 = vmatprep.subr.bf16.mxu1 %v5950_v30  ;;  %v2287_v47 = vld [vmem:[#allocation7] sm:$0xff] }
 0x445   :  { %v5962_v14 = vpack.c.bf16 %v2288_v58, %v2287_v47  ;;  %v2772_v58 = vld [vmem:[#allocation2 + $0x20] sm:$0xff] }
 0x446   :  { %v1926_v21 = vadd.f32 %v1923_v23, %v1896_v18  ;;  %5530 = vmatmul.mubr.msk.f32.gmra.mrb[14].mxu1 %vm1554_vm4, %v1928_v5  ;;  %v5071_v18 = vld [vmem:[%s7503_s9 + $0x30] sm:$0xff]  ;;  %v5072_v23 = vld [vmem:[%s7503_s9 + $0x38] sm:$0xff] }
 0x447   :  { %5532 = vmatprep.mubr.msk.f32.mxu1 %vm6326_vm7, %v6327_v53  ;;  %5953 = vmatpush3.bf16.msra.mxu1 %v5950_v30 }
 0x448   :  { %v1929_v55 = vmax.f32 %v1926_v21, 0.0  ;;  %5955 = vmatprep.subr.bf16.mxu1 %v5954_v37 }
 0x44a   :  { %5533 = vmatmul.mubr.msk.f32.gmra.mrb[16].mxu1 %vm1554_vm4, %v1929_v55  ;;  %v5974_v55 = vpack.c.bf16 %v5072_v23, %v5071_v18 }
 0x44b   :  { %5552 = vmatprep.mubr.msk.f32.mxu1 %vm1554_vm4, %v6936_v24 }
 0x44e   :  { %5553 = vmatmul.mubr.msk.f32.vlgmr.msra.gmra.mrb[18].mxu1 %vm1554_vm4, %v6934_v11 }
 0x44f   :  { %5957 = vmatpush3.bf16.msra.mxu1 %v5954_v37 }
 0x450   :  { %5959 = vmatprep.subr.bf16.mxu1 %v5958_v10 }
 0x453   :  { %5961 = vmatpush3.bf16.msra.mxu1 %v5958_v10 }
 0x454   :  { %5979 = vmatprep.subr.bf16.mxu1 %v5978_v56 }
 0x515   :  { %v2016_v17 = vpop.f32.mrb[12].mxu1 }
 0x516   :  { %v5528_v12 = vpop.f32.mrb[13].mxu1  ;;  %v2017_v54 = vadd.f32 %v5053_v26, %v2016_v17 }
 0x519   :  { %v2021_v51 = vpop.f32.mrb[14].mxu1 }
 0x51a   :  { %v2022_v44 = vadd.f32 %v5053_v26, %v2021_v51  ;;  %v5531_v8 = vpop.f32.mrb[15].mxu1  ;;  %v5074_v51 = vld [vmem:[%s7504_s10 + $0x1] ss:$0 sm:$0xff] }
 0x51c   :  { %v5942_v45 = vpack.c.bf16 %v2022_v44, %v2017_v54 }
 0x51d   :  { %v2026_v42 = vpop.f32.mrb[16].mxu1 }
 0x51e   :  { %v2027_v15 = vadd.f32 %v5053_v26, %v2026_v42  ;;  %v5534_v49 = vpop.f32.mrb[17].mxu1  ;;  %5943 = vmatprep.subr.bf16.mxu0 %v5942_v45 }
 0x51f   :  { %5945 = vmatpush3.bf16.msra.mxu0 %v5942_v45 }
 0x520   :  { %5539 = vmatprep.subr.mxu0 %v2027_v15 }
 0x523   :  { %5540 = vmatpush3.msra.mxu0 %v2027_v15 }
 0x524   :  { %5542 = vmatmul.mubr.msk.f32.vlgmr.msra.gmra.mrb[12].mxu0 %vm2030_vm6, %v7036_v4  ;;  %5963 = vmatprep.subr.bf16.mxu0 %v5962_v14 }
 0x525   :  { %5965 = vmatpush3.bf16.msra.mxu0 %v5962_v14  ;;  %v2773_v14 = vld [vmem:[#allocation2 + $0x28] sm:$0xff] }
 0x526   :  { %5967 = vmatprep.subr.bf16.mxu0 %v5966_v20  ;;  %v5993_v48 = vpack.c.bf16 %v2773_v14, %v2772_v58 }
 0x529   :  { %5969 = vmatpush3.bf16.msra.mxu0 %v5966_v20  ;;  %v5090_v20 = vld [vmem:[%s7505_s11 + $0x1] ss:$0 sm:$0xff] }
 0x52a   :  { %5971 = vmatprep.subr.bf16.mxu0 %v5970_v13 }
 0x5f7   :  { %v5543_v60 = vpop.f32.mrb[12].mxu0 }
 0x5f8   :  { %v2103_v61 = vpop.f32.mrb[13].mxu0 }
 0x5f9   :  { %5563 = vmatprep.mubr.msk.f32.mxu1 %vm1554_vm4, %v2103_v61 }
 0x5fa   :  { %5564 = vmatmul.mubr.msk.f32.vlgmr.msra.gmra.mrb[18].mxu1 %vm1554_vm4, %v5543_v60  ;;  %v2775_v60 = vld [vmem:[#allocation2 + $0x38] sm:$0xff] }
 0x5fb   :  { %5981 = vmatpush3.bf16.msra.mxu1 %v5978_v56  ;;  %5596 = vmatprep.mubr.msk.f32.mxu1 %vm1554_vm4, %v6936_v24  ;;  %v5996_v61 = vpack.c.bf16 %v2775_v60, %v2774_v19 }
 0x5fc   :  { %5983 = vmatprep.subr.bf16.mxu1 %v5982_v0 }
 0x5ff   :  { %5985 = vmatpush3.bf16.msra.mxu1 %v5982_v0  ;;  %v2960_v0 = vld [vmem:[#allocation6 + $0x20] sm:$0xff] }
 0x600   :  { %5989 = vmatprep.subr.bf16.mxu1 %v6325_v29  ;;  %v6002_v38 = vpack.c.bf16 %v2961_v50, %v2960_v0  ;;  %v5120_v50 = vld [vmem:[%s7506_s12 + $0x40] sm:$0xff] }
 0x602   :  { %5597 = vmatmul.mubr.msk.f32.vlgmr.msra.gmra.mrb[20].mxu1 %vm1554_vm4, %v6934_v11 }
 0x603   :  { %5616 = vmatprep.mubr.msk.f32.mxu1 %vm6326_vm7, %v6327_v53 }
 0x6cd   :  { %v5565_v30 = vpop.f32.mrb[18].mxu1 }
 0x6ce   :  { %v2284_v40 = vadd.f32 %v5565_v30, %v5063_v1  ;;  %v2267_v3 = vpop.f32.mrb[19].mxu1  ;;  %v2962_v30 = vld [vmem:[#allocation6 + $0x30] sm:$0xff] }
 0x6cf   :  { %v2283_v5 = vadd.f32 %v5063_v1, %v2267_v3 }
 0x6d0   :  { %v2286_v21 = vmax.f32 %v2284_v40, 0.0  ;;  %v2963_v40 = vld [vmem:[#allocation6 + $0x38] sm:$0xff] }
 0x6d1   :  { %v2285_v25 = vmax.f32 %v2283_v5, 0.0 }
 0x6d3   :  { %5574 = vmatprep.mubr.msk.f32.mxu0 %vm1554_vm4, %v2285_v25  ;;  %v2763_v25 = vmul.f32 %v5090_v20, %v7005_v62 }
 0x6d4   :  { %5575 = vmatmul.mubr.msk.f32.vlgmr.msra.gmra.mrb[14].mxu0 %vm1554_vm4, %v2286_v21 }
 0x6d5   :  { %5973 = vmatpush3.bf16.msra.mxu0 %v5970_v13  ;;  %v5598_v27 = vpop.f32.mrb[20].mxu1  ;;  %5585 = vmatprep.mubr.msk.f32.mxu0 %vm1554_vm4, %v6928_v6  ;;  %v2762_v13 = vmul.f32 %v5090_v20, %v7002_v46 }
 0x6d6   :  { %v2585_v34 = vpop.f32.mrb[21].mxu1  ;;  %5975 = vmatprep.subr.bf16.mxu0 %v5974_v55 }
 0x6d7   :  { %v5987_v35 = vpack.c.bf16 %v5598_v27, %v2585_v34 }
 0x6d9   :  { %5977 = vmatpush3.bf16.msra.mxu0 %v5974_v55  ;;  %v6006_v55 = vpack.c.bf16 %v2963_v40, %v2962_v30 }
 0x6da   :  { %5986 = vmatprep.subr.bf16.mxu0 %v6325_v29 }
 0x6dc   :  { %5586 = vmatmul.mubr.msk.f32.vlgmr.msra.gmra.mrb[16].mxu0 %vm1554_vm4, %v6926_v2 }
 0x6dd   :  { %5988 = vmatpush3.bf16.msra.mxu0 %v5987_v35  ;;  %5603 = vmatprep.mubr.msk.f32.mxu0 %vm6326_vm7, %v6327_v53 }
 0x6de   :  { %5992 = vmatprep.subr.bf16.mxu0 %v6325_v29 }
 0x6e0   :  { %5604 = vmatmul.mubr.msk.f32.vlgmr.msra.gmra.mrb[18].mxu0 %vm650_vm10, %v6978_v32 }
 0x6e1   :  { %5606 = vmatprep.mubr.msk.f32.mxu0 %vm6326_vm7, %v6327_v53  ;;  %5994 = vmatpush3.bf16.msra.mxu0 %v5993_v48 }
 0x6e2   :  { %5995 = vmatprep.subr.bf16.mxu0 %v6325_v29 }
 0x6e4   :  { %5607 = vmatmul.mubr.msk.f32.gmra.mrb[20].mxu0 %vm650_vm10, %v6986_v16 }
 0x6e5   :  { %5609 = vmatprep.mubr.msk.f32.mxu0 %vm6326_vm7, %v6327_v53  ;;  %5997 = vmatpush3.bf16.msra.mxu0 %v5996_v61 }
 0x6e6   :  { %6003 = vmatprep.subr.bf16.mxu0 %v6002_v38 }
 0x6e8   :  { %5610 = vmatmul.mubr.msk.f32.gmra.mrb[22].mxu0 %vm650_vm10, %v6994_v33 }
 0x6e9   :  { %5633 = vmatprep.mubr.msk.f32.mxu0 %vm6326_vm7, %v6327_v53 }
 0x7a7   :  { %v5576_v37 = vpop.f32.mrb[14].mxu0 }
 0x7a8   :  { %v7101_v41 = vadd.f32 %v5576_v37, %v5064_v36  ;;  %v2370_v10 = vpop.f32.mrb[15].mxu0  ;;  %v2764_v37 = vmul.f32 %v5090_v20, %v7008_v31 }
 0x7a9   :  { %v7103_v17 = vadd.f32 %v5064_v36, %v2370_v10 }
 0x7aa   :  { %v2382_v12 = vsel %vm1554_vm4, %v7101_v41, 0.0 }
 0x7ab   :  { %2383 = vadd.xlane.f32.xlu0 %v2382_v12  ;;  %v2379_v26 = vsel %vm1554_vm4, %v7103_v17, 0.0 }
 0x7ac   :  { %2380 = vadd.xlane.f32.xlu1 %v2379_v26 }
 0x7af   :  { %v5587_v54 = vpop.f32.mrb[16].mxu0 }
 0x7b0   :  { %v2511_v44 = vadd.f32 %v5587_v54, %v5074_v51  ;;  %v2505_v8 = vpop.f32.mrb[17].mxu0 }
 0x7b1   :  { %v2506_v45 = vadd.f32 %v5074_v51, %v2505_v8  ;;  %v5035_v51 = vld [vmem:[%s7544_s18] ss:$0 sm:$0xff]  ;;  %v2956_v8 = vld [vmem:[#allocation4 + $0x28] sm:$0xff] }
 0x7b2   :  { %vm1526_vm12 = vcmp.eq.s32.totalorder %v5035_v51, %v6540_v7  ;;  %v5092_v7 = vld [vmem:[%s7508_s14 + $0x1] ss:$0 sm:$0xff]  ;;  %vm1527_vm11 = vcmp.eq.s32.totalorder %v5035_v51, %v6545_v9 }
 0x7b3   :  { %v5990_v42 = vpack.c.bf16 %v2511_v44, %v2506_v45  ;;  %v2660_v15 = vpop.f32.mrb[18].mxu0  ;;  %v7145_v54 = vsel %vm1526_vm12, 1.0, %v6327_v53  ;;  %v2955_v44 = vld [vmem:[#allocation4 + $0x20] sm:$0xff]  ;;  %v2957_v45 = vld [vmem:[#allocation4 + $0x30] sm:$0xff]  ;;  %v7154_v0 = vsel %vm1527_vm11, 1.0, %v6327_v53 }
 0x7b4   :  { %v5605_v49 = vpop.f32.mrb[19].mxu0  ;;  %v3133_v9 = vld [vmem:[#allocation7 + $0x20] sm:$0xff] }
 0x7b5   :  { %5991 = vmatpush3.bf16.msra.mxu1 %v5990_v42  ;;  %v6010_v42 = vpack.c.bf16 %v2956_v8, %v2955_v44 }
 0x7b7   :  { %v2665_v52 = vpop.f32.mrb[20].mxu0 }
 0x7b8   :  { %v5608_v43 = vpop.f32.mrb[21].mxu0  ;;  %5617 = vmatmul.mubr.msk.f32.vlgmr.msra.gmra.mrb[22].mxu1 %vm650_vm10, %v6951_v22 }
 0x7b9   :  { %5619 = vmatprep.mubr.msk.f32.mxu1 %vm6326_vm7, %v6327_v53 }
 0x7bb   :  { %v2670_v56 = vpop.f32.mrb[22].mxu0 }
 0x7bc   :  { %v5611_v47 = vpop.f32.mrb[23].mxu0  ;;  %5620 = vmatmul.mubr.msk.f32.gmra.mrb[24].mxu1 %vm650_vm10, %v6959_v57 }
 0x7bd   :  { %5622 = vmatprep.mubr.msk.f32.mxu1 %vm6326_vm7, %v6327_v53 }
 0x7c0   :  { %5623 = vmatmul.mubr.msk.f32.gmra.mrb[26].mxu1 %vm650_vm10, %v6967_v39 }
 0x7c1   :  { %5648 = vmatprep.mubr.msk.f32.mxu1 %vm2030_vm6, %v7145_v54 }
 0x88b   :  { %v2740_v59 = vpop.f32.mrb[22].mxu1 }
 0x88c   :  { %v2741_v63 = vadd.f32 %v2740_v59, %v2660_v15  ;;  %v5618_v1 = vpop.f32.mrb[23].mxu1  ;;  %v2958_v15 = vld [vmem:[#allocation4 + $0x38] sm:$0xff]  ;;  %v3134_v59 = vld [vmem:[#allocation7 + $0x28] sm:$0xff] }
 0x88d   :  { %v6014_v49 = vpack.c.bf16 %v2958_v15, %v2957_v45  ;;  %v5123_v1 = vld [vmem:[%s7506_s12 + $0x58] sm:$0xff]  ;;  %v5105_v15 = vld [vmem:[%s7513_s19 + $0x1] ss:$0 sm:$0xff] }
 0x88e   :  { %v2765_v3 = vadd.f32 %v2762_v13, %v2741_v63  ;;  %v6018_v63 = vpack.c.bf16 %v3134_v59, %v3133_v9  ;;  %v5122_v13 = vld [vmem:[%s7506_s12 + $0x50] sm:$0xff] }
 0x88f   :  { %v2745_v5 = vpop.f32.mrb[24].mxu1 }
 0x890   :  { %v2768_v18 = vmax.f32 %v2765_v3, 0.0  ;;  %v2746_v23 = vadd.f32 %v2745_v5, %v2665_v52  ;;  %v5621_v21 = vpop.f32.mrb[25].mxu1  ;;  %v6038_v3 = vpack.c.bf16 %v5123_v1, %v5122_v13  ;;  %v3135_v5 = vld [vmem:[#allocation7 + $0x30] sm:$0xff]  ;;  %v3620_v13 = vld [vmem:[#allocation2 + $0x40] sm:$0xff]  ;;  %v3621_v1 = vld [vmem:[#allocation2 + $0x48] sm:$0xff] }
 0x891   :  { %v5113_v21 = vld [vmem:[%s7503_s9 + $0x48] sm:$0xff] }
 0x892   :  { %v2766_v27 = vadd.f32 %v2763_v25, %v2746_v23  ;;  %5634 = vmatmul.mubr.msk.f32.vlgmr.msra.gmra.mrb[24].mxu0 %vm1554_vm4, %v2768_v18  ;;  %v3136_v18 = vld [vmem:[#allocation7 + $0x38] sm:$0xff]  ;;  %v5112_v25 = vld [vmem:[%s7503_s9 + $0x40] sm:$0xff] }
 0x893   :  { %v2750_v34 = vpop.f32.mrb[26].mxu1  ;;  %5636 = vmatprep.mubr.msk.f32.mxu0 %vm6326_vm7, %v6327_v53  ;;  %6005 = vmatpush3.bf16.msra.mxu0 %v6002_v38  ;;  %v5121_v38 = vld [vmem:[%s7506_s12 + $0x48] sm:$0xff]  ;;  %v6022_v23 = vpack.c.bf16 %v3136_v18, %v3135_v5  ;;  %v3802_v18 = vld [vmem:[#allocation6 + $0x40] sm:$0xff] }
 0x894   :  { %v2769_v35 = vmax.f32 %v2766_v27, 0.0  ;;  %v2751_v36 = vadd.f32 %v2750_v34, %v2670_v56  ;;  %v5624_v10 = vpop.f32.mrb[27].mxu1  ;;  %6007 = vmatprep.subr.bf16.mxu0 %v6006_v55  ;;  %v6034_v20 = vpack.c.bf16 %v5121_v38, %v5120_v50  ;;  %v5103_v27 = vld [vmem:[%s7511_s17 + $0x1] ss:$0 sm:$0xff] }
 0x895   :  { %v5114_v10 = vld [vmem:[%s7503_s9 + $0x50] sm:$0xff] }
 0x896   :  { %v2767_v12 = vadd.f32 %v2764_v37, %v2751_v36  ;;  %5637 = vmatmul.mubr.msk.f32.gmra.mrb[26].mxu0 %vm1554_vm4, %v2769_v35 }
 0x897   :  { %5639 = vmatprep.mubr.msk.f32.mxu0 %vm6326_vm7, %v6327_v53  ;;  %6009 = vmatpush3.bf16.msra.mxu0 %v6006_v55  ;;  %v6026_v55 = vpack.c.bf16 %v5113_v21, %v5112_v25  ;;  %v5133_v21 = vld [vmem:[%s7505_s11 + $0x2] ss:$0 sm:$0xff] }
 0x898   :  { %v2770_v26 = vmax.f32 %v2767_v12, 0.0  ;;  %6011 = vmatprep.subr.bf16.mxu0 %v6010_v42  ;;  %v5115_v12 = vld [vmem:[%s7503_s9 + $0x58] sm:$0xff] }
 0x899   :  { %v6030_v44 = vpack.c.bf16 %v5115_v12, %v5114_v10 }
 0x89a   :  { %5640 = vmatmul.mubr.msk.f32.gmra.mrb[28].mxu0 %vm1554_vm4, %v2770_v26 }
 0x89b   :  { %5659 = vmatprep.mubr.msk.f32.mxu0 %vm1554_vm4, %v6928_v6 }
 0x89e   :  { %5660 = vmatmul.mubr.msk.f32.vlgmr.msra.gmra.mrb[30].mxu0 %vm1554_vm4, %v6926_v2 }
 0x89f   :  { %6013 = vmatpush3.bf16.msra.mxu0 %v6010_v42 }
 0x8a0   :  { %6015 = vmatprep.subr.bf16.mxu0 %v6014_v49 }
 0x8a3   :  { %6017 = vmatpush3.bf16.msra.mxu0 %v6014_v49 }
 0x8a4   :  { %6035 = vmatprep.subr.bf16.mxu0 %v6034_v20 }
 0x965   :  { %v2859_v52 = vpop.f32.mrb[24].mxu0 }
 0x966   :  { %v5635_v43 = vpop.f32.mrb[25].mxu0  ;;  %v2860_v47 = vadd.f32 %v5092_v7, %v2859_v52 }
 0x969   :  { %v2864_v56 = vpop.f32.mrb[26].mxu0 }
 0x96a   :  { %v2865_v58 = vadd.f32 %v5092_v7, %v2864_v56  ;;  %v5638_v14 = vpop.f32.mrb[27].mxu0 }
 0x96c   :  { %v5998_v48 = vpack.c.bf16 %v2865_v58, %v2860_v47  ;;  %v5117_v58 = vld [vmem:[%s7504_s10 + $0x2] ss:$0 sm:$0xff] }
 0x96d   :  { %v2869_v19 = vpop.f32.mrb[28].mxu0 }
 0x96e   :  { %v2870_v60 = vadd.f32 %v5092_v7, %v2869_v19  ;;  %v5641_v61 = vpop.f32.mrb[29].mxu0  ;;  %5999 = vmatprep.subr.bf16.mxu1 %v5998_v48 }
 0x96f   :  { %6001 = vmatpush3.bf16.msra.mxu1 %v5998_v48 }
 0x970   :  { %5646 = vmatprep.subr.mxu1 %v2870_v60 }
 0x973   :  { %5647 = vmatpush3.msra.mxu1 %v2870_v60 }
 0x974   :  { %5649 = vmatmul.mubr.msk.f32.vlgmr.msra.gmra.mrb[28].mxu1 %vm2030_vm6, %v7154_v0  ;;  %6019 = vmatprep.subr.bf16.mxu1 %v6018_v63 }
 0x975   :  { %6021 = vmatpush3.bf16.msra.mxu1 %v6018_v63 }
 0x976   :  { %6023 = vmatprep.subr.bf16.mxu1 %v6022_v23 }
 0x979   :  { %6025 = vmatpush3.bf16.msra.mxu1 %v6022_v23  ;;  %v3803_v23 = vld [vmem:[#allocation6 + $0x48] sm:$0xff] }
 0x97a   :  { %6027 = vmatprep.subr.bf16.mxu1 %v6026_v55  ;;  %v6058_v25 = vpack.c.bf16 %v3803_v23, %v3802_v18  ;;  %v5165_v18 = vld [vmem:[%s7506_s12 + $0x60] sm:$0xff]  ;;  %v5166_v23 = vld [vmem:[%s7506_s12 + $0x68] sm:$0xff] }
 0xa47   :  { %v5650_v30 = vpop.f32.mrb[28].mxu1 }
 0xa48   :  { %v2945_v40 = vpop.f32.mrb[29].mxu1 }
 0xa49   :  { %5670 = vmatprep.mubr.msk.f32.mxu0 %vm1554_vm4, %v2945_v40  ;;  %v3622_v40 = vld [vmem:[#allocation2 + $0x50] sm:$0xff] }
 0xa4a   :  { %5671 = vmatmul.mubr.msk.f32.vlgmr.msra.gmra.mrb[30].mxu0 %vm1554_vm4, %v5650_v30  ;;  %v6049_v30 = vpack.c.bf16 %v3621_v1, %v3620_v13 }
 0xa4b   :  { %6037 = vmatpush3.bf16.msra.mxu0 %v6034_v20  ;;  %5703 = vmatprep.mubr.msk.f32.mxu0 %vm1554_vm4, %v6928_v6 }
 0xa4c   :  { %6039 = vmatprep.subr.bf16.mxu0 %v6038_v3 }
 0xa4f   :  { %6041 = vmatpush3.bf16.msra.mxu0 %v6038_v3  ;;  %v3623_v3 = vld [vmem:[#allocation2 + $0x58] sm:$0xff] }
 0xa50   :  { %6045 = vmatprep.subr.bf16.mxu0 %v6325_v29  ;;  %v6052_v5 = vpack.c.bf16 %v3623_v3, %v3622_v40 }
 0xa52   :  { %5704 = vmatmul.mubr.msk.f32.vlgmr.msra.gmra.mrb[32].mxu0 %vm1554_vm4, %v6926_v2 }
 0xa53   :  { %5723 = vmatprep.mubr.msk.f32.mxu0 %vm6326_vm7, %v6327_v53 }
 0xb1d   :  { %v5672_v34 = vpop.f32.mrb[30].mxu0 }
 0xb1e   :  { %v3129_v35 = vadd.f32 %v5672_v34, %v5103_v27  ;;  %v3111_v36 = vpop.f32.mrb[31].mxu0 }
 0xb1f   :  { %v3128_v37 = vadd.f32 %v5103_v27, %v3111_v36  ;;  %v3610_v27 = vmul.f32 %v5133_v21, %v7002_v46  ;;  %v3805_v36 = vld [vmem:[#allocation6 + $0x58] sm:$0xff] }
 0xb20   :  { %v3131_v51 = vmax.f32 %v3129_v35, 0.0  ;;  %v3804_v35 = vld [vmem:[#allocation6 + $0x50] sm:$0xff] }
 0xb21   :  { %v3130_v26 = vmax.f32 %v3128_v37, 0.0 }
 0xb23   :  { %5681 = vmatprep.mubr.msk.f32.mxu1 %vm1554_vm4, %v3130_v26 }
 0xb24   :  { %5682 = vmatmul.mubr.msk.f32.vlgmr.msra.gmra.mrb[30].mxu1 %vm1554_vm4, %v3131_v51  ;;  %v3611_v51 = vmul.f32 %v5133_v21, %v7005_v62 }
 0xb25   :  { %6029 = vmatpush3.bf16.msra.mxu1 %v6026_v55  ;;  %v5705_v8 = vpop.f32.mrb[32].mxu0  ;;  %5692 = vmatprep.mubr.msk.f32.mxu1 %vm1554_vm4, %v6936_v24 }
 0xb26   :  { %v3433_v45 = vpop.f32.mrb[33].mxu0  ;;  %6031 = vmatprep.subr.bf16.mxu1 %v6030_v44 }
 0xb27   :  { %v6043_v42 = vpack.c.bf16 %v5705_v8, %v3433_v45  ;;  %v6062_v8 = vpack.c.bf16 %v3805_v36, %v3804_v35 }
 0xb29   :  { %6033 = vmatpush3.bf16.msra.mxu1 %v6030_v44 }
 0xb2a   :  { %6042 = vmatprep.subr.bf16.mxu1 %v6325_v29 }
 0xb2c   :  { %5693 = vmatmul.mubr.msk.f32.vlgmr.msra.gmra.mrb[32].mxu1 %vm1554_vm4, %v6934_v11 }
 0xb2d   :  { %6044 = vmatpush3.bf16.msra.mxu1 %v6043_v42  ;;  %5710 = vmatprep.mubr.msk.f32.mxu1 %vm6326_vm7, %v6327_v53 }
 0xb2e   :  { %6048 = vmatprep.subr.bf16.mxu1 %v6325_v29 }
 0xb30   :  { %5711 = vmatmul.mubr.msk.f32.vlgmr.msra.gmra.mrb[34].mxu1 %vm650_vm10, %v6951_v22 }
 0xb31   :  { %5713 = vmatprep.mubr.msk.f32.mxu1 %vm6326_vm7, %v6327_v53  ;;  %6050 = vmatpush3.bf16.msra.mxu1 %v6049_v30 }
 0xb32   :  { %6051 = vmatprep.subr.bf16.mxu1 %v6325_v29 }
 0xb34   :  { %5714 = vmatmul.mubr.msk.f32.gmra.mrb[36].mxu1 %vm650_vm10, %v6959_v57 }
 0xb35   :  { %5716 = vmatprep.mubr.msk.f32.mxu1 %vm6326_vm7, %v6327_v53  ;;  %6053 = vmatpush3.bf16.msra.mxu1 %v6052_v5 }
 0xb36   :  { %6059 = vmatprep.subr.bf16.mxu1 %v6058_v25 }
 0xb38   :  { %5717 = vmatmul.mubr.msk.f32.gmra.mrb[38].mxu1 %vm650_vm10, %v6967_v39 }
 0xb39   :  { %5740 = vmatprep.mubr.msk.f32.mxu1 %vm6326_vm7, %v6327_v53 }
 0xbf7   :  { %v5683_v49 = vpop.f32.mrb[30].mxu1 }
 0xbf8   :  { %v7219_v52 = vadd.f32 %v5683_v49, %v5105_v15  ;;  %v3217_v43 = vpop.f32.mrb[31].mxu1 }
 0xbf9   :  { %v7221_v7 = vadd.f32 %v5105_v15, %v3217_v43  ;;  %v3612_v43 = vmul.f32 %v5133_v21, %v7008_v31  ;;  %v3975_v21 = vld [vmem:[#allocation7 + $0x40] sm:$0xff] }
 0xbfa   :  { %v3229_v56 = vsel %vm1554_vm4, %v7219_v52, 0.0 }
 0xbfb   :  { %3230 = vadd.xlane.f32.xlu1 %v3229_v56  ;;  %v3226_v47 = vsel %vm1554_vm4, %v7221_v7, 0.0 }
 0xbfc   :  { %3227 = vadd.xlane.f32.xlu0 %v3226_v47 }
 0xbff   :  { %v5694_v14 = vpop.f32.mrb[32].mxu1 }
 0xc00   :  { %v3359_v48 = vadd.f32 %v5694_v14, %v5117_v58  ;;  %v3353_v19 = vpop.f32.mrb[33].mxu1  ;;  %v3797_v14 = vld [vmem:[#allocation4 + $0x40] sm:$0xff] }
 0xc01   :  { %v3354_v60 = vadd.f32 %v5117_v58, %v3353_v19  ;;  %v3799_v19 = vld [vmem:[#allocation4 + $0x50] sm:$0xff] }
 0xc03   :  { %v6046_v61 = vpack.c.bf16 %v3359_v48, %v3354_v60  ;;  %v3508_v50 = vpop.f32.mrb[34].mxu1  ;;  %v3798_v48 = vld [vmem:[#allocation4 + $0x48] sm:$0xff] }
 0xc04   :  { %v5712_v38 = vpop.f32.mrb[35].mxu1  ;;  %v6066_v60 = vpack.c.bf16 %v3798_v48, %v3797_v14 }
 0xc05   :  { %6047 = vmatpush3.bf16.msra.mxu0 %v6046_v61  ;;  %v3800_v61 = vld [vmem:[#allocation4 + $0x58] sm:$0xff] }
 0xc07   :  { %v3513_v20 = vpop.f32.mrb[36].mxu1 }
 0xc08   :  { %v5715_v9 = vpop.f32.mrb[37].mxu1  ;;  %5724 = vmatmul.mubr.msk.f32.vlgmr.msra.gmra.mrb[34].mxu0 %vm650_vm10, %v6978_v32 }
 0xc09   :  { %5726 = vmatprep.mubr.msk.f32.mxu0 %vm6326_vm7, %v6327_v53  ;;  %v5135_v9 = vld [vmem:[%s7508_s14 + $0x2] ss:$0 sm:$0xff] }
 0xc0b   :  { %v3518_v59 = vpop.f32.mrb[38].mxu1 }
 0xc0c   :  { %v5718_v63 = vpop.f32.mrb[39].mxu1  ;;  %5727 = vmatmul.mubr.msk.f32.gmra.mrb[36].mxu0 %vm650_vm10, %v6986_v16 }
 0xc0d   :  { %5729 = vmatprep.mubr.msk.f32.mxu0 %vm6326_vm7, %v6327_v53 }
 0xc10   :  { %5730 = vmatmul.mubr.msk.f32.gmra.mrb[38].mxu0 %vm650_vm10, %v6994_v33 }
 0xc11   :  { %5755 = vmatprep.mubr.msk.f32.mxu0 %vm2030_vm6, %v7027_v28 }
 0xcdb   :  { %v3588_v55 = vpop.f32.mrb[34].mxu0 }
 0xcdc   :  { %v3589_v28 = vadd.f32 %v3588_v55, %v3508_v50  ;;  %v5725_v34 = vpop.f32.mrb[35].mxu0  ;;  %v6070_v50 = vpack.c.bf16 %v3800_v61, %v3799_v19  ;;  %v3976_v55 = vld [vmem:[#allocation7 + $0x48] sm:$0xff]  ;;  %v5148_v19 = vld [vmem:[%s7513_s19 + $0x2] ss:$0 sm:$0xff] }
 0xcde   :  { %v3613_v37 = vadd.f32 %v3610_v27, %v3589_v28  ;;  %v6074_v28 = vpack.c.bf16 %v3976_v55, %v3975_v21  ;;  %v5167_v27 = vld [vmem:[%s7506_s12 + $0x70] sm:$0xff]  ;;  %v4466_v55 = vld [vmem:[#allocation2 + $0x78] sm:$0xff] }
 0xcdf   :  { %v3593_v10 = vpop.f32.mrb[36].mxu0  ;;  %v4465_v21 = vld [vmem:[#allocation2 + $0x70] sm:$0xff] }
 0xce0   :  { %v3616_v12 = vmax.f32 %v3613_v37, 0.0  ;;  %v3594_v26 = vadd.f32 %v3593_v10, %v3513_v20  ;;  %v5728_v44 = vpop.f32.mrb[37].mxu0  ;;  %v3977_v37 = vld [vmem:[#allocation7 + $0x50] sm:$0xff]  ;;  %v3978_v10 = vld [vmem:[#allocation7 + $0x58] sm:$0xff] }
 0xce2   :  { %v3614_v45 = vadd.f32 %v3611_v51, %v3594_v26  ;;  %5741 = vmatmul.mubr.msk.f32.vlgmr.msra.gmra.mrb[40].mxu1 %vm1554_vm4, %v3616_v12  ;;  %v6078_v12 = vpack.c.bf16 %v3978_v10, %v3977_v37  ;;  %v5157_v26 = vld [vmem:[%s7503_s9 + $0x60] sm:$0xff]  ;;  %v4647_v37 = vld [vmem:[#allocation6 + $0x70] sm:$0xff]  ;;  %v4648_v10 = vld [vmem:[#allocation6 + $0x78] sm:$0xff] }
 0xce3   :  { %v3598_v42 = vpop.f32.mrb[38].mxu0  ;;  %5743 = vmatprep.mubr.msk.f32.mxu1 %vm6326_vm7, %v6327_v53  ;;  %6061 = vmatpush3.bf16.msra.mxu1 %v6058_v25  ;;  %v6090_v25 = vpack.c.bf16 %v5166_v23, %v5165_v18  ;;  %v4463_v23 = vld [vmem:[#allocation2 + $0x60] sm:$0xff] }
 0xce4   :  { %v3617_v15 = vmax.f32 %v3614_v45, 0.0  ;;  %v3599_v49 = vadd.f32 %v3598_v42, %v3518_v59  ;;  %v5731_v56 = vpop.f32.mrb[39].mxu0  ;;  %6063 = vmatprep.subr.bf16.mxu1 %v6062_v8 }
 0xce6   :  { %v3615_v47 = vadd.f32 %v3612_v43, %v3599_v49  ;;  %5744 = vmatmul.mubr.msk.f32.gmra.mrb[42].mxu1 %vm1554_vm4, %v3617_v15  ;;  %v5159_v15 = vld [vmem:[%s7503_s9 + $0x70] sm:$0xff]  ;;  %v5160_v49 = vld [vmem:[%s7503_s9 + $0x78] sm:$0xff] }
 0xce7   :  { %5746 = vmatprep.mubr.msk.f32.mxu1 %vm6326_vm7, %v6327_v53  ;;  %6065 = vmatpush3.bf16.msra.mxu1 %v6062_v8 }
 0xce8   :  { %v3618_v58 = vmax.f32 %v3615_v47, 0.0  ;;  %6067 = vmatprep.subr.bf16.mxu1 %v6066_v60  ;;  %v6086_v47 = vpack.c.bf16 %v5160_v49, %v5159_v15 }
 0xcea   :  { %5747 = vmatmul.mubr.msk.f32.gmra.mrb[44].mxu1 %vm1554_vm4, %v3618_v58 }
 0xceb   :  { %5766 = vmatprep.mubr.msk.f32.mxu1 %vm1554_vm4, %v6936_v24 }
 0xcee   :  { %5767 = vmatmul.mubr.msk.f32.vlgmr.msra.gmra.mrb[46].mxu1 %vm1554_vm4, %v6934_v11 }
 0xcef   :  { %6069 = vmatpush3.bf16.msra.mxu1 %v6066_v60 }
 0xcf0   :  { %6071 = vmatprep.subr.bf16.mxu1 %v6070_v50 }
 0xcf3   :  { %6073 = vmatpush3.bf16.msra.mxu1 %v6070_v50 }
 0xcf4   :  { %6091 = vmatprep.subr.bf16.mxu1 %v6090_v25 }
 0xdb5   :  { %v3707_v38 = vpop.f32.mrb[40].mxu1 }
 0xdb6   :  { %v5742_v20 = vpop.f32.mrb[41].mxu1  ;;  %v3708_v63 = vadd.f32 %v5135_v9, %v3707_v38  ;;  %v5162_v38 = vld [vmem:[%s7504_s10 + $0x3] ss:$0 sm:$0xff] }
 0xdb9   :  { %v3712_v59 = vpop.f32.mrb[42].mxu1 }
 0xdba   :  { %v3713_v13 = vadd.f32 %v5135_v9, %v3712_v59  ;;  %v5745_v1 = vpop.f32.mrb[43].mxu1 }
 0xdbc   :  { %v6054_v30 = vpack.c.bf16 %v3713_v13, %v3708_v63 }
 0xdbd   :  { %v3717_v40 = vpop.f32.mrb[44].mxu1 }
 0xdbe   :  { %v3718_v3 = vadd.f32 %v5135_v9, %v3717_v40  ;;  %v5748_v5 = vpop.f32.mrb[45].mxu1  ;;  %6055 = vmatprep.subr.bf16.mxu0 %v6054_v30 }
 0xdbf   :  { %6057 = vmatpush3.bf16.msra.mxu0 %v6054_v30 }
 0xdc0   :  { %5753 = vmatprep.subr.mxu0 %v3718_v3 }
 0xdc3   :  { %5754 = vmatpush3.msra.mxu0 %v3718_v3 }
 0xdc4   :  { %5756 = vmatmul.mubr.msk.f32.vlgmr.msra.gmra.mrb[40].mxu0 %vm2030_vm6, %v7036_v4  ;;  %6075 = vmatprep.subr.bf16.mxu0 %v6074_v28  ;;  %v5168_v4 = vld [vmem:[%s7506_s12 + $0x78] sm:$0xff] }
 0xdc5   :  { %6077 = vmatpush3.bf16.msra.mxu0 %v6074_v28  ;;  %v6094_v36 = vpack.c.bf16 %v5168_v4, %v5167_v27  ;;  %v6108_v28 = vpack.c.bf16 %v4466_v55, %v4465_v21  ;;  %v4646_v27 = vld [vmem:[#allocation6 + $0x68] sm:$0xff] }
 0xdc6   :  { %6079 = vmatprep.subr.bf16.mxu0 %v6078_v12 }
 0xdc9   :  { %6081 = vmatpush3.bf16.msra.mxu0 %v6078_v12 }
 0xe97   :  { %v5757_v34 = vpop.f32.mrb[40].mxu0 }
 0xe98   :  { %v3787_v35 = vpop.f32.mrb[41].mxu0 }
 0xe99   :  { %5777 = vmatprep.mubr.msk.f32.mxu1 %vm1554_vm4, %v3787_v35 }
 0xe9a   :  { %5778 = vmatmul.mubr.msk.f32.vlgmr.msra.gmra.mrb[46].mxu1 %vm1554_vm4, %v5757_v34 }
 0xe9b   :  { %6093 = vmatpush3.bf16.msra.mxu1 %v6090_v25  ;;  %5810 = vmatprep.mubr.msk.f32.mxu1 %vm1554_vm4, %v6936_v24  ;;  %v5158_v24 = vld [vmem:[%s7503_s9 + $0x68] sm:$0xff] }
 0xe9c   :  { %6095 = vmatprep.subr.bf16.mxu1 %v6094_v36  ;;  %v6082_v51 = vpack.c.bf16 %v5158_v24, %v5157_v26  ;;  %v4464_v25 = vld [vmem:[#allocation2 + $0x68] sm:$0xff] }
 0xe9e   :  { %6083 = vmatprep.subr.bf16.mxu0 %v6082_v51 }
 0xe9f   :  { %6097 = vmatpush3.bf16.msra.mxu1 %v6094_v36 }
 0xea0   :  { %6101 = vmatprep.subr.bf16.mxu1 %v6325_v29 }
 0xea2   :  { %5811 = vmatmul.mubr.msk.f32.vlgmr.msra.gmra.mrb[48].mxu1 %vm1554_vm4, %v6934_v11  ;;  %v5146_v11 = vld [vmem:[%s7511_s17 + $0x2] ss:$0 sm:$0xff] }
 0xea3   :  { %5830 = vmatprep.mubr.msk.f32.mxu1 %vm6326_vm7, %v6327_v53 }
 0xf6d   :  { %v5779_v44 = vpop.f32.mrb[46].mxu1 }
 0xf6e   :  { %v3971_v8 = vadd.f32 %v5779_v44, %v5146_v11  ;;  %v3953_v45 = vpop.f32.mrb[47].mxu1  ;;  %v6118_v44 = vpack.c.bf16 %v4648_v10, %v4647_v37 }
 0xf6f   :  { %v3970_v42 = vadd.f32 %v5146_v11, %v3953_v45 }
 0xf70   :  { %v3973_v56 = vmax.f32 %v3971_v8, 0.0 }
 0xf71   :  { %v3972_v43 = vmax.f32 %v3970_v42, 0.0 }
 0xf73   :  { %5788 = vmatprep.mubr.msk.f32.mxu0 %vm1554_vm4, %v3972_v43 }
 0xf74   :  { %5789 = vmatmul.mubr.msk.f32.vlgmr.msra.gmra.mrb[42].mxu0 %vm1554_vm4, %v3973_v56  ;;  %v4640_v56 = vld [vmem:[#allocation4 + $0x60] sm:$0xff] }
 0xf75   :  { %6085 = vmatpush3.bf16.msra.mxu0 %v6082_v51  ;;  %v5812_v58 = vpop.f32.mrb[48].mxu1  ;;  %5799 = vmatprep.mubr.msk.f32.mxu0 %vm1554_vm4, %v6928_v6 }
 0xf76   :  { %v4276_v14 = vpop.f32.mrb[49].mxu1  ;;  %6087 = vmatprep.subr.bf16.mxu0 %v6086_v47 }
 0xf77   :  { %v6099_v48 = vpack.c.bf16 %v5812_v58, %v4276_v14  ;;  %v4643_v14 = vld [vmem:[#allocation4 + $0x78] sm:$0xff] }
 0xf79   :  { %6089 = vmatpush3.bf16.msra.mxu0 %v6086_v47  ;;  %v4642_v47 = vld [vmem:[#allocation4 + $0x70] sm:$0xff] }
 0xf7a   :  { %6098 = vmatprep.subr.bf16.mxu0 %v6325_v29 }
 0xf7c   :  { %5800 = vmatmul.mubr.msk.f32.vlgmr.msra.gmra.mrb[44].mxu0 %vm1554_vm4, %v6926_v2 }
 0xf7d   :  { %6100 = vmatpush3.bf16.msra.mxu0 %v6099_v48  ;;  %5817 = vmatprep.mubr.msk.f32.mxu0 %vm6326_vm7, %v6327_v53  ;;  %v6126_v48 = vpack.c.bf16 %v4643_v14, %v4642_v47 }
 0xf7e   :  { %6104 = vmatprep.subr.bf16.mxu0 %v6325_v29 }
 0xf80   :  { %5818 = vmatmul.mubr.msk.f32.vlgmr.msra.gmra.mrb[46].mxu0 %vm650_vm10, %v6978_v32 }
 0xf81   :  { %5820 = vmatprep.mubr.msk.f32.mxu0 %vm6326_vm7, %v6327_v53 }
 0xf84   :  { %5821 = vmatmul.mubr.msk.f32.gmra.mrb[48].mxu0 %vm650_vm10, %v6986_v16 }
 0xf85   :  { %5823 = vmatprep.mubr.msk.f32.mxu0 %vm6326_vm7, %v6327_v53 }
 0xf88   :  { %5824 = vmatmul.mubr.msk.f32.gmra.mrb[50].mxu0 %vm650_vm10, %v6994_v33 }
 0xf89   :  { %5847 = vmatprep.mubr.msk.f32.mxu0 %vm6326_vm7, %v6327_v53 }
0x1047   :  { %v5790_v32 = vpop.f32.mrb[42].mxu0 }
0x1048   :  { %v7326_v60 = vadd.f32 %v5790_v32, %v5148_v19  ;;  %v4059_v61 = vpop.f32.mrb[43].mxu0  ;;  %v5180_v32 = vld [vmem:[%s7508_s14 + $0x3] ss:$0 sm:$0xff] }
0x1049   :  { %v7328_v50 = vadd.f32 %v5148_v19, %v4059_v61 }
0x104a   :  { %v4071_v16 = vsel %vm1554_vm4, %v7326_v60, 0.0 }
0x104b   :  { %4072 = vadd.xlane.f32.xlu1 %v4071_v16  ;;  %v4068_v33 = vsel %vm1554_vm4, %v7328_v50, 0.0 }
0x104c   :  { %4069 = vadd.xlane.f32.xlu0 %v4068_v33 }
0x104f   :  { %v5801_v20 = vpop.f32.mrb[44].mxu0 }
0x1050   :  { %v4202_v9 = vadd.f32 %v5801_v20, %v5162_v38  ;;  %v4196_v59 = vpop.f32.mrb[45].mxu0 }
0x1051   :  { %v4197_v63 = vadd.f32 %v5162_v38, %v4196_v59  ;;  %v4818_v59 = vld [vmem:[#allocation7 + $0x60] sm:$0xff] }
0x1053   :  { %v6102_v13 = vpack.c.bf16 %v4202_v9, %v4197_v63  ;;  %v4351_v1 = vpop.f32.mrb[46].mxu0  ;;  %v4819_v63 = vld [vmem:[#allocation7 + $0x68] sm:$0xff] }
0x1054   :  { %v5819_v30 = vpop.f32.mrb[47].mxu0 }
0x1055   :  { %6103 = vmatpush3.bf16.msra.mxu1 %v6102_v13  ;;  %v6130_v13 = vpack.c.bf16 %v4819_v63, %v4818_v59 }
0x1057   :  { %v4356_v40 = vpop.f32.mrb[48].mxu0 }
0x1058   :  { %v5822_v3 = vpop.f32.mrb[49].mxu0  ;;  %5831 = vmatmul.mubr.msk.f32.vlgmr.msra.gmra.mrb[50].mxu1 %vm650_vm10, %v6951_v22  ;;  %v6105_v22 = vpack.c.bf16 %v4464_v25, %v4463_v23 }
0x1059   :  { %5833 = vmatprep.mubr.msk.f32.mxu1 %vm6326_vm7, %v6327_v53  ;;  %v4821_v3 = vld [vmem:[#allocation7 + $0x78] sm:$0xff] }
0x105a   :  { %6106 = vmatpush3.bf16.msra.mxu0 %v6105_v22 }
0x105b   :  { %v4361_v5 = vpop.f32.mrb[50].mxu0  ;;  %6107 = vmatprep.subr.bf16.mxu0 %v6325_v29 }
0x105c   :  { %v5825_v18 = vpop.f32.mrb[51].mxu0  ;;  %5834 = vmatmul.mubr.msk.f32.gmra.mrb[52].mxu1 %vm650_vm10, %v6959_v57  ;;  %v4645_v57 = vld [vmem:[#allocation6 + $0x60] sm:$0xff] }
0x105d   :  { %5836 = vmatprep.mubr.msk.f32.mxu1 %vm6326_vm7, %v6327_v53  ;;  %v6114_v4 = vpack.c.bf16 %v4646_v27, %v4645_v57  ;;  %v2381_v57 = vpop.xlane.xlu1 %2380 }
0x105e   :  { %6109 = vmatpush3.bf16.msra.mxu0 %v6108_v28  ;;  %v2384_v28 = vpop.xlane.xlu0 %2383 }
0x105f   :  { %6115 = vmatprep.subr.bf16.mxu0 %v6114_v4  ;;  %v2387_v27 = vmul.f32 0.03125, %v2384_v28 }
0x1060   :  { %5837 = vmatmul.mubr.msk.f32.gmra.mrb[54].mxu1 %vm650_vm10, %v6967_v39  ;;  %v5178_v39 = vld [vmem:[%s7505_s11 + $0x3] ss:$0 sm:$0xff] }
0x1061   :  { %5862 = vmatprep.mubr.msk.f32.mxu1 %vm2030_vm6, %v7145_v54  ;;  %v4453_v35 = vmul.f32 %v5178_v39, %v7002_v46  ;;  %v4454_v51 = vmul.f32 %v5178_v39, %v7005_v62  ;;  %v4455_v15 = vmul.f32 %v5178_v39, %v7008_v31  ;;  %v4641_v31 = vld [vmem:[#allocation4 + $0x68] sm:$0xff]  ;;  %v3231_v39 = vpop.xlane.xlu1 %3230 }
0x1062   :  { %v6122_v58 = vpack.c.bf16 %v4641_v31, %v4640_v56 }
0x112b   :  { %v4431_v34 = vpop.f32.mrb[50].mxu1 }
0x112c   :  { %v4432_v54 = vadd.f32 %v4431_v34, %v4351_v1  ;;  %v5832_v36 = vpop.f32.mrb[51].mxu1  ;;  %v3228_v34 = vpop.xlane.xlu0 %3227 }
0x112d   :  { %v3233_v36 = vmul.f32 0.03125, %v3231_v39  ;;  %v3232_v10 = vmul.f32 0.03125, %v3228_v34  ;;  %v5068_v34 = vld [vmem:[%s7515_s21] ss:$0 sm:$0xff] }
0x112e   :  { %v4456_v29 = vadd.f32 %v4453_v35, %v4432_v54  ;;  %v5193_v54 = vld [vmem:[%s7513_s19 + $0x3] ss:$0 sm:$0xff]  ;;  %v7383_v35 = vsub.f32 %v7101_v41, %v2387_v27  ;;  %v5067_v27 = vld [vmem:[%s7514_s20] ss:$0 sm:$0xff] }
0x112f   :  { %v4436_v12 = vpop.f32.mrb[52].mxu1 }
0x1130   :  { %v4459_v26 = vmax.f32 %v4456_v29, 0.0  ;;  %v4437_v24 = vadd.f32 %v4436_v12, %v4356_v40  ;;  %v5835_v11 = vpop.f32.mrb[53].mxu1  ;;  %v4820_v40 = vld [vmem:[#allocation7 + $0x70] sm:$0xff]  ;;  %v4073_v29 = vpop.xlane.xlu1 %4072  ;;  %v2391_v41 = vmul.f32 %v7383_v35, %v7383_v35 }
0x1132   :  { %v4457_v8 = vadd.f32 %v4454_v51, %v4437_v24  ;;  %5848 = vmatmul.mubr.msk.f32.vlgmr.msra.gmra.mrb[52].mxu0 %vm1554_vm4, %v4459_v26  ;;  %v4070_v26 = vpop.xlane.xlu0 %4069 }
0x1133   :  { %v4441_v45 = vpop.f32.mrb[54].mxu1  ;;  %5850 = vmatprep.mubr.msk.f32.mxu0 %vm6326_vm7, %v6327_v53  ;;  %6117 = vmatpush3.bf16.msra.mxu0 %v6114_v4  ;;  %v2386_v4 = vmul.f32 0.03125, %v2381_v57 }
0x1134   :  { %v4460_v46 = vmax.f32 %v4457_v8, 0.0  ;;  %v4442_v42 = vadd.f32 %v4441_v45, %v4361_v5  ;;  %v5838_v49 = vpop.f32.mrb[55].mxu1  ;;  %6119 = vmatprep.subr.bf16.mxu0 %v6118_v44  ;;  %v6134_v5 = vpack.c.bf16 %v4821_v3, %v4820_v40  ;;  %v4075_v8 = vmul.f32 0.03125, %v4073_v29 }
0x1135   :  { %v7386_v37 = vsub.f32 %v7103_v17, %v2386_v4  ;;  %v4074_v17 = vmul.f32 0.03125, %v4070_v26  ;;  %v2395_v49 = vsel %vm1554_vm4, %v2391_v41, 0.0  ;;  %v5152_v41 = vld [vmem:[%s7514_s20 + $0x2] ss:$0 sm:$0xff] }
0x1136   :  { %v4458_v43 = vadd.f32 %v4455_v15, %v4442_v42  ;;  %5851 = vmatmul.mubr.msk.f32.gmra.mrb[54].mxu0 %vm1554_vm4, %v4460_v46  ;;  %v7395_v46 = vsub.f32 %v7221_v7, %v3232_v10 }
0x1137   :  { %5853 = vmatprep.mubr.msk.f32.mxu0 %vm6326_vm7, %v6327_v53  ;;  %6121 = vmatpush3.bf16.msra.mxu0 %v6118_v44  ;;  %v7389_v44 = vsub.f32 %v7219_v52, %v3233_v36  ;;  %v2390_v15 = vmul.f32 %v7386_v37, %v7386_v37  ;;  %v7401_v52 = vsub.f32 %v7326_v60, %v4075_v8 }
0x1138   :  { %v4461_v62 = vmax.f32 %v4458_v43, 0.0  ;;  %6123 = vmatprep.subr.bf16.mxu0 %v6122_v58  ;;  %v3236_v56 = vmul.f32 %v7395_v46, %v7395_v46 }
0x1139   :  { %v3237_v43 = vmul.f32 %v7389_v44, %v7389_v44  ;;  %v2392_v7 = vsel %vm1554_vm4, %v2390_v15, 0.0  ;;  %v4079_v60 = vmul.f32 %v7401_v52, %v7401_v52 }
0x113a   :  { %5854 = vmatmul.mubr.msk.f32.gmra.mrb[56].mxu0 %vm1554_vm4, %v4461_v62  ;;  %v7407_v62 = vsub.f32 %v7328_v50, %v4074_v17  ;;  %v3238_v47 = vsel %vm1554_vm4, %v3236_v56, 0.0 }
0x113b   :  { %5873 = vmatprep.mubr.msk.f32.mxu0 %vm1554_vm4, %v6928_v6  ;;  %v3241_v31 = vsel %vm1554_vm4, %v3237_v43, 0.0  ;;  %v4083_v50 = vsel %vm1554_vm4, %v4079_v60, 0.0 }
0x113e   :  { %5874 = vmatmul.mubr.msk.f32.vlgmr.msra.gmra.mrb[58].mxu0 %vm1554_vm4, %v6926_v2 }
0x113f   :  { %6125 = vmatpush3.bf16.msra.mxu0 %v6122_v58  ;;  %v4078_v58 = vmul.f32 %v7407_v62, %v7407_v62 }
0x1140   :  { %6127 = vmatprep.subr.bf16.mxu0 %v6126_v48 }
0x1141   :  { %v4080_v14 = vsel %vm1554_vm4, %v4078_v58, 0.0 }
0x1143   :  { %6129 = vmatpush3.bf16.msra.mxu0 %v6126_v48 }
0x1205   :  { %v4550_v53 = vpop.f32.mrb[52].mxu0 }
0x1206   :  { %v5849_v19 = vpop.f32.mrb[53].mxu0  ;;  %v4551_v61 = vadd.f32 %v5180_v32, %v4550_v53 }
0x1209   :  { %v4555_v6 = vpop.f32.mrb[54].mxu0 }
0x120a   :  { %v4556_v16 = vadd.f32 %v5180_v32, %v4555_v6  ;;  %v5852_v2 = vpop.f32.mrb[55].mxu0 }
0x120c   :  { %v6110_v33 = vpack.c.bf16 %v4556_v16, %v4551_v61 }
0x120d   :  { %v4560_v38 = vpop.f32.mrb[56].mxu0 }
0x120e   :  { %v4561_v20 = vadd.f32 %v5180_v32, %v4560_v38  ;;  %v5855_v9 = vpop.f32.mrb[57].mxu0  ;;  %6111 = vmatprep.subr.bf16.mxu1 %v6110_v33 }
0x120f   :  { %6113 = vmatpush3.bf16.msra.mxu1 %v6110_v33 }
0x1210   :  { %5860 = vmatprep.subr.mxu1 %v4561_v20 }
0x1213   :  { %5861 = vmatpush3.msra.mxu1 %v4561_v20 }
0x1214   :  { %5863 = vmatmul.mubr.msk.f32.vlgmr.msra.gmra.mrb[56].mxu1 %vm2030_vm6, %v7154_v0  ;;  %6131 = vmatprep.subr.bf16.mxu1 %v6130_v13  ;;  %v5191_v0 = vld [vmem:[%s7511_s17 + $0x3] ss:$0 sm:$0xff] }
0x1215   :  { %6133 = vmatpush3.bf16.msra.mxu1 %v6130_v13 }
0x1216   :  { %6135 = vmatprep.subr.bf16.mxu1 %v6134_v5 }
0x1219   :  { %6137 = vmatpush3.bf16.msra.mxu1 %v6134_v5 }
0x12e7   :  { %v5864_v1 = vpop.f32.mrb[56].mxu1 }
0x12e8   :  { %v4630_v30 = vpop.f32.mrb[57].mxu1 }
0x12e9   :  { %5884 = vmatprep.mubr.msk.f32.mxu0 %vm1554_vm4, %v4630_v30 }
0x12ea   :  { %5885 = vmatmul.mubr.msk.f32.vlgmr.msra.gmra.mrb[58].mxu0 %vm1554_vm4, %v5864_v1 }
0x13bd   :  { %v5886_v18 = vpop.f32.mrb[58].mxu0 }
0x13be   :  { %v4814_v23 = vadd.f32 %v5886_v18, %v5191_v0  ;;  %v4796_v25 = vpop.f32.mrb[59].mxu0 }
0x13bf   :  { %v4813_v22 = vadd.f32 %v5191_v0, %v4796_v25 }
0x13c0   :  { %v4816_v55 = vmax.f32 %v4814_v23, 0.0 }
0x13c1   :  { %v4815_v21 = vmax.f32 %v4813_v22, 0.0 }
0x13c3   :  { %5895 = vmatprep.mubr.msk.f32.mxu1 %vm1554_vm4, %v4815_v21 }
0x13c4   :  { %5896 = vmatmul.mubr.msk.f32.vlgmr.msra.gmra.mrb[58].mxu1 %vm1554_vm4, %v4816_v55 }
0x1497   :  { %v5897_v12 = vpop.f32.mrb[58].mxu1 }
0x1498   :  { %v4908_v24 = vadd.f32 %v5897_v12, %v5193_v54  ;;  %v4902_v51 = vpop.f32.mrb[59].mxu1  ;;  %v5109_v12 = vld [vmem:[%s7514_s20 + $0x1] ss:$0 sm:$0xff] }
0x1499   :  { %v4903_v11 = vadd.f32 %v5193_v54, %v4902_v51 }
0x149a   :  { %v4914_v45 = vsel %vm1554_vm4, %v4908_v24, 0.0 }
0x149b   :  { %4915 = vadd.xlane.f32.xlu1 %v4914_v45  ;;  %v4911_v42 = vsel %vm1554_vm4, %v4903_v11, 0.0 }
0x149c   :  { %4912 = vadd.xlane.f32.xlu0 %v4911_v42 }
0x149f   :  { %2396 = vadd.xlane.f32.xlu1 %v2395_v49  ;;  %v5154_v49 = vld [vmem:[%s7515_s21 + $0x2] ss:$0 sm:$0xff] }
0x14a0   :  { %2393 = vadd.xlane.f32.xlu0 %v2392_v7 }
0x14a3   :  { %3242 = vadd.xlane.f32.xlu1 %v3241_v31 }
0x14a4   :  { %3239 = vadd.xlane.f32.xlu0 %v3238_v47 }
0x14a7   :  { %4084 = vadd.xlane.f32.xlu1 %v4083_v50 }
0x14a8   :  { %4081 = vadd.xlane.f32.xlu0 %v4080_v14 }
0x1528   :  { %v4916_v48 = vpop.xlane.xlu1 %4915 }
0x1529   :  { %v4918_v53 = vmul.f32 0.03125, %v4916_v48  ;;  %v4913_v19 = vpop.xlane.xlu0 %4912 }
0x152a   :  { %v4917_v32 = vmul.f32 0.03125, %v4913_v19 }
0x152b   :  { %v7420_v6 = vsub.f32 %v4908_v24, %v4918_v53  ;;  %v5197_v53 = vld [vmem:[%s7514_s20 + $0x3] ss:$0 sm:$0xff] }
0x152c   :  { %v7422_v61 = vsub.f32 %v4903_v11, %v4917_v32  ;;  %v2397_v16 = vpop.xlane.xlu1 %2396 }
0x152d   :  { %v2399_v2 = vmul.f32 0.03125, %v2397_v16  ;;  %v2394_v33 = vpop.xlane.xlu0 %2393  ;;  %v4922_v38 = vmul.f32 %v7420_v6, %v7420_v6  ;;  %v5199_v16 = vld [vmem:[%s7515_s21 + $0x3] ss:$0 sm:$0xff] }
0x152e   :  { %v2398_v20 = vmul.f32 0.03125, %v2394_v33  ;;  %v4921_v9 = vmul.f32 %v7422_v61, %v7422_v61 }
0x152f   :  { %v2401_v59 = vadd.f32 1e-05, %v2399_v2  ;;  %v4926_v63 = vsel %vm1554_vm4, %v4922_v38, 0.0 }
0x1530   :  { %v2400_v13 = vadd.f32 1e-05, %v2398_v20  ;;  %4927 = vadd.xlane.f32.xlu1 %v4926_v63  ;;  %v3243_v1 = vpop.xlane.xlu1 %3242  ;;  %v4923_v30 = vsel %vm1554_vm4, %v4921_v9, 0.0 }
0x1531   :  { %6201 = vrsqrt.f32 %v2401_v59  ;;  %v3245_v40 = vmul.f32 0.03125, %v3243_v1  ;;  %4924 = vadd.xlane.f32.xlu0 %v4923_v30  ;;  %v3240_v3 = vpop.xlane.xlu0 %3239 }
0x1532   :  { %6203 = vrsqrt.f32 %v2400_v13  ;;  %v3244_v5 = vmul.f32 0.03125, %v3240_v3 }
0x1533   :  { %v3247_v0 = vadd.f32 1e-05, %v3245_v40 }
0x1534   :  { %v3246_v18 = vadd.f32 1e-05, %v3244_v5  ;;  %v4085_v23 = vpop.xlane.xlu1 %4084 }
0x1535   :  { %6205 = vrsqrt.f32 %v3247_v0  ;;  %v4087_v25 = vmul.f32 0.03125, %v4085_v23  ;;  %v4082_v22 = vpop.xlane.xlu0 %4081 }
0x1536   :  { %6207 = vrsqrt.f32 %v3246_v18  ;;  %v4086_v21 = vmul.f32 0.03125, %v4082_v22 }
0x1537   :  { %v4089_v55 = vadd.f32 1e-05, %v4087_v25 }
0x1538   :  { %v4088_v28 = vadd.f32 1e-05, %v4086_v21 }
0x1539   :  { %6209 = vrsqrt.f32 %v4089_v55 }
0x153a   :  { %6211 = vrsqrt.f32 %v4088_v28 }
0x153b   :  { %v6202_v57 = vpop.eup %6201 }
0x153c   :  { %v6204_v4 = vpop.eup %6203  ;;  %v2405_v39 = vmul.f32 %v6202_v57, %v7383_v35  ;;  %v5111_v35 = vld [vmem:[%s7515_s21 + $0x1] ss:$0 sm:$0xff] }
0x153d   :  { %v2404_v54 = vmul.f32 %v6204_v4, %v7386_v37 }
0x153e   :  { %v2414_v36 = vmul.f32 %v5067_v27, %v2405_v39 }
0x153f   :  { %v6206_v10 = vpop.eup %6205  ;;  %v2413_v29 = vmul.f32 %v5067_v27, %v2404_v54 }
0x1540   :  { %v6208_v26 = vpop.eup %6207  ;;  %v2423_v24 = vadd.f32 %v5068_v34, %v2414_v36  ;;  %v3251_v51 = vmul.f32 %v6206_v10, %v7389_v44 }
0x1541   :  { %v2422_v11 = vadd.f32 %v5068_v34, %v2413_v29  ;;  %v3250_v8 = vmul.f32 %v6208_v26, %v7395_v46 }
0x1542   :  { %2425 = vst.msk [vmem:[%s7517_s23 + $0x8] sm:$0xff] %vm1554_vm4, %v2423_v24  ;;  %v3261_v37 = vmul.f32 %v5109_v12, %v3251_v51 }
0x1543   :  { %v6210_v45 = vpop.eup %6209  ;;  %2424 = vst.msk [vmem:[%s7517_s23] sm:$0xff] %vm1554_vm4, %v2422_v11  ;;  %v3260_v44 = vmul.f32 %v5109_v12, %v3250_v8 }
0x1544   :  { %v6212_v17 = vpop.eup %6211  ;;  %v3271_v42 = vadd.f32 %v5111_v35, %v3261_v37  ;;  %v4093_v46 = vmul.f32 %v6210_v45, %v7401_v52 }
0x1545   :  { %v3270_v15 = vadd.f32 %v5111_v35, %v3260_v44  ;;  %v4092_v43 = vmul.f32 %v6212_v17, %v7407_v62 }
0x1546   :  { %3273 = vst.msk [vmem:[%s7516_s22 + $0x8] sm:$0xff] %vm1554_vm4, %v3271_v42  ;;  %v4103_v7 = vmul.f32 %v5152_v41, %v4093_v46 }
0x1547   :  { %3272 = vst.msk [vmem:[%s7516_s22] sm:$0xff] %vm1554_vm4, %v3270_v15  ;;  %v4102_v56 = vmul.f32 %v5152_v41, %v4092_v43 }
0x1548   :  { %v4113_v52 = vadd.f32 %v5154_v49, %v4103_v7 }
0x1549   :  { %v4112_v31 = vadd.f32 %v5154_v49, %v4102_v56 }
0x154a   :  { %5156 = vst.msk [vmem:[%s7517_s23 + $0x18] sm:$0xff] %vm1554_vm4, %v4113_v52 }
0x154b   :  { %5155 = vst.msk [vmem:[%s7517_s23 + $0x10] sm:$0xff] %vm1554_vm4, %v4112_v31 }
0x15bd   :  { %v4928_v62 = vpop.xlane.xlu1 %4927 }
0x15be   :  { %v4930_v60 = vmul.f32 0.03125, %v4928_v62  ;;  %v4925_v47 = vpop.xlane.xlu0 %4924 }
0x15bf   :  { %v4929_v58 = vmul.f32 0.03125, %v4925_v47 }
0x15c0   :  { %v4932_v50 = vadd.f32 1e-05, %v4930_v60 }
0x15c1   :  { %v4931_v14 = vadd.f32 1e-05, %v4929_v58 }
0x15c2   :  { %6213 = vrsqrt.f32 %v4932_v50 }
0x15c3   :  { %6215 = vrsqrt.f32 %v4931_v14 }
0x15cc   :  { %v6214_v48 = vpop.eup %6213 }
0x15cd   :  { %v6216_v19 = vpop.eup %6215  ;;  %v4936_v32 = vmul.f32 %v6214_v48, %v7420_v6 }
0x15ce   :  { %v4935_v2 = vmul.f32 %v6216_v19, %v7422_v61 }
0x15cf   :  { %v4946_v33 = vmul.f32 %v5197_v53, %v4936_v32 }
0x15d0   :  { %v4945_v38 = vmul.f32 %v5197_v53, %v4935_v2 }
0x15d1   :  { %v4956_v20 = vadd.f32 %v5199_v16, %v4946_v33 }
0x15d2   :  { %v4955_v9 = vadd.f32 %v5199_v16, %v4945_v38 }
0x15d3   :  { %5201 = vst.msk [vmem:[%s7516_s22 + $0x18] sm:$0xff] %vm1554_vm4, %v4956_v20 }
0x15d4   :  { %5200 = vst.msk [vmem:[%s7516_s22 + $0x10] sm:$0xff] %vm1554_vm4, %v4955_v9 }
0x15d5   :  { %4968 = vsyncpa [#allocation3], 1 }
0x15d6   :  { %4969 = vsyncpa [#allocation5], 1 }
0x15d7   :  { %4970 = vsyncpa [#allocation8], 1 }

</bundles_post_ra>
